<compile_context>
chip_gen: v6e
topology: v6e:2x2x1
jax: 0.10.0
libtpu: 0.0.40
codegen_flags: <defaults>
</compile_context>

<pallas_src>
import numpy as np
import jax
import jax.numpy as jnp
from jax.experimental import pallas as pl
from jax.experimental.pallas import tpu as pltpu

NEG_SLOPE = 0.2
BN_EPS = 1e-5


def _leaky_relu(x):
    return jnp.where(x >= 0, x, NEG_SLOPE * x)


def _round_up(x, m):
    return ((x + m - 1) // m) * m


def _row_chunks(total, chunk):
    out, r = [], 0
    while r < total:
        out.append((r, min(chunk, total - r)))
        r += chunk
    return out


def _default_row_chunk():
    # 256-row chunks match the 256-wide MXU on v6e/v7x; 128 on 128-wide-MXU
    # generations (v5e and earlier).
    try:
        kind = jax.devices()[0].device_kind.lower()
    except Exception:
        return 256
    if ("v5" in kind and ("lite" in kind or "v5e" in kind)) or any(
            t in kind for t in ("v2", "v3", "v4")):
        return 128
    return 256


def multi_pixel_discriminator(feats_nchw, params, row_chunk=None):
    """feats_nchw: (nstage, N, Cin, H, W) f32.  Returns (N, nstage, H-4, W-4)."""
    w1, b1, w2, gamma, beta, w3 = params
    nstage, N, Cin, H, W = feats_nchw.shape
    ndf = w1.shape[-1]
    ndf2 = 2 * ndf
    assert H > 4 and W > 4, "need at least 5x5 spatial extent"
    Ho2, Wo2 = H - 4, W - 4
    M = N * H * W
    HW = H * W
    rc = int(row_chunk) if row_chunk is not None else _default_row_chunk()

    # Overscan row extents:
    #   acc rows [0, Macc) cover every valid conv2 output pixel,
    #   h1  rows [0, M1)  cover every row conv2 reads (max row offset 2*W),
    #   xh  rows [0, Mx)  cover every row conv1 reads (max row offset 2*W).
    # Valid output pixels never read rows contaminated by zero padding or
    # batch wraparound (largest needed input row for a valid pixel is M-1).
    Macc = _round_up(M - 4 * W - 4, 8)
    M1 = _round_up(Macc + 2 * W, 8)
    Mx = _round_up(M1 + 2 * W, 8)
    assert M - 4 * W - 4 <= Macc <= M and Mx + 4 >= M
    inv_cnt = 1.0 / float(N * Ho2 * Wo2)

    KX = 5 * Cin                    # 5 horizontal taps, channels in lanes
    KXp = _round_up(KX, 8)          # pad K so per-dy weight slices stay aligned
    K1 = 3 * ndf                    # conv1 emits 3 horizontal-tap slots of h1
    K2 = 3 * ndf                    # conv2 contraction per dy

    # ---- wrapper-side layout work (XLA) -------------------------------------
    # Channels-last input flattened to (M, Cin) rows with only the 5 horizontal
    # taps lane-concatenated.
    x = jnp.transpose(feats_nchw, (0, 1, 3, 4, 2)).reshape(nstage, M, Cin)
    x = jnp.pad(x, ((0, 0), (0, Mx + 4 - M), (0, 0)))
    xh = jnp.concatenate([x[:, j:j + Mx, :] for j in range(5)], axis=-1)
    xh = jnp.pad(xh, ((0, 0), (0, 0), (0, KXp - KX)))            # (S, Mx, KXp)

    # conv1 weights folded so that one dot per dy emits all 3 horizontal-tap
    # slots:  w1f[s, dy*KXp + j*Cin + c, dx*ndf + f] = w1[s, dy, j-dx, c, f].
    w1f = jnp.zeros((nstage, 3, KXp, K1), jnp.float32)
    for dx in range(3):
        for dxx in range(3):
            j = dx + dxx
            w1f = w1f.at[:, :, j * Cin:(j + 1) * Cin,
                         dx * ndf:(dx + 1) * ndf].set(w1[:, :, dxx])
    w1f = w1f.reshape(nstage, 3 * KXp, K1)

    # conv2 weights as one (9*ndf, ndf2) slab per stage; (dy, dx, g) flattens
    # to dy*3*ndf + dx*ndf + g, matching the h1 lane order dx*ndf + g.
    w2f = w2.reshape(nstage, 9 * ndf, ndf2)

    # Small per-channel params packed into one (S, 4, 3*ndf) array (one DMA).
    pad = K1 - ndf2
    vecs = jnp.concatenate(
        [jnp.tile(b1, (1, 1, 3)),
         jnp.pad(gamma, ((0, 0), (0, 0), (0, pad))),
         jnp.pad(beta, ((0, 0), (0, 0), (0, pad))),
         jnp.pad(w3, ((0, 0), (0, 0), (0, pad)))], axis=1)       # (S, 4, 3*ndf)

    # Compile-time validity mask over acc rows (valid conv2 output pixels).
    p_idx = np.arange(Macc)
    q = p_idx % HW
    valid = ((q // W) < Ho2) & ((q % W) < Wo2)
    mask = jnp.asarray(valid.astype(np.float32)[None, :])        # (1, Macc)

    def kernel(xh_ref, w1_ref, w2_ref, vec_ref, mask_ref, out_ref,
               h1_ref, acc_ref):
        b1c = vec_ref[0, 0:1, :]                    # (1, 3*ndf) bias tiled x3
        gam = vec_ref[0, 1:2, :ndf2]
        bet = vec_ref[0, 2:3, :ndf2]
        w3s = vec_ref[0, 3:4, :ndf2]

        # conv1 -> h1 in 3-horizontal-tap lane-concat layout:
        #   h1[p, dx*ndf + f] = LeakyReLU(conv1 output at pixel p + dx).
        # Three sublane-aligned row-shifted dots per chunk (offsets 0, W, 2W).
        for r, c in _row_chunks(M1, rc):
            acc1 = None
            for dy in range(3):
                d = jnp.dot(xh_ref[0, pl.ds(r + dy * W, c), :],
                            w1_ref[0, pl.ds(dy * KXp, KXp), :],
                            preferred_element_type=jnp.float32)
                acc1 = d if acc1 is None else acc1 + d
            h1_ref[pl.ds(r, c), :] = _leaky_relu(acc1 + b1c)

        # conv2 (3 aligned dots, K = 3*ndf) + single-pass masked BN statistics
        # reduced on the MXU via the constant mask row.
        s1 = jnp.zeros((1, ndf2), jnp.float32)
        s2 = jnp.zeros((1, ndf2), jnp.float32)
        for r, c in _row_chunks(Macc, rc):
            a = None
            for dy in range(3):
                d = jnp.dot(h1_ref[pl.ds(r + dy * W, c), :],
                            w2_ref[0, pl.ds(dy * K2, K2), :],
                            preferred_element_type=jnp.float32)
                a = d if a is None else a + d
            acc_ref[pl.ds(r, c), :] = a
            m = mask_ref[0:1, pl.ds(r, c)]                        # (1, c) const
            s1 = s1 + jax.lax.dot_general(
                m, a, (((1,), (0,)), ((), ())),
                preferred_element_type=jnp.float32)
            s2 = s2 + jax.lax.dot_general(
                m, a * a, (((1,), (0,)), ((), ())),
                preferred_element_type=jnp.float32)

        mean = s1 * inv_cnt
        inv_std = jax.lax.rsqrt(s2 * inv_cnt - mean * mean + BN_EPS)
        scale = inv_std * gam                       # gamma / std
        shift = bet - mean * scale                  # beta - mean*gamma/std

        # BN + LeakyReLU + 1x1 classifier + sigmoid; lane-major logits and a
        # single lane-dense store per stage.
        parts = []
        for r, c in _row_chunks(Macc, rc):
            h2 = _leaky_relu(acc_ref[pl.ds(r, c), :] * scale + shift)
            parts.append(jax.lax.dot_general(
                w3s, h2, (((1,), (1,)), ((), ())),
                preferred_element_type=jnp.float32))              # (1, c)
        logits = parts[0] if len(parts) == 1 else jnp.concatenate(parts, axis=1)
        out_ref[0, 0:1, :] = jax.nn.sigmoid(logits)

    out = pl.pallas_call(
        kernel,
        out_shape=jax.ShapeDtypeStruct((nstage, 1, Macc), jnp.float32),
        grid_spec=pltpu.PrefetchScalarGridSpec(
            num_scalar_prefetch=0,
            grid=(nstage,),
            in_specs=[
                pl.BlockSpec((1, Mx, KXp), lambda g: (g, 0, 0)),
                pl.BlockSpec((1, 3 * KXp, K1), lambda g: (g, 0, 0)),
                pl.BlockSpec((1, 9 * ndf, ndf2), lambda g: (g, 0, 0)),
                pl.BlockSpec((1, 4, K1), lambda g: (g, 0, 0)),
                pl.BlockSpec((1, Macc), lambda g: (0, 0)),
            ],
            out_specs=pl.BlockSpec((1, 1, Macc), lambda g: (g, 0, 0)),
            scratch_shapes=[pltpu.VMEM((M1, K1), jnp.float32),
                            pltpu.VMEM((Macc, ndf2), jnp.float32)],
        ),
        compiler_params=pltpu.CompilerParams(
            dimension_semantics=("parallel",)),
    )(xh, w1f, w2f, vecs, mask)

    # overscan rows -> (N, H, W) grid, crop to valid, stage axis -> channels
    # (equivalent to torch.cat(output, dim=1) in NCHW).
    out = jnp.pad(out[:, 0, :], ((0, 0), (0, M - Macc)))
    out = out.reshape(nstage, N, H, W)[:, :, :Ho2, :Wo2]
    return jnp.transpose(out, (1, 0, 2, 3))


def reference(feats_nchw, params):
    """Pure-JAX (XLA) reference of the PyTorch forward, NCHW."""
    w1, b1, w2, gamma, beta, w3 = params
    nstage = feats_nchw.shape[0]
    dn = ('NCHW', 'HWIO', 'NCHW')
    outs = []
    for s in range(nstage):
        x = feats_nchw[s]
        h = jax.lax.conv_general_dilated(x, w1[s], (1, 1), 'VALID',
                                         dimension_numbers=dn)
        h = h + b1[s, 0][None, :, None, None]
        h = jnp.where(h >= 0, h, NEG_SLOPE * h)
        h = jax.lax.conv_general_dilated(h, w2[s], (1, 1), 'VALID',
                                         dimension_numbers=dn)
        mean = jnp.mean(h, axis=(0, 2, 3), keepdims=True)
        var = jnp.mean((h - mean) ** 2, axis=(0, 2, 3), keepdims=True)
        h = (h - mean) / jnp.sqrt(var + BN_EPS)
        h = h * gamma[s, 0][None, :, None, None] + beta[s, 0][None, :, None, None]
        h = jnp.where(h >= 0, h, NEG_SLOPE * h)
        k3 = w3[s, 0].reshape(1, 1, -1, 1)
        h = jax.lax.conv_general_dilated(h, k3, (1, 1), 'VALID',
                                         dimension_numbers=dn)
        outs.append(jax.nn.sigmoid(h))
    return jnp.concatenate(outs, axis=1)


if __name__ == "__main__":
    nstage, N, Cin, H, W, ndf = 6, 2, 4, 16, 16, 32
    ndf2 = 2 * ndf

    key = jax.random.PRNGKey(0)
    k = jax.random.split(key, 7)
    feats = jax.random.normal(k[0], (nstage, N, Cin, H, W), jnp.float32)
    # Deterministic synthetic parameters (HWIO conv weights).
    w1 = 0.10 * jax.random.normal(k[1], (nstage, 3, 3, Cin, ndf), jnp.float32)
    b1 = 0.10 * jax.random.normal(k[2], (nstage, 1, ndf), jnp.float32)
    w2 = 0.05 * jax.random.normal(k[3], (nstage, 3, 3, ndf, ndf2), jnp.float32)
    gamma = 1.0 + 0.1 * jax.random.normal(k[4], (nstage, 1, ndf2), jnp.float32)
    beta = 0.10 * jax.random.normal(k[5], (nstage, 1, ndf2), jnp.float32)
    w3 = 0.10 * jax.random.normal(k[6], (nstage, 1, ndf2), jnp.float32)
    params = (w1, b1, w2, gamma, beta, w3)

    out = jax.block_until_ready(multi_pixel_discriminator(feats, params))
    ref = jax.block_until_ready(reference(feats, params))

    assert out.shape == (N, nstage, H - 4, W - 4), out.shape
    max_err = float(jnp.max(jnp.abs(out - ref)))
    assert jnp.allclose(out, ref, atol=1e-4, rtol=1e-4), max_err
    print("KERNEL_OK")
</pallas_src>

<mosaic_0001>
module attributes {stable_mosaic.version = 11 : i64} {
  func.func @kernel(%arg0: i32, %arg1: memref<1x512x24xf32, #tpu.memory_space<vmem>>, %arg2: memref<1x72x96xf32, #tpu.memory_space<vmem>>, %arg3: memref<1x288x64xf32, #tpu.memory_space<vmem>>, %arg4: memref<1x4x96xf32, #tpu.memory_space<vmem>>, %arg5: memref<1x448xf32, #tpu.memory_space<vmem>>, %arg6: memref<1x1x448xf32, #tpu.memory_space<vmem>>, %arg7: memref<480x96xf32, #tpu.memory_space<vmem>>, %arg8: memref<448x64xf32, #tpu.memory_space<vmem>>) attributes {dimension_semantics = [#tpu.dimension_semantics<parallel>], iteration_bounds = array<i64: 6>, scalar_prefetch = 0 : i64, scratch_operands = 2 : i64, tpu.core_type = #tpu.core_type<tc>, window_params = [{transform_indices = @transform_0, window_bounds = array<i64: 1, 512, 24>}, {transform_indices = @transform_1, window_bounds = array<i64: 1, 72, 96>}, {transform_indices = @transform_2, window_bounds = array<i64: 1, 288, 64>}, {transform_indices = @transform_3, window_bounds = array<i64: 1, 4, 96>}, {pipeline_mode = #tpu.pipeline_mode<synchronous>, transform_indices = @transform_4, window_bounds = array<i64: 1, 448>}, {transform_indices = @transform_5, window_bounds = array<i64: 1, 1, 448>}]} {
    %c0 = arith.constant 0 : index
    %c0_0 = arith.constant 0 : index
    %c0_1 = arith.constant 0 : index
    %0 = vector.load %arg4[%c0, %c0_0, %c0_1] : memref<1x4x96xf32, #tpu.memory_space<vmem>>, vector<1x1x96xf32>
    %1 = vector.shape_cast %0 : vector<1x1x96xf32> to vector<1x96xf32>
    %c0_2 = arith.constant 0 : index
    %c1 = arith.constant 1 : index
    %c0_3 = arith.constant 0 : index
    %2 = vector.load %arg4[%c0_2, %c1, %c0_3] : memref<1x4x96xf32, #tpu.memory_space<vmem>>, vector<1x1x64xf32>
    %3 = vector.shape_cast %2 : vector<1x1x64xf32> to vector<1x64xf32>
    %c0_4 = arith.constant 0 : index
    %c2 = arith.constant 2 : index
    %c0_5 = arith.constant 0 : index
    %4 = vector.load %arg4[%c0_4, %c2, %c0_5] : memref<1x4x96xf32, #tpu.memory_space<vmem>>, vector<1x1x64xf32>
    %5 = vector.shape_cast %4 : vector<1x1x64xf32> to vector<1x64xf32>
    %c0_6 = arith.constant 0 : index
    %c3 = arith.constant 3 : index
    %c0_7 = arith.constant 0 : index
    %6 = vector.load %arg4[%c0_6, %c3, %c0_7] : memref<1x4x96xf32, #tpu.memory_space<vmem>>, vector<1x1x64xf32>
    %7 = vector.shape_cast %6 : vector<1x1x64xf32> to vector<1x64xf32>
    %c0_8 = arith.constant 0 : index
    %c0_9 = arith.constant 0 : index
    %c0_10 = arith.constant 0 : index
    %8 = vector.load %arg1[%c0_8, %c0_9, %c0_10] : memref<1x512x24xf32, #tpu.memory_space<vmem>>, vector<1x256x24xf32>
    %9 = vector.shape_cast %8 : vector<1x256x24xf32> to vector<256x24xf32>
    %c0_11 = arith.constant 0 : index
    %c0_12 = arith.constant 0 : index
    %c0_13 = arith.constant 0 : index
    %10 = vector.load %arg2[%c0_11, %c0_12, %c0_13] : memref<1x72x96xf32, #tpu.memory_space<vmem>>, vector<1x24x96xf32>
    %11 = vector.shape_cast %10 : vector<1x24x96xf32> to vector<24x96xf32>
    %cst = arith.constant dense<0.000000e+00> : vector<256x96xf32>
    %12 = tpu.matmul %9, %11, %cst {dimension_numbers = #tpu.dot_dimension_numbers<[1], [0], [0], [1], [0, 0, 1, 1], [], []>} : vector<256x24xf32>, vector<24x96xf32>, vector<256x96xf32> -> vector<256x96xf32>
    %c0_14 = arith.constant 0 : index
    %c16 = arith.constant 16 : index
    %c0_15 = arith.constant 0 : index
    %13 = vector.load %arg1[%c0_14, %c16, %c0_15] : memref<1x512x24xf32, #tpu.memory_space<vmem>>, vector<1x256x24xf32>
    %14 = vector.shape_cast %13 : vector<1x256x24xf32> to vector<256x24xf32>
    %c0_16 = arith.constant 0 : index
    %c24 = arith.constant 24 : index
    %c0_17 = arith.constant 0 : index
    %15 = vector.load %arg2[%c0_16, %c24, %c0_17] : memref<1x72x96xf32, #tpu.memory_space<vmem>>, vector<1x24x96xf32>
    %16 = vector.shape_cast %15 : vector<1x24x96xf32> to vector<24x96xf32>
    %cst_18 = arith.constant dense<0.000000e+00> : vector<256x96xf32>
    %17 = tpu.matmul %14, %16, %cst_18 {dimension_numbers = #tpu.dot_dimension_numbers<[1], [0], [0], [1], [0, 0, 1, 1], [], []>} : vector<256x24xf32>, vector<24x96xf32>, vector<256x96xf32> -> vector<256x96xf32>
    %18 = arith.addf %12, %17 : vector<256x96xf32>
    %c0_19 = arith.constant 0 : index
    %c32 = arith.constant 32 : index
    %c0_20 = arith.constant 0 : index
    %19 = vector.load %arg1[%c0_19, %c32, %c0_20] : memref<1x512x24xf32, #tpu.memory_space<vmem>>, vector<1x256x24xf32>
    %20 = vector.shape_cast %19 : vector<1x256x24xf32> to vector<256x24xf32>
    %c0_21 = arith.constant 0 : index
    %c48 = arith.constant 48 : index
    %c0_22 = arith.constant 0 : index
    %21 = vector.load %arg2[%c0_21, %c48, %c0_22] : memref<1x72x96xf32, #tpu.memory_space<vmem>>, vector<1x24x96xf32>
    %22 = vector.shape_cast %21 : vector<1x24x96xf32> to vector<24x96xf32>
    %cst_23 = arith.constant dense<0.000000e+00> : vector<256x96xf32>
    %23 = tpu.matmul %20, %22, %cst_23 {dimension_numbers = #tpu.dot_dimension_numbers<[1], [0], [0], [1], [0, 0, 1, 1], [], []>} : vector<256x24xf32>, vector<24x96xf32>, vector<256x96xf32> -> vector<256x96xf32>
    %24 = arith.addf %18, %23 : vector<256x96xf32>
    %25 = vector.broadcast %1 : vector<1x96xf32> to vector<256x96xf32>
    %26 = arith.addf %24, %25 : vector<256x96xf32>
    %cst_24 = arith.constant 0.000000e+00 : f32
    %27 = vector.broadcast %cst_24 : f32 to vector<256x96xf32>
    %28 = arith.cmpf oge, %26, %27 : vector<256x96xf32>
    %cst_25 = arith.constant 2.000000e-01 : f32
    %29 = vector.broadcast %cst_25 : f32 to vector<256x96xf32>
    %30 = arith.mulf %29, %26 : vector<256x96xf32>
    %31 = arith.select %28, %26, %30 : vector<256x96xi1>, vector<256x96xf32>
    %c0_26 = arith.constant 0 : index
    %c0_27 = arith.constant 0 : index
    %32 = vector.load %arg7[%c0_26, %c0_27] : memref<480x96xf32, #tpu.memory_space<vmem>>, vector<256x96xf32>
    tpu.vector_store %arg7[%c0_26, %c0_27], %31 {strides = array<i32>} : memref<480x96xf32, #tpu.memory_space<vmem>>, vector<256x96xf32>,
    %c0_28 = arith.constant 0 : index
    %c256 = arith.constant 256 : index
    %c0_29 = arith.constant 0 : index
    %33 = vector.load %arg1[%c0_28, %c256, %c0_29] : memref<1x512x24xf32, #tpu.memory_space<vmem>>, vector<1x224x24xf32>
    %34 = vector.shape_cast %33 : vector<1x224x24xf32> to vector<224x24xf32>
    %c0_30 = arith.constant 0 : index
    %c0_31 = arith.constant 0 : index
    %c0_32 = arith.constant 0 : index
    %35 = vector.load %arg2[%c0_30, %c0_31, %c0_32] : memref<1x72x96xf32, #tpu.memory_space<vmem>>, vector<1x24x96xf32>
    %36 = vector.shape_cast %35 : vector<1x24x96xf32> to vector<24x96xf32>
    %cst_33 = arith.constant dense<0.000000e+00> : vector<224x96xf32>
    %37 = tpu.matmul %34, %36, %cst_33 {dimension_numbers = #tpu.dot_dimension_numbers<[1], [0], [0], [1], [0, 0, 1, 1], [], []>} : vector<224x24xf32>, vector<24x96xf32>, vector<224x96xf32> -> vector<224x96xf32>
    %c0_34 = arith.constant 0 : index
    %c272 = arith.constant 272 : index
    %c0_35 = arith.constant 0 : index
    %38 = vector.load %arg1[%c0_34, %c272, %c0_35] : memref<1x512x24xf32, #tpu.memory_space<vmem>>, vector<1x224x24xf32>
    %39 = vector.shape_cast %38 : vector<1x224x24xf32> to vector<224x24xf32>
    %c0_36 = arith.constant 0 : index
    %c24_37 = arith.constant 24 : index
    %c0_38 = arith.constant 0 : index
    %40 = vector.load %arg2[%c0_36, %c24_37, %c0_38] : memref<1x72x96xf32, #tpu.memory_space<vmem>>, vector<1x24x96xf32>
    %41 = vector.shape_cast %40 : vector<1x24x96xf32> to vector<24x96xf32>
    %cst_39 = arith.constant dense<0.000000e+00> : vector<224x96xf32>
    %42 = tpu.matmul %39, %41, %cst_39 {dimension_numbers = #tpu.dot_dimension_numbers<[1], [0], [0], [1], [0, 0, 1, 1], [], []>} : vector<224x24xf32>, vector<24x96xf32>, vector<224x96xf32> -> vector<224x96xf32>
    %43 = arith.addf %37, %42 : vector<224x96xf32>
    %c0_40 = arith.constant 0 : index
    %c288 = arith.constant 288 : index
    %c0_41 = arith.constant 0 : index
    %44 = vector.load %arg1[%c0_40, %c288, %c0_41] : memref<1x512x24xf32, #tpu.memory_space<vmem>>, vector<1x224x24xf32>
    %45 = vector.shape_cast %44 : vector<1x224x24xf32> to vector<224x24xf32>
    %c0_42 = arith.constant 0 : index
    %c48_43 = arith.constant 48 : index
    %c0_44 = arith.constant 0 : index
    %46 = vector.load %arg2[%c0_42, %c48_43, %c0_44] : memref<1x72x96xf32, #tpu.memory_space<vmem>>, vector<1x24x96xf32>
    %47 = vector.shape_cast %46 : vector<1x24x96xf32> to vector<24x96xf32>
    %cst_45 = arith.constant dense<0.000000e+00> : vector<224x96xf32>
    %48 = tpu.matmul %45, %47, %cst_45 {dimension_numbers = #tpu.dot_dimension_numbers<[1], [0], [0], [1], [0, 0, 1, 1], [], []>} : vector<224x24xf32>, vector<24x96xf32>, vector<224x96xf32> -> vector<224x96xf32>
    %49 = arith.addf %43, %48 : vector<224x96xf32>
    %50 = vector.broadcast %1 : vector<1x96xf32> to vector<224x96xf32>
    %51 = arith.addf %49, %50 : vector<224x96xf32>
    %cst_46 = arith.constant 0.000000e+00 : f32
    %52 = vector.broadcast %cst_46 : f32 to vector<224x96xf32>
    %53 = arith.cmpf oge, %51, %52 : vector<224x96xf32>
    %cst_47 = arith.constant 2.000000e-01 : f32
    %54 = vector.broadcast %cst_47 : f32 to vector<224x96xf32>
    %55 = arith.mulf %54, %51 : vector<224x96xf32>
    %56 = arith.select %53, %51, %55 : vector<224x96xi1>, vector<224x96xf32>
    %c256_48 = arith.constant 256 : index
    %c0_49 = arith.constant 0 : index
    %57 = vector.load %arg7[%c256_48, %c0_49] : memref<480x96xf32, #tpu.memory_space<vmem>>, vector<224x96xf32>
    tpu.vector_store %arg7[%c256_48, %c0_49], %56 {strides = array<i32>} : memref<480x96xf32, #tpu.memory_space<vmem>>, vector<224x96xf32>,
    %cst_50 = arith.constant 0.000000e+00 : f32
    %58 = vector.broadcast %cst_50 : f32 to vector<1x64xf32>
    %cst_51 = arith.constant 0.000000e+00 : f32
    %59 = vector.broadcast %cst_51 : f32 to vector<1x64xf32>
    %c0_52 = arith.constant 0 : index
    %c0_53 = arith.constant 0 : index
    %60 = vector.load %arg7[%c0_52, %c0_53] : memref<480x96xf32, #tpu.memory_space<vmem>>, vector<256x96xf32>
    %c0_54 = arith.constant 0 : index
    %c0_55 = arith.constant 0 : index
    %c0_56 = arith.constant 0 : index
    %61 = vector.load %arg3[%c0_54, %c0_55, %c0_56] : memref<1x288x64xf32, #tpu.memory_space<vmem>>, vector<1x96x64xf32>
    %62 = vector.shape_cast %61 : vector<1x96x64xf32> to vector<96x64xf32>
    %cst_57 = arith.constant dense<0.000000e+00> : vector<256x64xf32>
    %63 = tpu.matmul %60, %62, %cst_57 {dimension_numbers = #tpu.dot_dimension_numbers<[1], [0], [0], [1], [0, 0, 1, 1], [], []>} : vector<256x96xf32>, vector<96x64xf32>, vector<256x64xf32> -> vector<256x64xf32>
    %c16_58 = arith.constant 16 : index
    %c0_59 = arith.constant 0 : index
    %64 = vector.load %arg7[%c16_58, %c0_59] : memref<480x96xf32, #tpu.memory_space<vmem>>, vector<256x96xf32>
    %c0_60 = arith.constant 0 : index
    %c96 = arith.constant 96 : index
    %c0_61 = arith.constant 0 : index
    %65 = vector.load %arg3[%c0_60, %c96, %c0_61] : memref<1x288x64xf32, #tpu.memory_space<vmem>>, vector<1x96x64xf32>
    %66 = vector.shape_cast %65 : vector<1x96x64xf32> to vector<96x64xf32>
    %cst_62 = arith.constant dense<0.000000e+00> : vector<256x64xf32>
    %67 = tpu.matmul %64, %66, %cst_62 {dimension_numbers = #tpu.dot_dimension_numbers<[1], [0], [0], [1], [0, 0, 1, 1], [], []>} : vector<256x96xf32>, vector<96x64xf32>, vector<256x64xf32> -> vector<256x64xf32>
    %68 = arith.addf %63, %67 : vector<256x64xf32>
    %c32_63 = arith.constant 32 : index
    %c0_64 = arith.constant 0 : index
    %69 = vector.load %arg7[%c32_63, %c0_64] : memref<480x96xf32, #tpu.memory_space<vmem>>, vector<256x96xf32>
    %c0_65 = arith.constant 0 : index
    %c192 = arith.constant 192 : index
    %c0_66 = arith.constant 0 : index
    %70 = vector.load %arg3[%c0_65, %c192, %c0_66] : memref<1x288x64xf32, #tpu.memory_space<vmem>>, vector<1x96x64xf32>
    %71 = vector.shape_cast %70 : vector<1x96x64xf32> to vector<96x64xf32>
    %cst_67 = arith.constant dense<0.000000e+00> : vector<256x64xf32>
    %72 = tpu.matmul %69, %71, %cst_67 {dimension_numbers = #tpu.dot_dimension_numbers<[1], [0], [0], [1], [0, 0, 1, 1], [], []>} : vector<256x96xf32>, vector<96x64xf32>, vector<256x64xf32> -> vector<256x64xf32>
    %73 = arith.addf %68, %72 : vector<256x64xf32>
    %c0_68 = arith.constant 0 : index
    %c0_69 = arith.constant 0 : index
    %74 = vector.load %arg8[%c0_68, %c0_69] : memref<448x64xf32, #tpu.memory_space<vmem>>, vector<256x64xf32>
    tpu.vector_store %arg8[%c0_68, %c0_69], %73 {strides = array<i32>} : memref<448x64xf32, #tpu.memory_space<vmem>>, vector<256x64xf32>,
    %c0_70 = arith.constant 0 : index
    %c0_71 = arith.constant 0 : index
    %75 = vector.load %arg5[%c0_70, %c0_71] : memref<1x448xf32, #tpu.memory_space<vmem>>, vector<1x256xf32>
    %cst_72 = arith.constant dense<0.000000e+00> : vector<1x64xf32>
    %76 = tpu.matmul %75, %73, %cst_72 {dimension_numbers = #tpu.dot_dimension_numbers<[1], [0], [0], [1], [0, 0, 1, 1], [], []>} : vector<1x256xf32>, vector<256x64xf32>, vector<1x64xf32> -> vector<1x64xf32>
    %77 = arith.addf %58, %76 : vector<1x64xf32>
    %78 = arith.mulf %73, %73 : vector<256x64xf32>
    %cst_73 = arith.constant dense<0.000000e+00> : vector<1x64xf32>
    %79 = tpu.matmul %75, %78, %cst_73 {dimension_numbers = #tpu.dot_dimension_numbers<[1], [0], [0], [1], [0, 0, 1, 1], [], []>} : vector<1x256xf32>, vector<256x64xf32>, vector<1x64xf32> -> vector<1x64xf32>
    %80 = arith.addf %59, %79 : vector<1x64xf32>
    %c256_74 = arith.constant 256 : index
    %c0_75 = arith.constant 0 : index
    %81 = vector.load %arg7[%c256_74, %c0_75] : memref<480x96xf32, #tpu.memory_space<vmem>>, vector<192x96xf32>
    %c0_76 = arith.constant 0 : index
    %c0_77 = arith.constant 0 : index
    %c0_78 = arith.constant 0 : index
    %82 = vector.load %arg3[%c0_76, %c0_77, %c0_78] : memref<1x288x64xf32, #tpu.memory_space<vmem>>, vector<1x96x64xf32>
    %83 = vector.shape_cast %82 : vector<1x96x64xf32> to vector<96x64xf32>
    %cst_79 = arith.constant dense<0.000000e+00> : vector<192x64xf32>
    %84 = tpu.matmul %81, %83, %cst_79 {dimension_numbers = #tpu.dot_dimension_numbers<[1], [0], [0], [1], [0, 0, 1, 1], [], []>} : vector<192x96xf32>, vector<96x64xf32>, vector<192x64xf32> -> vector<192x64xf32>
    %c272_80 = arith.constant 272 : index
    %c0_81 = arith.constant 0 : index
    %85 = vector.load %arg7[%c272_80, %c0_81] : memref<480x96xf32, #tpu.memory_space<vmem>>, vector<192x96xf32>
    %c0_82 = arith.constant 0 : index
    %c96_83 = arith.constant 96 : index
    %c0_84 = arith.constant 0 : index
    %86 = vector.load %arg3[%c0_82, %c96_83, %c0_84] : memref<1x288x64xf32, #tpu.memory_space<vmem>>, vector<1x96x64xf32>
    %87 = vector.shape_cast %86 : vector<1x96x64xf32> to vector<96x64xf32>
    %cst_85 = arith.constant dense<0.000000e+00> : vector<192x64xf32>
    %88 = tpu.matmul %85, %87, %cst_85 {dimension_numbers = #tpu.dot_dimension_numbers<[1], [0], [0], [1], [0, 0, 1, 1], [], []>} : vector<192x96xf32>, vector<96x64xf32>, vector<192x64xf32> -> vector<192x64xf32>
    %89 = arith.addf %84, %88 : vector<192x64xf32>
    %c288_86 = arith.constant 288 : index
    %c0_87 = arith.constant 0 : index
    %90 = vector.load %arg7[%c288_86, %c0_87] : memref<480x96xf32, #tpu.memory_space<vmem>>, vector<192x96xf32>
    %c0_88 = arith.constant 0 : index
    %c192_89 = arith.constant 192 : index
    %c0_90 = arith.constant 0 : index
    %91 = vector.load %arg3[%c0_88, %c192_89, %c0_90] : memref<1x288x64xf32, #tpu.memory_space<vmem>>, vector<1x96x64xf32>
    %92 = vector.shape_cast %91 : vector<1x96x64xf32> to vector<96x64xf32>
    %cst_91 = arith.constant dense<0.000000e+00> : vector<192x64xf32>
    %93 = tpu.matmul %90, %92, %cst_91 {dimension_numbers = #tpu.dot_dimension_numbers<[1], [0], [0], [1], [0, 0, 1, 1], [], []>} : vector<192x96xf32>, vector<96x64xf32>, vector<192x64xf32> -> vector<192x64xf32>
    %94 = arith.addf %89, %93 : vector<192x64xf32>
    %c256_92 = arith.constant 256 : index
    %c0_93 = arith.constant 0 : index
    %95 = vector.load %arg8[%c256_92, %c0_93] : memref<448x64xf32, #tpu.memory_space<vmem>>, vector<192x64xf32>
    tpu.vector_store %arg8[%c256_92, %c0_93], %94 {strides = array<i32>} : memref<448x64xf32, #tpu.memory_space<vmem>>, vector<192x64xf32>,
    %c0_94 = arith.constant 0 : index
    %c256_95 = arith.constant 256 : index
    %96 = vector.load %arg5[%c0_94, %c256_95] : memref<1x448xf32, #tpu.memory_space<vmem>>, vector<1x192xf32>
    %cst_96 = arith.constant dense<0.000000e+00> : vector<1x64xf32>
    %97 = tpu.matmul %96, %94, %cst_96 {dimension_numbers = #tpu.dot_dimension_numbers<[1], [0], [0], [1], [0, 0, 1, 1], [], []>} : vector<1x192xf32>, vector<192x64xf32>, vector<1x64xf32> -> vector<1x64xf32>
    %98 = arith.addf %77, %97 : vector<1x64xf32>
    %99 = arith.mulf %94, %94 : vector<192x64xf32>
    %cst_97 = arith.constant dense<0.000000e+00> : vector<1x64xf32>
    %100 = tpu.matmul %96, %99, %cst_97 {dimension_numbers = #tpu.dot_dimension_numbers<[1], [0], [0], [1], [0, 0, 1, 1], [], []>} : vector<1x192xf32>, vector<192x64xf32>, vector<1x64xf32> -> vector<1x64xf32>
    %101 = arith.addf %80, %100 : vector<1x64xf32>
    %cst_98 = arith.constant 0.00347222225 : f32
    %102 = vector.broadcast %cst_98 : f32 to vector<1x64xf32>
    %103 = arith.mulf %98, %102 : vector<1x64xf32>
    %cst_99 = arith.constant 0.00347222225 : f32
    %104 = vector.broadcast %cst_99 : f32 to vector<1x64xf32>
    %105 = arith.mulf %101, %104 : vector<1x64xf32>
    %106 = arith.mulf %103, %103 : vector<1x64xf32>
    %107 = arith.subf %105, %106 : vector<1x64xf32>
    %cst_100 = arith.constant 9.99999974E-6 : f32
    %108 = vector.broadcast %cst_100 : f32 to vector<1x64xf32>
    %109 = arith.addf %107, %108 : vector<1x64xf32>
    %110 = math.rsqrt %109 : vector<1x64xf32>
    %111 = arith.mulf %110, %3 : vector<1x64xf32>
    %112 = arith.mulf %103, %111 : vector<1x64xf32>
    %113 = arith.subf %5, %112 : vector<1x64xf32>
    %c0_101 = arith.constant 0 : index
    %c0_102 = arith.constant 0 : index
    %114 = vector.load %arg8[%c0_101, %c0_102] : memref<448x64xf32, #tpu.memory_space<vmem>>, vector<256x64xf32>
    %115 = vector.broadcast %111 : vector<1x64xf32> to vector<256x64xf32>
    %116 = arith.mulf %114, %115 : vector<256x64xf32>
    %117 = vector.broadcast %113 : vector<1x64xf32> to vector<256x64xf32>
    %118 = arith.addf %116, %117 : vector<256x64xf32>
    %cst_103 = arith.constant 0.000000e+00 : f32
    %119 = vector.broadcast %cst_103 : f32 to vector<256x64xf32>
    %120 = arith.cmpf oge, %118, %119 : vector<256x64xf32>
    %cst_104 = arith.constant 2.000000e-01 : f32
    %121 = vector.broadcast %cst_104 : f32 to vector<256x64xf32>
    %122 = arith.mulf %121, %118 : vector<256x64xf32>
    %123 = arith.select %120, %118, %122 : vector<256x64xi1>, vector<256x64xf32>
    %cst_105 = arith.constant dense<0.000000e+00> : vector<1x256xf32>
    %124 = tpu.matmul %7, %123, %cst_105 {dimension_numbers = #tpu.dot_dimension_numbers<[1], [1], [0], [0], [0, 0, 1, 0], [], []>} : vector<1x64xf32>, vector<256x64xf32>, vector<1x256xf32> -> vector<1x256xf32>
    %c256_106 = arith.constant 256 : index
    %c0_107 = arith.constant 0 : index
    %125 = vector.load %arg8[%c256_106, %c0_107] : memref<448x64xf32, #tpu.memory_space<vmem>>, vector<192x64xf32>
    %126 = vector.broadcast %111 : vector<1x64xf32> to vector<192x64xf32>
    %127 = arith.mulf %125, %126 : vector<192x64xf32>
    %128 = vector.broadcast %113 : vector<1x64xf32> to vector<192x64xf32>
    %129 = arith.addf %127, %128 : vector<192x64xf32>
    %cst_108 = arith.constant 0.000000e+00 : f32
    %130 = vector.broadcast %cst_108 : f32 to vector<192x64xf32>
    %131 = arith.cmpf oge, %129, %130 : vector<192x64xf32>
    %cst_109 = arith.constant 2.000000e-01 : f32
    %132 = vector.broadcast %cst_109 : f32 to vector<192x64xf32>
    %133 = arith.mulf %132, %129 : vector<192x64xf32>
    %134 = arith.select %131, %129, %133 : vector<192x64xi1>, vector<192x64xf32>
    %cst_110 = arith.constant dense<0.000000e+00> : vector<1x192xf32>
    %135 = tpu.matmul %7, %134, %cst_110 {dimension_numbers = #tpu.dot_dimension_numbers<[1], [1], [0], [0], [0, 0, 1, 0], [], []>} : vector<1x64xf32>, vector<192x64xf32>, vector<1x192xf32> -> vector<1x192xf32>
    %136 = tpu.concatenate %124, %135 in 1 : vector<1x256xf32>, vector<1x192xf32> -> vector<1x448xf32>
    %137 = arith.negf %136 : vector<1x448xf32>
    %138 = math.exp %137 : vector<1x448xf32>
    %cst_111 = arith.constant 1.000000e+00 : f32
    %139 = vector.broadcast %cst_111 : f32 to vector<1x448xf32>
    %140 = arith.addf %139, %138 : vector<1x448xf32>
    %141 = arith.divf %139, %140 : vector<1x448xf32>
    %c0_112 = arith.constant 0 : index
    %c0_113 = arith.constant 0 : index
    %c0_114 = arith.constant 0 : index
    %142 = vector.load %arg6[%c0_112, %c0_113, %c0_114] : memref<1x1x448xf32, #tpu.memory_space<vmem>>, vector<1x1x448xf32>
    %143 = vector.shape_cast %142 : vector<1x1x448xf32> to vector<1x448xf32>
    %144 = vector.shape_cast %141 : vector<1x448xf32> to vector<1x1x448xf32>
    tpu.vector_store %arg6[%c0_112, %c0_113, %c0_114], %144 {strides = array<i32>} : memref<1x1x448xf32, #tpu.memory_space<vmem>>, vector<1x1x448xf32>,
    return
  }
  func.func @transform_0(%arg0: i32) -> (i32, i32, i32) {
    %c0_i32 = arith.constant 0 : i32
    %c0_i32_0 = arith.constant 0 : i32
    %c0_i32_1 = arith.constant 0 : i32
    return %arg0, %c0_i32, %c0_i32_0 : i32, i32, i32
  }
  func.func @transform_1(%arg0: i32) -> (i32, i32, i32) {
    %c0_i32 = arith.constant 0 : i32
    %c0_i32_0 = arith.constant 0 : i32
    %c0_i32_1 = arith.constant 0 : i32
    return %arg0, %c0_i32, %c0_i32_0 : i32, i32, i32
  }
  func.func @transform_2(%arg0: i32) -> (i32, i32, i32) {
    %c0_i32 = arith.constant 0 : i32
    %c0_i32_0 = arith.constant 0 : i32
    %c0_i32_1 = arith.constant 0 : i32
    return %arg0, %c0_i32, %c0_i32_0 : i32, i32, i32
  }
  func.func @transform_3(%arg0: i32) -> (i32, i32, i32) {
    %c0_i32 = arith.constant 0 : i32
    %c0_i32_0 = arith.constant 0 : i32
    %c0_i32_1 = arith.constant 0 : i32
    return %arg0, %c0_i32, %c0_i32_0 : i32, i32, i32
  }
  func.func @transform_4(%arg0: i32) -> (i32, i32) {
    %c0_i32 = arith.constant 0 : i32
    %c0_i32_0 = arith.constant 0 : i32
    %c0_i32_1 = arith.constant 0 : i32
    return %c0_i32, %c0_i32_0 : i32, i32
  }
  func.func @transform_5(%arg0: i32) -> (i32, i32, i32) {
    %c0_i32 = arith.constant 0 : i32
    %c0_i32_0 = arith.constant 0 : i32
    %c0_i32_1 = arith.constant 0 : i32
    return %arg0, %c0_i32, %c0_i32_0 : i32, i32, i32
  }
}

</mosaic_0001>

<bundles_post_ra>
// kernel: tpu_custom_call.1
= control target key start
LH: loop header
LB: loop body
LE: loop exit
PB: predicated region body
PF: predicated region fallthrough
CT: control target
= control target key end

     0   :  { %10 = vsyncpa [#allocation5], 0  ;;  %s10077_s0 = inlined_call_operand.vmem [shape: f32[6,512,24], index: 0, kind: input, shape index: {}]   ;;  %s10078_s1 = inlined_call_operand.vmem [shape: f32[6,72,96], index: 1, kind: input, shape index: {}]   ;;  %s10079_s2 = inlined_call_operand.vmem [shape: f32[6,288,64], index: 2, kind: input, shape index: {}]   ;;  %s10080_s3 = inlined_call_operand.vmem [shape: f32[6,4,96], index: 3, kind: input, shape index: {}]   ;;  %s10081_s4 = inlined_call_operand.vmem [shape: f32[1,448], index: 4, kind: input, shape index: {}]   ;;  %s10082_s5 = inlined_call_operand.hbm [shape: f32[6,1,448], index: 5, kind: output, shape index: {}]  }
   0x1   :  { %12 = vsyncpa [#allocation5 + $0x1], 0  ;;  %s7366_s18 = smov 0   ;;  %s7368_s19 = smov 0  }
   0x2   :  { %s7370_s20 = smov 0   ;;  %s7372_s21 = smov 0  }
   0x3 LB: > { %s7387_s22 = sadd.s32 4294967295, %s7331_s21   ;;  %s5528_s23 = sadd.s32 4294967294, %s7331_s21   ;;  %s7331_s21 = sphi %s7372_s21, %s10270_s21   ;;  %s7327_s20 = sphi %s7370_s20, %s10269_s20   ;;  %s7323_s19 = sphi %s7368_s19, %s10268_s19   ;;  %s7319_s18 = sphi %s7366_s18, %s10267_s18  }
   0x4   : > { %s7391_s24 = sadd.s32 1, %s7331_s21   ;;  %s150_s25 = sadd.s32 1, %s7327_s20 }
   0x5   : > { %s147_s26 = ssub.s32 %s7331_s21, %s7391_s24  ;;  %p160_p0 = scmp.ne.s32.totalorder %s7327_s20, %s7323_s19 }
   0x6   : > { %p148_p1 = scmp.eq.s32.totalorder %s147_s26, 0  ;;  %p161_p2 = scmp.eq.s32.totalorder %s7387_s22, 5 }
   0x7   : > { %p166_p3 = scmp.ne.s32.totalorder %s7323_s19, %s7319_s18  ;;  %p167_p4 = scmp.eq.s32.totalorder %s5528_s23, 5 }
   0x8   : > { %s7402_s27 = scalar_select %p148_p1, %s7327_s20, %s150_s25  }
   0x9   : > { %p7404_p5 = por %p161_p2, %p160_p0  ;;  %p7408_p6 = por %p167_p4, %p166_p3 }
   0xa   : > { %p5531_p7 = scmp.ge.s32.totalorder %s7331_s21, 1  ;;  %p219_p8 = scmp.lt.s32.totalorder %s7331_s21, 7 }
   0xc   : > { %p220_p9 = pnand %p5531_p7, %p219_p8 }
   0xe   : > { %223 = sbr.rel (%p220_p9) target bundleno = 1343 (0x53f), region = 40 }
  0x13   : > { %p261_p10 = scmp.lt.s32.totalorder %s7387_s22, 5  ;;  %vm324_vm0 = vcmask 195584   ;;  %vm1397_vm2 = vcmask 785408   ;;  %s5957_s12 = sshll.u32 %s7387_s22, 6 }
  0x14   : > { %s7335_s26 = smov [#allocation4]  }
  0x15   : > { %s7416_s30 = scalar_select %p261_p10, %s7387_s22, 5 }
  0x16   : > { %s7275_s22 = sshll.u32 %s7335_s26, 4  ;;  %s7276_s22 = int_to_ptr.vmem [resolvable:$false] %s7275_s22 }
  0x17   : > { %s5956_s6 = sshll.u32 %s7416_s30, 9  ;;  %s7208_s7 = smul.u32 72, %s7416_s30 }
  0x18   : > { %s7423_s10 = scalar_lea.vmem %s10077_s0, %s5956_s6  ;;  %s7209_s14 = smul.u32 288, %s7416_s30 }
  0x19   : > { %s7428_s13 = scalar_lea.vmem %s10078_s1, %s7208_s7  ;;  %v7431_v0 = vld [vmem:[%s7423_s10 + $0x10] sm:$0xff]  ;;  %v7434_v1 = vld [vmem:[%s7423_s10 + $0xc0] sm:$0xff]  ;;  %v7458_v5 = vld [vmem:[%s7423_s10 + $0x18] sm:$0xff]  ;;  %s5537_s23 = sshll.u32 %s7416_s30, 2 }
  0x1a   : > { %v7437_v2 = vld [vmem:[%s7428_s13 + $0x28] sm:$0xff]  ;;  %v7440_v3 = vld [vmem:[%s7428_s13 + $0x20] sm:$0xff]  ;;  %6506 = vmatprep.mubr.msk.f32.mxu0 %vm324_vm0, %v7431_v0  ;;  %6539 = vmatprep.mubr.msk.f32.mxu1 %vm324_vm0, %v7434_v1  ;;  %v7451_v4 = vld [vmem:[%s7428_s13 + $0x18] sm:$0xff]  ;;  %s7791_s17 = scalar_lea.vmem %s10079_s2, %s7209_s14  ;;  %s8131_s6 = scalar_lea.vmem %s10080_s3, %s5537_s23 }
  0x1b   : > { %6500 = vmatprep.subr.mxu0 %v7437_v2  ;;  %7202 = vmatprep.subr.mxu1 %v7437_v2  ;;  %v7461_v6 = vld [vmem:[%s7423_s10 + $0xc8] sm:$0xff]  ;;  %v7466_v7 = vld [vmem:[%s7428_s13 + $0x10] sm:$0xff]  ;;  %v7469_v8 = vld [vmem:[%s7423_s10 + $0x20] sm:$0xff] }
  0x1c   : > { %6501 = vmatpush3.msra.mxu0 %v7437_v2  ;;  %7205 = vmatpush3.msra.mxu1 %v7437_v2  ;;  %v7474_v9 = vld [vmem:[%s7423_s10 + $0xd0] sm:$0xff]  ;;  %v7481_v10 = vld [vmem:[%s7428_s13 + $0x8] sm:$0xff]  ;;  %v7490_v12 = vld [vmem:[%s7423_s10 + $0xd8] sm:$0xff] }
  0x1d   : > { %6502 = vmatprep.subr.mxu0 %v7440_v3  ;;  %7203 = vmatprep.subr.mxu1 %v7440_v3  ;;  %v7487_v11 = vld [vmem:[%s7423_s10 + $0x28] sm:$0xff]  ;;  %v7496_v13 = vld [vmem:[%s7423_s10 + $0x30] sm:$0xff]  ;;  %v7499_v14 = vld [vmem:[%s7423_s10 + $0xe0] sm:$0xff] }
  0x1e   : > { %6503 = vmatpush3.msra.mxu0 %v7440_v3  ;;  %7206 = vmatpush3.msra.mxu1 %v7440_v3  ;;  %v7507_v15 = vld [vmem:[%s7428_s13] sm:$0xff]  ;;  %v7517_v17 = vld [vmem:[%s7423_s10 + $0x38] sm:$0xff]  ;;  %v7520_v18 = vld [vmem:[%s7423_s10 + $0xe8] sm:$0xff] }
  0x1f   : > { %6504 = vmatprep.subr.mxu0 %v7451_v4  ;;  %7204 = vmatprep.subr.mxu1 %v7451_v4  ;;  %v7510_v16 = vld [vmem:[%s7428_s13 + $0x40] sm:$0xff]  ;;  %v7527_v20 = vld [vmem:[%s7423_s10 + $0xf0] sm:$0xff]  ;;  %v7533_v21 = vld [vmem:[%s7428_s13 + $0x38] sm:$0xff] }
  0x20   : > { %6505 = vmatpush3.msra.mxu0 %v7451_v4  ;;  %7207 = vmatpush3.msra.mxu1 %v7451_v4  ;;  %v7524_v19 = vld [vmem:[%s7423_s10 + $0x40] sm:$0xff]  ;;  %v7544_v22 = vld [vmem:[%s7423_s10 + $0x48] sm:$0xff]  ;;  %v7547_v23 = vld [vmem:[%s7423_s10 + $0xf8] sm:$0xff] }
  0x21   : > { %6507 = vmatmul.mubr.msk.f32.vlgmr.msra.gmra.mxu0 %vm324_vm0, %v7458_v5  ;;  %6540 = vmatmul.mubr.msk.f32.vlgmr.msra.gmra.mxu1 %vm324_vm0, %v7461_v6  ;;  %v7550_v24 = vld [vmem:[%s7423_s10 + $0x50] sm:$0xff]  ;;  %v7553_v25 = vld [vmem:[%s7423_s10 + $0x100] sm:$0xff]  ;;  %v7571_v27 = vld [vmem:[%s7423_s10 + $0x58] sm:$0xff] }
  0x22   : > { %6554 = vmatprep.subr.mxu1 %v7466_v7  ;;  %6509 = vmatprep.mubr.msk.f32.mxu0 %vm324_vm0, %v7469_v8  ;;  %v7560_v26 = vld [vmem:[%s7428_s13 + $0x30] sm:$0xff]  ;;  %v7574_v28 = vld [vmem:[%s7423_s10 + $0x108] sm:$0xff]  ;;  %v7577_v29 = vld [vmem:[%s7423_s10 + $0x60] sm:$0xff] }
  0x23   : > { %6555 = vmatpush3.msra.mxu1 %v7466_v7  ;;  %6542 = vmatprep.mubr.msk.f32.mxu1 %vm324_vm0, %v7474_v9  ;;  %v284_v30 = vld [vmem:[%s7423_s10] sm:$0xff]  ;;  %v7590_v31 = vld [vmem:[%s7423_s10 + $0x68] sm:$0xff]  ;;  %v7594_v33 = vld [vmem:[%s7423_s10 + $0x70] sm:$0xff] }
  0x24   : > { %6556 = vmatprep.subr.mxu1 %v7481_v10  ;;  %6608 = vmatprep.subr.mxu0 %v7510_v16  ;;  %v285_v32 = vld [vmem:[%s7423_s10 + $0x8] sm:$0xff]  ;;  %v299_v34 = vld [vmem:[%s7423_s10 + $0x78] sm:$0xff]  ;;  %v300_v35 = vld [vmem:[%s7423_s10 + $0x80] sm:$0xff] }
  0x25   : > { %6510 = vmatmul.mubr.msk.f32.gmra.mxu0 %vm324_vm0, %v7487_v11  ;;  %6543 = vmatmul.mubr.msk.f32.gmra.mxu1 %vm324_vm0, %v7490_v12  ;;  %v301_v36 = vld [vmem:[%s7423_s10 + $0x88] sm:$0xff]  ;;  %v302_v37 = vld [vmem:[%s7423_s10 + $0x90] sm:$0xff]  ;;  %v303_v38 = vld [vmem:[%s7423_s10 + $0x98] sm:$0xff] }
  0x26   : > { %6512 = vmatprep.mubr.msk.f32.mxu0 %vm324_vm0, %v7496_v13  ;;  %6545 = vmatprep.mubr.msk.f32.mxu1 %vm324_vm0, %v7499_v14  ;;  %v304_v39 = vld [vmem:[%s7423_s10 + $0xa0] sm:$0xff]  ;;  %v305_v40 = vld [vmem:[%s7423_s10 + $0xa8] sm:$0xff]  ;;  %v306_v41 = vld [vmem:[%s7423_s10 + $0xb0] sm:$0xff] }
  0x27   : > { %6557 = vmatpush3.msra.mxu1 %v7481_v10  ;;  %6609 = vmatpush3.msra.mxu0 %v7510_v16  ;;  %v307_v42 = vld [vmem:[%s7423_s10 + $0xb8] sm:$0xff]  ;;  %v7711_v43 = vld [vmem:[%s7423_s10 + $0x110] sm:$0xff]  ;;  %v7724_v45 = vld [vmem:[%s7423_s10 + $0x120] sm:$0xff] }
  0x28   : > { %6558 = vmatprep.subr.mxu1 %v7507_v15  ;;  %6610 = vmatprep.subr.mxu0 %v7533_v21  ;;  %v7721_v44 = vld [vmem:[%s7423_s10 + $0x118] sm:$0xff]  ;;  %v7734_v46 = vld [vmem:[%s7423_s10 + $0x128] sm:$0xff]  ;;  %v7739_v47 = vld [vmem:[%s7423_s10 + $0x130] sm:$0xff] }
  0x29   : > { %6513 = vmatmul.mubr.msk.f32.gmra.mxu0 %vm324_vm0, %v7517_v17  ;;  %6546 = vmatmul.mubr.msk.f32.gmra.mxu1 %vm324_vm0, %v7520_v18  ;;  %v7752_v48 = vld [vmem:[%s7423_s10 + $0x138] sm:$0xff]  ;;  %v7755_v49 = vld [vmem:[%s7423_s10 + $0x140] sm:$0xff]  ;;  %v7768_v50 = vld [vmem:[%s7423_s10 + $0x148] sm:$0xff] }
  0x2a   : > { %6515 = vmatprep.mubr.msk.f32.mxu0 %vm324_vm0, %v7524_v19  ;;  %6548 = vmatprep.mubr.msk.f32.mxu1 %vm324_vm0, %v7527_v20  ;;  %v7771_v51 = vld [vmem:[%s7423_s10 + $0x150] sm:$0xff]  ;;  %v7783_v52 = vld [vmem:[%s7423_s10 + $0x158] sm:$0xff]  ;;  %v7786_v53 = vld [vmem:[%s7423_s10 + $0x160] sm:$0xff] }
  0x2b   : > { %6559 = vmatpush3.msra.mxu1 %v7507_v15  ;;  %6611 = vmatpush3.msra.mxu0 %v7533_v21  ;;  %v7802_v54 = vld [vmem:[%s7423_s10 + $0x168] sm:$0xff]  ;;  %v7805_v55 = vld [vmem:[%s7423_s10 + $0x170] sm:$0xff]  ;;  %v2497_v56 = vld [vmem:[%s7791_s17 + $0x58] sm:$0xff] }
  0x2c   : > { %6662 = vmatprep.subr.mxu1 %v7437_v2  ;;  %6612 = vmatprep.subr.mxu0 %v7560_v26  ;;  %v7815_v57 = vld [vmem:[%s7423_s10 + $0x178] sm:$0xff]  ;;  %v7820_v58 = vld [vmem:[%s7423_s10 + $0x180] sm:$0xff]  ;;  %v2496_v60 = vld [vmem:[%s7791_s17 + $0x50] sm:$0xff] }
  0x2d   : > { %6516 = vmatmul.mubr.msk.f32.gmra.mxu0 %vm324_vm0, %v7544_v22  ;;  %6549 = vmatmul.mubr.msk.f32.gmra.mxu1 %vm324_vm0, %v7547_v23  ;;  %v7823_v59 = vld [vmem:[%s7791_s17 + $0xb8] sm:$0xff]  ;;  %v7834_v61 = vld [vmem:[%s7423_s10 + $0x188] sm:$0xff]  ;;  %v7839_v62 = vld [vmem:[%s7423_s10 + $0x190] sm:$0xff] }
  0x2e   : > { %6518 = vmatprep.mubr.msk.f32.mxu0 %vm324_vm0, %v7550_v24  ;;  %6551 = vmatprep.mubr.msk.f32.mxu1 %vm324_vm0, %v7553_v25  ;;  %v2495_v63 = vld [vmem:[%s7791_s17 + $0x48] sm:$0xff] }
  0x2f   : > { %6613 = vmatpush3.msra.mxu0 %v7560_v26 }
  0x30   : > { %6758 = vmatprep.subr.mxu0 %v7510_v16 }
  0x31   : > { %6519 = vmatmul.mubr.msk.f32.gmra.mxu0 %vm324_vm0, %v7571_v27  ;;  %6552 = vmatmul.mubr.msk.f32.gmra.mxu1 %vm324_vm0, %v7574_v28 }
  0x32   : > { %6521 = vmatprep.mubr.msk.f32.mxu0 %vm324_vm0, %v7577_v29  ;;  %6560 = vmatprep.mubr.msk.f32.mxu1 %vm324_vm0, %v284_v30  ;;  %v8023_v30 = vld [vmem:[%s7791_s17 + $0x70] sm:$0xff] }
  0x33   : > { %10134 = vst [vmem:[#allocation7_spill] sm:$0xff] %v8023_v30 }
  0x35   : > { %6522 = vmatmul.mubr.msk.f32.gmra.mxu0 %vm324_vm0, %v7590_v31  ;;  %6561 = vmatmul.mubr.msk.f32.vlgmr.msra.gmra.mxu1 %vm324_vm0, %v285_v32  ;;  %v8037_v32 = vld [vmem:[%s7791_s17 + $0x60] sm:$0xff] }
  0x36   : > { %6663 = vmatpush3.msra.mxu1 %v7437_v2  ;;  %6524 = vmatprep.mubr.msk.f32.mxu0 %vm324_vm0, %v7594_v33  ;;  %v2494_v2 = vld [vmem:[%s7791_s17 + $0x40] sm:$0xff]  ;;  %10136 = vst [vmem:[#allocation9_spill] sm:$0xff] %v8037_v32 }
  0x37   : > { %6563 = vmatprep.mubr.msk.f32.mxu1 %vm324_vm0, %v7431_v0  ;;  %6664 = vmatprep.subr.mxu1 %v7440_v3  ;;  %v7849_v0 = vld [vmem:[%s7423_s10 + $0x198] sm:$0xff] }
  0x38   : > { %6665 = vmatpush3.msra.mxu1 %v7440_v3  ;;  %v7864_v3 = vld [vmem:[%s7423_s10 + $0x1a8] sm:$0xff] }
  0x39   : > { %6525 = vmatmul.mubr.msk.f32.gmra.mxu0 %vm324_vm0, %v299_v34  ;;  %6564 = vmatmul.mubr.msk.f32.gmra.mxu1 %vm324_vm0, %v7458_v5  ;;  %v2493_v5 = vld [vmem:[%s7791_s17 + $0x38] sm:$0xff] }
  0x3a   : > { %6527 = vmatprep.mubr.msk.f32.mxu0 %vm324_vm0, %v300_v35  ;;  %6566 = vmatprep.mubr.msk.f32.mxu1 %vm324_vm0, %v7469_v8 }
  0x3b   : > { %6666 = vmatprep.subr.mxu1 %v7451_v4 }
  0x3c   : > { %6667 = vmatpush3.msra.mxu1 %v7451_v4  ;;  %v7869_v4 = vld [vmem:[%s7423_s10 + $0x1b0] sm:$0xff] }
  0x3d   : > { %6528 = vmatmul.mubr.msk.f32.gmra.mxu0 %vm324_vm0, %v301_v36  ;;  %6567 = vmatmul.mubr.msk.f32.gmra.mxu1 %vm324_vm0, %v7487_v11 }
  0x3e   : > { %6530 = vmatprep.mubr.msk.f32.mxu0 %vm324_vm0, %v302_v37  ;;  %6569 = vmatprep.mubr.msk.f32.mxu1 %vm324_vm0, %v7496_v13 }
  0x3f   : > { %6710 = vmatprep.subr.mxu1 %v7466_v7 }
  0x41   : > { %6531 = vmatmul.mubr.msk.f32.gmra.mxu0 %vm324_vm0, %v303_v38  ;;  %6570 = vmatmul.mubr.msk.f32.gmra.mxu1 %vm324_vm0, %v7517_v17 }
  0x42   : > { %6533 = vmatprep.mubr.msk.f32.mxu0 %vm324_vm0, %v304_v39  ;;  %6572 = vmatprep.mubr.msk.f32.mxu1 %vm324_vm0, %v7524_v19 }
  0x45   : > { %6534 = vmatmul.mubr.msk.f32.gmra.mxu0 %vm324_vm0, %v305_v40  ;;  %6573 = vmatmul.mubr.msk.f32.gmra.mxu1 %vm324_vm0, %v7544_v22 }
  0x46   : > { %6536 = vmatprep.mubr.msk.f32.mxu0 %vm324_vm0, %v306_v41  ;;  %6575 = vmatprep.mubr.msk.f32.mxu1 %vm324_vm0, %v7550_v24 }
  0x49   : > { %6537 = vmatmul.mubr.msk.f32.gmra.mxu0 %vm324_vm0, %v307_v42  ;;  %6576 = vmatmul.mubr.msk.f32.gmra.mxu1 %vm324_vm0, %v7571_v27 }
  0x4a   : > { %6578 = vmatprep.mubr.msk.f32.mxu1 %vm324_vm0, %v7577_v29  ;;  %6614 = vmatprep.mubr.msk.f32.mxu0 %vm324_vm0, %v7469_v8  ;;  %v2492_v8 = vld [vmem:[%s7791_s17 + $0x30] sm:$0xff] }
  0x4d   : > { %6579 = vmatmul.mubr.msk.f32.gmra.mxu1 %vm324_vm0, %v7590_v31  ;;  %6615 = vmatmul.mubr.msk.f32.vlgmr.msra.gmra.mxu0 %vm324_vm0, %v7487_v11  ;;  %v2491_v11 = vld [vmem:[%s7791_s17 + $0x28] sm:$0xff] }
  0x4e   : > { %6581 = vmatprep.mubr.msk.f32.mxu1 %vm324_vm0, %v7594_v33  ;;  %6617 = vmatprep.mubr.msk.f32.mxu0 %vm324_vm0, %v7496_v13  ;;  %v1461_v13 = vld [vmem:[%s7423_s10 + $0x1e0] sm:$0xff] }
  0x4f   : > { %6759 = vmatpush3.msra.mxu0 %v7510_v16  ;;  %v2489_v16 = vld [vmem:[%s7791_s17 + $0x18] sm:$0xff] }
  0x50   : > { %6760 = vmatprep.subr.mxu0 %v7533_v21 }
  0x51   : > { %6582 = vmatmul.mubr.msk.f32.gmra.mxu1 %vm324_vm0, %v299_v34  ;;  %6618 = vmatmul.mubr.msk.f32.gmra.mxu0 %vm324_vm0, %v7517_v17  ;;  %v7936_v17 = vld [vmem:[%s7791_s17 + $0xb0] sm:$0xff] }
  0x52   : > { %6584 = vmatprep.mubr.msk.f32.mxu1 %vm324_vm0, %v300_v35  ;;  %6620 = vmatprep.mubr.msk.f32.mxu0 %vm324_vm0, %v7524_v19  ;;  %v7950_v19 = vld [vmem:[%s7791_s17 + $0xa8] sm:$0xff] }
  0x53   : > { %6761 = vmatpush3.msra.mxu0 %v7533_v21  ;;  %v7964_v21 = vld [vmem:[%s7791_s17 + $0xa0] sm:$0xff] }
  0x54   : > { %6762 = vmatprep.subr.mxu0 %v7560_v26 }
  0x55   : > { %6585 = vmatmul.mubr.msk.f32.gmra.mxu1 %vm324_vm0, %v301_v36  ;;  %6621 = vmatmul.mubr.msk.f32.gmra.mxu0 %vm324_vm0, %v7544_v22  ;;  %v2486_v22 = vld [vmem:[%s7791_s17] sm:$0xff] }
  0x56   : > { %6587 = vmatprep.mubr.msk.f32.mxu1 %vm324_vm0, %v302_v37  ;;  %6623 = vmatprep.mubr.msk.f32.mxu0 %vm324_vm0, %v7550_v24  ;;  %v1992_v24 = vld [vmem:[%s7423_s10 + $0x1f0] sm:$0xff] }
  0x57   : > { %6763 = vmatpush3.msra.mxu0 %v7560_v26  ;;  %v1993_v26 = vld [vmem:[%s7423_s10 + $0x1f8] sm:$0xff] }
  0x58   : > { %6878 = vmatprep.subr.mxu0 %v2497_v56 }
  0x59   : > { %6588 = vmatmul.mubr.msk.f32.gmra.mxu1 %vm324_vm0, %v303_v38  ;;  %6624 = vmatmul.mubr.msk.f32.gmra.mxu0 %vm324_vm0, %v7571_v27  ;;  %v8000_v27 = vld [vmem:[%s7791_s17 + $0x88] sm:$0xff] }
  0x5a   : > { %6590 = vmatprep.mubr.msk.f32.mxu1 %vm324_vm0, %v304_v39  ;;  %6626 = vmatprep.mubr.msk.f32.mxu0 %vm324_vm0, %v7577_v29  ;;  %v8014_v29 = vld [vmem:[%s7791_s17 + $0x78] sm:$0xff] }
  0x5d   : > { %6591 = vmatmul.mubr.msk.f32.gmra.mxu1 %vm324_vm0, %v305_v40  ;;  %6627 = vmatmul.mubr.msk.f32.gmra.mxu0 %vm324_vm0, %v7590_v31  ;;  %v8028_v31 = vld [vmem:[%s7791_s17 + $0x68] sm:$0xff] }
  0x5e   : > { %6593 = vmatprep.mubr.msk.f32.mxu1 %vm324_vm0, %v306_v41  ;;  %6629 = vmatprep.mubr.msk.f32.mxu0 %vm324_vm0, %v7594_v33  ;;  %10135 = vst [vmem:[#allocation8_spill] sm:$0xff] %v8028_v31  ;;  %v8045_v33 = vld [vmem:[%s7791_s17 + $0x118] sm:$0xff] }
  0x61   : > { %6594 = vmatmul.mubr.msk.f32.gmra.mxu1 %vm324_vm0, %v307_v42  ;;  %6630 = vmatmul.mubr.msk.f32.gmra.mxu0 %vm324_vm0, %v299_v34 }
  0x62   : > { %6596 = vmatprep.mubr.msk.f32.mxu1 %vm324_vm0, %v7434_v1  ;;  %6632 = vmatprep.mubr.msk.f32.mxu0 %vm324_vm0, %v300_v35 }
  0x65   : > { %6597 = vmatmul.mubr.msk.f32.gmra.mxu1 %vm324_vm0, %v7461_v6  ;;  %6633 = vmatmul.mubr.msk.f32.gmra.mxu0 %vm324_vm0, %v301_v36 }
  0x66   : > { %6599 = vmatprep.mubr.msk.f32.mxu1 %vm324_vm0, %v7474_v9  ;;  %6635 = vmatprep.mubr.msk.f32.mxu0 %vm324_vm0, %v302_v37 }
  0x69   : > { %6600 = vmatmul.mubr.msk.f32.gmra.mxu1 %vm324_vm0, %v7490_v12  ;;  %6636 = vmatmul.mubr.msk.f32.gmra.mxu0 %vm324_vm0, %v303_v38 }
  0x6a   : > { %6602 = vmatprep.mubr.msk.f32.mxu1 %vm324_vm0, %v7499_v14  ;;  %6638 = vmatprep.mubr.msk.f32.mxu0 %vm324_vm0, %v304_v39 }
  0x6d   : > { %6603 = vmatmul.mubr.msk.f32.gmra.mxu1 %vm324_vm0, %v7520_v18  ;;  %6639 = vmatmul.mubr.msk.f32.gmra.mxu0 %vm324_vm0, %v305_v40 }
  0x6e   : > { %6605 = vmatprep.mubr.msk.f32.mxu1 %vm324_vm0, %v7527_v20  ;;  %6641 = vmatprep.mubr.msk.f32.mxu0 %vm324_vm0, %v306_v41 }
  0x71   : > { %6606 = vmatmul.mubr.msk.f32.gmra.mxu1 %vm324_vm0, %v7547_v23  ;;  %6642 = vmatmul.mubr.msk.f32.gmra.mxu0 %vm324_vm0, %v307_v42 }
  0x72   : > { %6644 = vmatprep.mubr.msk.f32.mxu0 %vm324_vm0, %v7434_v1  ;;  %6668 = vmatprep.mubr.msk.f32.mxu1 %vm324_vm0, %v7711_v43  ;;  %v7854_v1 = vld [vmem:[%s7423_s10 + $0x1a0] sm:$0xff] }
  0x75   : > { %6645 = vmatmul.mubr.msk.f32.gmra.mxu0 %vm324_vm0, %v7461_v6  ;;  %6669 = vmatmul.mubr.msk.f32.vlgmr.msra.gmra.mxu1 %vm324_vm0, %v7721_v44  ;;  %v7879_v6 = vld [vmem:[%s7423_s10 + $0x1b8] sm:$0xff] }
  0x76   : > { %6711 = vmatpush3.msra.mxu1 %v7466_v7  ;;  %6647 = vmatprep.mubr.msk.f32.mxu0 %vm324_vm0, %v7474_v9  ;;  %v7884_v7 = vld [vmem:[%s7423_s10 + $0x1c0] sm:$0xff]  ;;  %v7894_v9 = vld [vmem:[%s7423_s10 + $0x1c8] sm:$0xff] }
  0x77   : > { %6671 = vmatprep.mubr.msk.f32.mxu1 %vm324_vm0, %v7724_v45  ;;  %6712 = vmatprep.subr.mxu1 %v7481_v10 }
  0x78   : > { %6713 = vmatpush3.msra.mxu1 %v7481_v10  ;;  %v7899_v10 = vld [vmem:[%s7423_s10 + $0x1d0] sm:$0xff] }
  0x79   : > { %6648 = vmatmul.mubr.msk.f32.gmra.mxu0 %vm324_vm0, %v7490_v12  ;;  %6672 = vmatmul.mubr.msk.f32.gmra.mxu1 %vm324_vm0, %v7734_v46  ;;  %v7909_v12 = vld [vmem:[%s7423_s10 + $0x1d8] sm:$0xff] }
  0x7a   : > { %6650 = vmatprep.mubr.msk.f32.mxu0 %vm324_vm0, %v7499_v14  ;;  %6674 = vmatprep.mubr.msk.f32.mxu1 %vm324_vm0, %v7739_v47  ;;  %v2490_v14 = vld [vmem:[%s7791_s17 + $0x20] sm:$0xff] }
  0x7b   : > { %6714 = vmatprep.subr.mxu1 %v7507_v15 }
  0x7c   : > { %6715 = vmatpush3.msra.mxu1 %v7507_v15  ;;  %v1462_v15 = vld [vmem:[%s7423_s10 + $0x1e8] sm:$0xff]  ;;  %s258_s10 = sand.u32 1, %s7323_s19  }
  0x7d   : > { %6651 = vmatmul.mubr.msk.f32.gmra.mxu0 %vm324_vm0, %v7520_v18  ;;  %6675 = vmatmul.mubr.msk.f32.gmra.mxu1 %vm324_vm0, %v7752_v48  ;;  %v2488_v18 = vld [vmem:[%s7791_s17 + $0x10] sm:$0xff]  ;;  %s5532_s11 = sshll.u32 %s258_s10, 2  ;;  %s5419_s23 = scalar_lea.sflag [#allocation5], %s258_s10 }
  0x7e   : > { %6653 = vmatprep.mubr.msk.f32.mxu0 %vm324_vm0, %v7527_v20  ;;  %6677 = vmatprep.mubr.msk.f32.mxu1 %vm324_vm0, %v7755_v49  ;;  %v2487_v20 = vld [vmem:[%s7791_s17 + $0x8] sm:$0xff]  ;;  %s260_s13 = scalar_lea.vmem [#allocation4], %s5532_s11 }
  0x7f   : > { %6806 = vmatprep.subr.mxu1 %v7823_v59  ;;  %s5433_s14 = sshll.u32 %s260_s13, 4  ;;  %s5434_s14 = int_to_ptr.vmem [resolvable:$true] %s5433_s14 }
  0x80   : > { %s7271_s25 = scalar_lea.vmem %s5434_s14, 64  ;;  %p7278_p0 = scmp.lt.s32.totalorder %s5434_s14, %s7276_s22 }
  0x81   : > { %6654 = vmatmul.mubr.msk.f32.gmra.mxu0 %vm324_vm0, %v7547_v23  ;;  %6678 = vmatmul.mubr.msk.f32.gmra.mxu1 %vm324_vm0, %v7768_v50  ;;  %v7978_v23 = vld [vmem:[%s7791_s17 + $0x98] sm:$0xff]  ;;  %p7272_p11 = scmp.ne.s32.totalorder %s5434_s14, %s7271_s25 }
  0x82   : > { %6656 = vmatprep.mubr.msk.f32.mxu0 %vm324_vm0, %v7553_v25  ;;  %6680 = vmatprep.mubr.msk.f32.mxu1 %vm324_vm0, %v7771_v51 }
  0x83   : > { %p7273_p12 = pnand %p7272_p11, %p7404_p5 }
  0x85   : > { %6657 = vmatmul.mubr.msk.f32.gmra.mxu0 %vm324_vm0, %v7574_v28  ;;  %6681 = vmatmul.mubr.msk.f32.gmra.mxu1 %vm324_vm0, %v7783_v52  ;;  %p7274_p13 = pneg %p7273_p12 }
  0x86   : > { %6659 = vmatprep.mubr.msk.f32.mxu0 %vm324_vm0, %v7711_v43  ;;  %6683 = vmatprep.mubr.msk.f32.mxu1 %vm324_vm0, %v7786_v53 }
  0x89   : > { %6660 = vmatmul.mubr.msk.f32.gmra.mxu0 %vm324_vm0, %v7721_v44  ;;  %6684 = vmatmul.mubr.msk.f32.gmra.mxu1 %vm324_vm0, %v7802_v54 }
  0x8a   : > { %6686 = vmatprep.mubr.msk.f32.mxu1 %vm324_vm0, %v7805_v55  ;;  %6764 = vmatprep.mubr.msk.f32.mxu0 %vm324_vm0, %v7724_v45 }
  0x8d   : > { %6687 = vmatmul.mubr.msk.f32.gmra.mxu1 %vm324_vm0, %v7815_v57  ;;  %6765 = vmatmul.mubr.msk.f32.vlgmr.msra.gmra.mxu0 %vm324_vm0, %v7734_v46 }
  0x8e   : > { %6689 = vmatprep.mubr.msk.f32.mxu1 %vm324_vm0, %v7820_v58  ;;  %6767 = vmatprep.mubr.msk.f32.mxu0 %vm324_vm0, %v7739_v47 }
  0x8f   : > { %6879 = vmatpush3.msra.mxu0 %v2497_v56 }
  0x90   : > { %6880 = vmatprep.subr.mxu0 %v2496_v60 }
  0x91   : > { %6690 = vmatmul.mubr.msk.f32.gmra.mxu1 %vm324_vm0, %v7834_v61  ;;  %6768 = vmatmul.mubr.msk.f32.gmra.mxu0 %vm324_vm0, %v7752_v48 }
  0x92   : > { %6692 = vmatprep.mubr.msk.f32.mxu1 %vm324_vm0, %v7839_v62  ;;  %6770 = vmatprep.mubr.msk.f32.mxu0 %vm324_vm0, %v7755_v49 }
  0x93   : > { %6881 = vmatpush3.msra.mxu0 %v2496_v60 }
  0x94   : > { %6882 = vmatprep.subr.mxu0 %v2495_v63 }
  0x95   : > { %6693 = vmatmul.mubr.msk.f32.gmra.mxu1 %vm324_vm0, %v7849_v0  ;;  %6771 = vmatmul.mubr.msk.f32.gmra.mxu0 %vm324_vm0, %v7768_v50 }
  0x96   : > { %6695 = vmatprep.mubr.msk.f32.mxu1 %vm324_vm0, %v7854_v1  ;;  %6773 = vmatprep.mubr.msk.f32.mxu0 %vm324_vm0, %v7771_v51 }
  0x97   : > { %6883 = vmatpush3.msra.mxu0 %v2495_v63 }
  0x98   : > { %6884 = vmatprep.subr.mxu0 %v2494_v2 }
  0x99   : > { %6696 = vmatmul.mubr.msk.f32.gmra.mxu1 %vm324_vm0, %v7864_v3  ;;  %6774 = vmatmul.mubr.msk.f32.gmra.mxu0 %vm324_vm0, %v7783_v52 }
  0x9a   : > { %6698 = vmatprep.mubr.msk.f32.mxu1 %vm324_vm0, %v7869_v4  ;;  %6776 = vmatprep.mubr.msk.f32.mxu0 %vm324_vm0, %v7786_v53 }
  0x9b   : > { %6885 = vmatpush3.msra.mxu0 %v2494_v2 }
  0x9c   : > { %6886 = vmatprep.subr.mxu0 %v2493_v5 }
  0x9d   : > { %6699 = vmatmul.mubr.msk.f32.gmra.mxu1 %vm324_vm0, %v7879_v6  ;;  %6777 = vmatmul.mubr.msk.f32.gmra.mxu0 %vm324_vm0, %v7802_v54 }
  0x9e   : > { %6701 = vmatprep.mubr.msk.f32.mxu1 %vm324_vm0, %v7884_v7  ;;  %6779 = vmatprep.mubr.msk.f32.mxu0 %vm324_vm0, %v7805_v55 }
  0x9f   : > { %6887 = vmatpush3.msra.mxu0 %v2493_v5 }
  0xa0   : > { %6888 = vmatprep.subr.mxu0 %v2492_v8 }
  0xa1   : > { %6702 = vmatmul.mubr.msk.f32.gmra.mxu1 %vm324_vm0, %v7894_v9  ;;  %6780 = vmatmul.mubr.msk.f32.gmra.mxu0 %vm324_vm0, %v7815_v57 }
  0xa2   : > { %6704 = vmatprep.mubr.msk.f32.mxu1 %vm324_vm0, %v7899_v10  ;;  %6782 = vmatprep.mubr.msk.f32.mxu0 %vm324_vm0, %v7820_v58 }
  0xa3   : > { %6889 = vmatpush3.msra.mxu0 %v2492_v8 }
  0xa4   : > { %6890 = vmatprep.subr.mxu0 %v2491_v11 }
  0xa5   : > { %6705 = vmatmul.mubr.msk.f32.gmra.mxu1 %vm324_vm0, %v7909_v12  ;;  %6783 = vmatmul.mubr.msk.f32.gmra.mxu0 %vm324_vm0, %v7834_v61 }
  0xa6   : > { %6707 = vmatprep.mubr.msk.f32.mxu1 %vm324_vm0, %v1461_v13  ;;  %6785 = vmatprep.mubr.msk.f32.mxu0 %vm324_vm0, %v7839_v62 }
  0xa7   : > { %6891 = vmatpush3.msra.mxu0 %v2491_v11 }
  0xa8   : > { %6892 = vmatprep.subr.mxu0 %v2490_v14 }
  0xa9   : > { %6708 = vmatmul.mubr.msk.f32.gmra.mxu1 %vm324_vm0, %v1462_v15  ;;  %6786 = vmatmul.mubr.msk.f32.gmra.mxu0 %vm324_vm0, %v7849_v0 }
  0xaa   : > { %6716 = vmatprep.mubr.msk.f32.mxu1 %vm324_vm0, %v7553_v25  ;;  %6788 = vmatprep.mubr.msk.f32.mxu0 %vm324_vm0, %v7854_v1  ;;  %v7991_v25 = vld [vmem:[%s7791_s17 + $0x90] sm:$0xff] }
  0xab   : > { %6893 = vmatpush3.msra.mxu0 %v2490_v14 }
  0xac   : > { %6894 = vmatprep.subr.mxu0 %v2489_v16 }
  0xad   : > { %6717 = vmatmul.mubr.msk.f32.vlgmr.msra.gmra.mxu1 %vm324_vm0, %v7574_v28  ;;  %6789 = vmatmul.mubr.msk.f32.gmra.mxu0 %vm324_vm0, %v7864_v3  ;;  %v8009_v28 = vld [vmem:[%s7791_s17 + $0x80] sm:$0xff] }
  0xae   : > { %6719 = vmatprep.mubr.msk.f32.mxu1 %vm324_vm0, %v7711_v43  ;;  %6791 = vmatprep.mubr.msk.f32.mxu0 %vm324_vm0, %v7869_v4 }
  0xaf   : > { %6807 = vmatpush3.msra.mxu1 %v7823_v59  ;;  %6895 = vmatpush3.msra.mxu0 %v2489_v16  ;;  %v8138_v16 = vld [vmem:[%s8131_s6] ss:$0 sm:$0xff] }
  0xb0   : > { %6808 = vmatprep.subr.mxu1 %v7936_v17  ;;  %6896 = vmatprep.subr.mxu0 %v2488_v18 }
  0xb1   : > { %6720 = vmatmul.mubr.msk.f32.gmra.mxu1 %vm324_vm0, %v7721_v44  ;;  %6792 = vmatmul.mubr.msk.f32.gmra.mxu0 %vm324_vm0, %v7879_v6 }
  0xb2   : > { %6722 = vmatprep.mubr.msk.f32.mxu1 %vm324_vm0, %v7724_v45  ;;  %6794 = vmatprep.mubr.msk.f32.mxu0 %vm324_vm0, %v7884_v7 }
  0xb3   : > { %6809 = vmatpush3.msra.mxu1 %v7936_v17  ;;  %6897 = vmatpush3.msra.mxu0 %v2488_v18 }
  0xb4   : > { %6810 = vmatprep.subr.mxu1 %v7950_v19  ;;  %6898 = vmatprep.subr.mxu0 %v2487_v20 }
  0xb5   : > { %6723 = vmatmul.mubr.msk.f32.gmra.mxu1 %vm324_vm0, %v7734_v46  ;;  %6795 = vmatmul.mubr.msk.f32.gmra.mxu0 %vm324_vm0, %v7894_v9 }
  0xb6   : > { %6725 = vmatprep.mubr.msk.f32.mxu1 %vm324_vm0, %v7739_v47  ;;  %6797 = vmatprep.mubr.msk.f32.mxu0 %vm324_vm0, %v7899_v10 }
  0xb7   : > { %6811 = vmatpush3.msra.mxu1 %v7950_v19  ;;  %6899 = vmatpush3.msra.mxu0 %v2487_v20 }
  0xb8   : > { %6812 = vmatprep.subr.mxu1 %v7964_v21  ;;  %6900 = vmatprep.subr.mxu0 %v2486_v22 }
  0xb9   : > { %6726 = vmatmul.mubr.msk.f32.gmra.mxu1 %vm324_vm0, %v7752_v48  ;;  %6798 = vmatmul.mubr.msk.f32.gmra.mxu0 %vm324_vm0, %v7909_v12 }
  0xba   : > { %6728 = vmatprep.mubr.msk.f32.mxu1 %vm324_vm0, %v7755_v49  ;;  %6800 = vmatprep.mubr.msk.f32.mxu0 %vm324_vm0, %v1461_v13 }
  0xbb   : > { %6813 = vmatpush3.msra.mxu1 %v7964_v21  ;;  %6901 = vmatpush3.msra.mxu0 %v2486_v22 }
  0xbc   : > { %6814 = vmatprep.subr.mxu1 %v7978_v23  ;;  %7022 = vmatprep.subr.mxu0 %v7823_v59 }
  0xbd   : > { %6729 = vmatmul.mubr.msk.f32.gmra.mxu1 %vm324_vm0, %v7768_v50  ;;  %6801 = vmatmul.mubr.msk.f32.gmra.mxu0 %vm324_vm0, %v1462_v15 }
  0xbe   : > { %6731 = vmatprep.mubr.msk.f32.mxu1 %vm324_vm0, %v7771_v51  ;;  %6803 = vmatprep.mubr.msk.f32.mxu0 %vm324_vm0, %v1992_v24 }
  0xbf   : > { %6815 = vmatpush3.msra.mxu1 %v7978_v23 }
  0xc0   : > { %6816 = vmatprep.subr.mxu1 %v7991_v25 }
  0xc1   : > { %6732 = vmatmul.mubr.msk.f32.gmra.mxu1 %vm324_vm0, %v7783_v52  ;;  %6804 = vmatmul.mubr.msk.f32.gmra.mxu0 %vm324_vm0, %v1993_v26 }
  0xc2   : > { %6734 = vmatprep.mubr.msk.f32.mxu1 %vm324_vm0, %v7786_v53  ;;  %6817 = vmatpush3.msra.mxu1 %v7991_v25 }
  0xc3   : > { %6818 = vmatprep.subr.mxu1 %v8000_v27 }
  0xc4   : > { %6819 = vmatpush3.msra.mxu1 %v8000_v27 }
  0xc5   : > { %6735 = vmatmul.mubr.msk.f32.gmra.mxu1 %vm324_vm0, %v7802_v54  ;;  %6820 = vmatprep.subr.mxu1 %v8009_v28 }
  0xc6   : > { %6737 = vmatprep.mubr.msk.f32.mxu1 %vm324_vm0, %v7805_v55  ;;  %6821 = vmatpush3.msra.mxu1 %v8009_v28 }
  0xc7   : > { %6822 = vmatprep.subr.mxu1 %v8014_v29 }
  0xc8   : > { %6823 = vmatpush3.msra.mxu1 %v8014_v29 }
  0xc9   : > { %6738 = vmatmul.mubr.msk.f32.gmra.mxu1 %vm324_vm0, %v7815_v57  ;;  %6824 = vmatprep.subr.mxu1 %v8023_v30 }
  0xca   : > { %6740 = vmatprep.mubr.msk.f32.mxu1 %vm324_vm0, %v7820_v58  ;;  %6825 = vmatpush3.msra.mxu1 %v8023_v30 }
  0xcb   : > { %6826 = vmatprep.subr.mxu1 %v8028_v31 }
  0xcc   : > { %6827 = vmatpush3.msra.mxu1 %v8028_v31 }
  0xcd   : > { %6741 = vmatmul.mubr.msk.f32.gmra.mxu1 %vm324_vm0, %v7834_v61  ;;  %6828 = vmatprep.subr.mxu1 %v8037_v32 }
  0xce   : > { %6743 = vmatprep.mubr.msk.f32.mxu1 %vm324_vm0, %v7839_v62  ;;  %6829 = vmatpush3.msra.mxu1 %v8037_v32 }
  0xcf   : > { %6950 = vmatprep.subr.mxu1 %v8045_v33 }
  0xd1   : > { %6744 = vmatmul.mubr.msk.f32.gmra.mxu1 %vm324_vm0, %v7849_v0 }
  0xd2   : > { %6746 = vmatprep.mubr.msk.f32.mxu1 %vm324_vm0, %v7854_v1 }
  0xd5   : > { %6747 = vmatmul.mubr.msk.f32.gmra.mxu1 %vm324_vm0, %v7864_v3 }
  0xd6   : > { %6749 = vmatprep.mubr.msk.f32.mxu1 %vm324_vm0, %v7869_v4 }
  0xd9   : > { %6750 = vmatmul.mubr.msk.f32.gmra.mxu1 %vm324_vm0, %v7879_v6 }
  0xda   : > { %6752 = vmatprep.mubr.msk.f32.mxu1 %vm324_vm0, %v7884_v7 }
  0xdd   : > { %6753 = vmatmul.mubr.msk.f32.gmra.mxu1 %vm324_vm0, %v7894_v9 }
  0xde   : > { %6755 = vmatprep.mubr.msk.f32.mxu1 %vm324_vm0, %v7899_v10 }
  0xe1   : > { %v6508_v34 = vpop.f32.mrf.mxu0  ;;  %v8067_v35 = vpop.f32.mrf.mxu1  ;;  %6756 = vmatmul.mubr.msk.f32.gmra.mxu1 %vm324_vm0, %v7909_v12 }
  0xe3   : > { %v487_v36 = vpop.f32.mrf.mxu0  ;;  %v8071_v37 = vpop.f32.mrf.mxu1 }
  0xe5   : > { %v6511_v38 = vpop.f32.mrf.mxu0  ;;  %v8073_v39 = vpop.f32.mrf.mxu1 }
  0xe7   : > { %v497_v40 = vpop.f32.mrf.mxu0  ;;  %v8075_v41 = vpop.f32.mrf.mxu1 }
  0xe9   : > { %v6514_v42 = vpop.f32.mrf.mxu0  ;;  %v8077_v43 = vpop.f32.mrf.mxu1 }
  0xea   : > { %10137 = vst [vmem:[#allocation10_spill] sm:$0xff] %v8077_v43 }
  0xeb   : > { %v8079_v44 = vpop.f32.mrf.mxu0  ;;  %v8081_v45 = vpop.f32.mrf.mxu1 }
  0xec   : > { %10138 = vst [vmem:[#allocation11_spill] sm:$0xff] %v8081_v45 }
  0xed   : > { %v8083_v46 = vpop.f32.mrf.mxu0  ;;  %v8085_v47 = vpop.f32.mrf.mxu1 }
  0xee   : > { %10139 = vst [vmem:[#allocation12_spill] sm:$0xff] %v8085_v47 }
  0xef   : > { %v8087_v48 = vpop.f32.mrf.mxu0  ;;  %v8089_v49 = vpop.f32.mrf.mxu1 }
  0xf0   : > { %10140 = vst [vmem:[#allocation13_spill] sm:$0xff] %v8089_v49 }
  0xf1   : > { %v8091_v50 = vpop.f32.mrf.mxu0  ;;  %v8093_v51 = vpop.f32.mrf.mxu1 }
  0xf2   : > { %10141 = vst [vmem:[#allocation14_spill] sm:$0xff] %v8093_v51 }
  0xf3   : > { %v8095_v52 = vpop.f32.mrf.mxu0  ;;  %v8097_v53 = vpop.f32.mrf.mxu1 }
  0xf4   : > { %10142 = vst [vmem:[#allocation15_spill] sm:$0xff] %v8097_v53 }
  0xf5   : > { %v8099_v54 = vpop.f32.mrf.mxu0  ;;  %v6562_v55 = vpop.f32.mrf.mxu1 }
  0xf6   : > { %v724_v15 = vadd.f32 %v6562_v55, %v6508_v34 }
  0xf7   : > { %v8101_v56 = vpop.f32.mrf.mxu0  ;;  %v718_v57 = vpop.f32.mrf.mxu1 }
  0xf8   : > { %v719_v22 = vadd.f32 %v718_v57, %v487_v36 }
  0xf9   : > { %v8103_v58 = vpop.f32.mrf.mxu0  ;;  %v6565_v60 = vpop.f32.mrf.mxu1 }
  0xfa   : > { %v734_v31 = vadd.f32 %v6565_v60, %v6511_v38 }
  0xfb   : > { %v8105_v61 = vpop.f32.mrf.mxu0  ;;  %v728_v62 = vpop.f32.mrf.mxu1 }
  0xfc   : > { %v729_v55 = vadd.f32 %v728_v62, %v497_v40 }
  0xfd   : > { %v8107_v63 = vpop.f32.mrf.mxu0  ;;  %v6568_v0 = vpop.f32.mrf.mxu1 }
  0xfe   : > { %v744_v57 = vadd.f32 %v6568_v0, %v6514_v42 }
  0xff   : > { %v8109_v1 = vpop.f32.mrf.mxu0  ;;  %v738_v2 = vpop.f32.mrf.mxu1 }
 0x101   : > { %v8111_v3 = vpop.f32.mrf.mxu0  ;;  %v6571_v4 = vpop.f32.mrf.mxu1 }
 0x102   : > { %v754_v62 = vadd.f32 %v6571_v4, %v8083_v46 }
 0x103   : > { %v8113_v5 = vpop.f32.mrf.mxu0  ;;  %v748_v6 = vpop.f32.mrf.mxu1 }
 0x105   : > { %v8115_v7 = vpop.f32.mrf.mxu0  ;;  %v8117_v8 = vpop.f32.mrf.mxu1 }
 0x106   : > { %v764_v46 = vadd.f32 %v8117_v8, %v8091_v50 }
 0x107   : > { %v8120_v9 = vpop.f32.mrf.mxu0  ;;  %v8122_v10 = vpop.f32.mrf.mxu1 }
 0x109   : > { %v8124_v11 = vpop.f32.mrf.mxu0  ;;  %v8126_v12 = vpop.f32.mrf.mxu1 }
 0x10b   : > { %v8133_v13 = vpop.f32.mrf.mxu0  ;;  %v8135_v14 = vpop.f32.mrf.mxu1 }
 0x10d   : > { %v8140_v18 = vpop.f32.mrf.mxu1  ;;  %v6616_v20 = vpop.f32.mrf.mxu0 }
 0x10e   : > { %v1234_v24 = vadd.f32 %v6616_v20, %v724_v15 }
 0x10f   : > { %v8142_v26 = vpop.f32.mrf.mxu1  ;;  %v1074_v53 = vpop.f32.mrf.mxu0 }
 0x110   : > { %v1270_v32 = vadd.f32 %v8138_v16, %v1234_v24  ;;  %v1233_v51 = vadd.f32 %v1074_v53, %v719_v22  ;;  %v739_v24 = vadd.f32 %v738_v2, %v8079_v44 }
 0x111   : > { %v8145_v49 = vpop.f32.mrf.mxu1  ;;  %v6619_v47 = vpop.f32.mrf.mxu0 }
 0x112   : > { %vm1302_vm1 = vcmp.ge.f32.partialorder %v1270_v32, 0.0  ;;  %v1334_v45 = vmul.f32 0.2, %v1270_v32  ;;  %v1269_v34 = vadd.f32 %v8138_v16, %v1233_v51  ;;  %v1236_v30 = vadd.f32 %v6619_v47, %v734_v31 }
 0x113   : > { %v8148_v43 = vpop.f32.mrf.mxu1  ;;  %v1084_v36 = vpop.f32.mrf.mxu0 }
 0x114   : > { %v1366_v15 = vsel %vm1302_vm1, %v1270_v32, %v1334_v45  ;;  %vm1301_vm3 = vcmp.ge.f32.partialorder %v1269_v34, 0.0  ;;  %v1333_v20 = vmul.f32 0.2, %v1269_v34  ;;  %v1272_v38 = vadd.f32 %v8138_v16, %v1236_v30 }
 0x115   : > { %1399 = vst.msk [vmem:[#allocation2 + $0x8] sm:$0xff] %vm1397_vm2, %v1366_v15  ;;  %v1235_v53 = vadd.f32 %v1084_v36, %v729_v55  ;;  %v8152_v60 = vpop.f32.mrf.mxu1  ;;  %v6622_v22 = vpop.f32.mrf.mxu0 }
 0x116   : > { %v1365_v51 = vsel %vm1301_vm3, %v1269_v34, %v1333_v20  ;;  %v1238_v40 = vadd.f32 %v6622_v22, %v744_v57  ;;  %vm1304_vm4 = vcmp.ge.f32.partialorder %v1272_v38, 0.0  ;;  %v1336_v31 = vmul.f32 0.2, %v1272_v38 }
 0x117   : > { %1398 = vst.msk [vmem:[#allocation2] sm:$0xff] %vm1397_vm2, %v1365_v51  ;;  %v1271_v32 = vadd.f32 %v8138_v16, %v1235_v53  ;;  %v8157_v42 = vpop.f32.mrf.mxu1  ;;  %v1094_v45 = vpop.f32.mrf.mxu0  ;;  %v749_v57 = vadd.f32 %v748_v6, %v8087_v48  ;;  %v759_v6 = vadd.f32 %v8122_v10, %v8095_v52  ;;  %v774_v52 = vadd.f32 %v8126_v12, %v8099_v54 }
 0x118   : > { %v1274_v47 = vadd.f32 %v8138_v16, %v1238_v40  ;;  %v1237_v30 = vadd.f32 %v1094_v45, %v739_v24  ;;  %v1368_v0 = vsel %vm1304_vm4, %v1272_v38, %v1336_v31 }
 0x119   : > { %vm1303_vm5 = vcmp.ge.f32.partialorder %v1271_v32, 0.0  ;;  %v1335_v55 = vmul.f32 0.2, %v1271_v32  ;;  %v8161_v44 = vpop.f32.mrf.mxu1  ;;  %v6625_v2 = vpop.f32.mrf.mxu0  ;;  %1401 = vst.msk [vmem:[#allocation2 + $0x18] sm:$0xff] %vm1397_vm2, %v1368_v0 }
 0x11a   : > { %vm1306_vm6 = vcmp.ge.f32.partialorder %v1274_v47, 0.0  ;;  %v1338_v34 = vmul.f32 0.2, %v1274_v47  ;;  %v1273_v36 = vadd.f32 %v8138_v16, %v1237_v30  ;;  %v1240_v20 = vadd.f32 %v6625_v2, %v754_v62 }
 0x11b   : > { %v1367_v15 = vsel %vm1303_vm5, %v1271_v32, %v1335_v55  ;;  %v8166_v53 = vpop.f32.mrf.mxu1  ;;  %v1104_v22 = vpop.f32.mrf.mxu0 }
 0x11c   : > { %1400 = vst.msk [vmem:[#allocation2 + $0x10] sm:$0xff] %vm1397_vm2, %v1367_v15  ;;  %v1370_v4 = vsel %vm1306_vm6, %v1274_v47, %v1338_v34  ;;  %vm1305_vm7 = vcmp.ge.f32.partialorder %v1273_v36, 0.0  ;;  %v1337_v38 = vmul.f32 0.2, %v1273_v36  ;;  %v1276_v24 = vadd.f32 %v8138_v16, %v1240_v20  ;;  %v2455_v62 = vld [vmem:[#allocation2 + $0x8] sm:$0xff] }
 0x11d   : > { %1403 = vst.msk [vmem:[#allocation2 + $0x28] sm:$0xff] %vm1397_vm2, %v1370_v4  ;;  %v1239_v51 = vadd.f32 %v1104_v22, %v749_v57  ;;  %v8173_v40 = vpop.f32.mrf.mxu1  ;;  %v6628_v48 = vpop.f32.mrf.mxu0  ;;  %v769_v20 = vadd.f32 %v8135_v14, %v8101_v56 }
 0x11e   : > { %v1369_v31 = vsel %vm1305_vm7, %v1273_v36, %v1337_v38  ;;  %v1242_v32 = vadd.f32 %v6628_v48, %v764_v46  ;;  %v2454_v45 = vld [vmem:[#allocation2] sm:$0xff]  ;;  %vm1308_vm8 = vcmp.ge.f32.partialorder %v1276_v24, 0.0  ;;  %v1340_v50 = vmul.f32 0.2, %v1276_v24 }
 0x11f   : > { %1402 = vst.msk [vmem:[#allocation2 + $0x20] sm:$0xff] %vm1397_vm2, %v1369_v31  ;;  %v1275_v8 = vadd.f32 %v8138_v16, %v1239_v51  ;;  %v8179_v47 = vpop.f32.mrf.mxu1  ;;  %v1114_v30 = vpop.f32.mrf.mxu0  ;;  %6902 = vmatprep.mubr.msk.f32.mxu0 %vm1397_vm2, %v2454_v45  ;;  %v779_v48 = vadd.f32 %v8142_v26, %v8105_v61 }
 0x120   : > { %v1278_v0 = vadd.f32 %v8138_v16, %v1242_v32  ;;  %v1241_v55 = vadd.f32 %v1114_v30, %v759_v6  ;;  %6903 = vmatmul.mubr.msk.f32.vlgmr.msra.gmra.mxu0 %vm1397_vm2, %v2455_v62  ;;  %v1372_v10 = vsel %vm1308_vm8, %v1276_v24, %v1340_v50  ;;  %v2457_v56 = vld [vmem:[#allocation2 + $0x18] sm:$0xff] }
 0x121   : > { %vm1307_vm9 = vcmp.ge.f32.partialorder %v1275_v8, 0.0  ;;  %v1339_v2 = vmul.f32 0.2, %v1275_v8  ;;  %v8186_v34 = vpop.f32.mrf.mxu1  ;;  %v6631_v36 = vpop.f32.mrf.mxu0  ;;  %7023 = vmatpush3.msra.mxu0 %v7823_v59  ;;  %1405 = vst.msk [vmem:[#allocation2 + $0x38] sm:$0xff] %vm1397_vm2, %v1372_v10  ;;  %v784_v59 = vadd.f32 %v8140_v18, %v8103_v58  ;;  %v8209_v18 = vld [vmem:[%s7791_s17 + $0x110] sm:$0xff] }
 0x122   : > { %vm1310_vm10 = vcmp.ge.f32.partialorder %v1278_v0, 0.0  ;;  %v1342_v57 = vmul.f32 0.2, %v1278_v0  ;;  %v1277_v15 = vadd.f32 %v8138_v16, %v1241_v55  ;;  %7024 = vmatprep.subr.mxu0 %v7936_v17  ;;  %v1244_v12 = vadd.f32 %v6631_v36, %v774_v52 }
 0x123   : > { %v1371_v54 = vsel %vm1307_vm9, %v1275_v8, %v1339_v2  ;;  %v8194_v22 = vpop.f32.mrf.mxu1  ;;  %v1124_v46 = vpop.f32.mrf.mxu0  ;;  %v2456_v4 = vld [vmem:[#allocation2 + $0x10] sm:$0xff]  ;;  %7025 = vmatpush3.msra.mxu0 %v7936_v17  ;;  %v794_v55 = vadd.f32 %v8145_v49, %v8107_v63  ;;  %v789_v49 = vadd.f32 %v8148_v43, %v8109_v1 }
 0x124   : > { %1404 = vst.msk [vmem:[#allocation2 + $0x30] sm:$0xff] %vm1397_vm2, %v1371_v54  ;;  %v1374_v38 = vsel %vm1310_vm10, %v1278_v0, %v1342_v57  ;;  %vm1309_vm11 = vcmp.ge.f32.partialorder %v1277_v15, 0.0  ;;  %v1341_v24 = vmul.f32 0.2, %v1277_v15  ;;  %6830 = vmatprep.mubr.msk.f32.mxu1 %vm1397_vm2, %v2456_v4  ;;  %6905 = vmatprep.mubr.msk.f32.mxu0 %vm1397_vm2, %v2456_v4  ;;  %v1280_v14 = vadd.f32 %v8138_v16, %v1244_v12  ;;  %v8226_v62 = vld [vmem:[#allocation2 + $0x28] sm:$0xff] }
 0x125   : > { %1407 = vst.msk [vmem:[#allocation2 + $0x48] sm:$0xff] %vm1397_vm2, %v1374_v38  ;;  %v1243_v51 = vadd.f32 %v1124_v46, %v769_v20  ;;  %6831 = vmatmul.mubr.msk.f32.vlgmr.msra.gmra.mxu1 %vm1397_vm2, %v2457_v56  ;;  %6906 = vmatmul.mubr.msk.f32.gmra.mxu0 %vm1397_vm2, %v2457_v56  ;;  %v8206_v17 = vpop.f32.mrf.mxu1  ;;  %v6634_v58 = vpop.f32.mrf.mxu0  ;;  %v8230_v0 = vld [vmem:[%s7791_s17 + $0x108] sm:$0xff]  ;;  %v804_v46 = vadd.f32 %v8152_v60, %v8111_v3  ;;  %v8271_v38 = vld [vmem:[%s7791_s17 + $0x100] sm:$0xff] }
 0x126   : > { %v1373_v6 = vsel %vm1309_vm11, %v1277_v15, %v1341_v24  ;;  %v1246_v31 = vadd.f32 %v6634_v58, %v784_v59  ;;  %v8213_v32 = vld [vmem:[#allocation2 + $0x20] sm:$0xff]  ;;  %6951 = vmatpush3.msra.mxu1 %v8045_v33  ;;  %7026 = vmatprep.subr.mxu0 %v7950_v19  ;;  %vm1312_vm12 = vcmp.ge.f32.partialorder %v1280_v14, 0.0  ;;  %v1344_v45 = vmul.f32 0.2, %v1280_v14 }
 0x127   : > { %1406 = vst.msk [vmem:[#allocation2 + $0x40] sm:$0xff] %vm1397_vm2, %v1373_v6  ;;  %v1279_v50 = vadd.f32 %v8138_v16, %v1243_v51  ;;  %v8219_v8 = vpop.f32.mrf.mxu1  ;;  %v1134_v30 = vpop.f32.mrf.mxu0  ;;  %6833 = vmatprep.mubr.msk.f32.mxu1 %vm1397_vm2, %v8213_v32  ;;  %6908 = vmatprep.mubr.msk.f32.mxu0 %vm1397_vm2, %v8213_v32  ;;  %v799_v24 = vadd.f32 %v8157_v42, %v8113_v5 }
 0x128   : > { %v1282_v61 = vadd.f32 %v8138_v16, %v1246_v31  ;;  %v1245_v26 = vadd.f32 %v1134_v30, %v779_v48  ;;  %6952 = vmatprep.subr.mxu1 %v8209_v18  ;;  %7027 = vmatpush3.msra.mxu0 %v7950_v19  ;;  %v1376_v52 = vsel %vm1312_vm12, %v1280_v14, %v1344_v45  ;;  %v8260_v1 = vld [vmem:[#allocation2 + $0x38] sm:$0xff] }
 0x129   : > { %vm1311_vm13 = vcmp.ge.f32.partialorder %v1279_v50, 0.0  ;;  %v1343_v10 = vmul.f32 0.2, %v1279_v50  ;;  %6834 = vmatmul.mubr.msk.f32.gmra.mxu1 %vm1397_vm2, %v8226_v62  ;;  %6909 = vmatmul.mubr.msk.f32.gmra.mxu0 %vm1397_vm2, %v8226_v62  ;;  %v8239_v2 = vpop.f32.mrf.mxu1  ;;  %v6637_v36 = vpop.f32.mrf.mxu0  ;;  %1409 = vst.msk [vmem:[#allocation2 + $0x58] sm:$0xff] %vm1397_vm2, %v1376_v52  ;;  %v814_v30 = vadd.f32 %v8161_v44, %v8115_v7  ;;  %v809_v7 = vadd.f32 %v8166_v53, %v8120_v9 }
 0x12a   : > { %vm1314_vm14 = vcmp.ge.f32.partialorder %v1282_v61, 0.0  ;;  %v1346_v57 = vmul.f32 0.2, %v1282_v61  ;;  %v1281_v19 = vadd.f32 %v8138_v16, %v1245_v26  ;;  %6953 = vmatpush3.msra.mxu1 %v8209_v18  ;;  %7028 = vmatprep.subr.mxu0 %v7964_v21  ;;  %v1248_v15 = vadd.f32 %v6637_v36, %v794_v55 }
 0x12b   : > { %v1375_v63 = vsel %vm1311_vm13, %v1279_v50, %v1343_v10  ;;  %v8247_v20 = vpop.f32.mrf.mxu1  ;;  %v1144_v54 = vpop.f32.mrf.mxu0  ;;  %v8249_v12 = vld [vmem:[#allocation2 + $0x30] sm:$0xff]  ;;  %6954 = vmatprep.subr.mxu1 %v8230_v0  ;;  %7029 = vmatpush3.msra.mxu0 %v7964_v21  ;;  %v8292_v50 = vld [vmem:[%s7791_s17 + $0xf8] sm:$0xff] }
 0x12c   : > { %1408 = vst.msk [vmem:[#allocation2 + $0x50] sm:$0xff] %vm1397_vm2, %v1375_v63  ;;  %v1378_v4 = vsel %vm1314_vm14, %v1282_v61, %v1346_v57  ;;  %vm1313_vm15 = vcmp.ge.f32.partialorder %v1281_v19, 0.0  ;;  %v1345_v43 = vmul.f32 0.2, %v1281_v19  ;;  %6836 = vmatprep.mubr.msk.f32.mxu1 %vm1397_vm2, %v8249_v12  ;;  %6911 = vmatprep.mubr.msk.f32.mxu0 %vm1397_vm2, %v8249_v12  ;;  %v1284_v21 = vadd.f32 %v8138_v16, %v1248_v15  ;;  %v8288_v45 = vld [vmem:[#allocation2 + $0x48] sm:$0xff] }
 0x12d   : > { %1411 = vst.msk [vmem:[#allocation2 + $0x68] sm:$0xff] %vm1397_vm2, %v1378_v4  ;;  %v1247_v59 = vadd.f32 %v1144_v54, %v789_v49  ;;  %6837 = vmatmul.mubr.msk.f32.gmra.mxu1 %vm1397_vm2, %v8260_v1  ;;  %6912 = vmatmul.mubr.msk.f32.gmra.mxu0 %vm1397_vm2, %v8260_v1  ;;  %v8268_v3 = vpop.f32.mrf.mxu1  ;;  %v6640_v60 = vpop.f32.mrf.mxu0  ;;  %v824_v63 = vadd.f32 %v8173_v40, %v8124_v11 }
 0x12e   : > { %v1377_v56 = vsel %vm1313_vm15, %v1281_v19, %v1345_v43  ;;  %v1250_v14 = vadd.f32 %v6640_v60, %v804_v46  ;;  %v8275_v51 = vld [vmem:[#allocation2 + $0x40] sm:$0xff]  ;;  %6955 = vmatpush3.msra.mxu1 %v8230_v0  ;;  %7030 = vmatprep.subr.mxu0 %v7978_v23  ;;  %vm1316_vm0 = vcmp.ge.f32.partialorder %v1284_v21, 0.0  ;;  %v1348_v58 = vmul.f32 0.2, %v1284_v21  ;;  %v8333_v46 = vld [vmem:[%s7791_s17 + $0xf0] sm:$0xff] }
 0x12f   : > { %1410 = vst.msk [vmem:[#allocation2 + $0x60] sm:$0xff] %vm1397_vm2, %v1377_v56  ;;  %v1283_v48 = vadd.f32 %v8138_v16, %v1247_v59  ;;  %v8281_v6 = vpop.f32.mrf.mxu1  ;;  %v1154_v31 = vpop.f32.mrf.mxu0  ;;  %6839 = vmatprep.mubr.msk.f32.mxu1 %vm1397_vm2, %v8275_v51  ;;  %6914 = vmatprep.mubr.msk.f32.mxu0 %vm1397_vm2, %v8275_v51  ;;  %10143 = vst [vmem:[#allocation16_spill] sm:$0xff] %v8333_v46  ;;  %v819_v4 = vadd.f32 %v8179_v47, %v8133_v13 }
 0x130   : > { %v1286_v5 = vadd.f32 %v8138_v16, %v1250_v14  ;;  %v1249_v42 = vadd.f32 %v1154_v31, %v799_v24  ;;  %6956 = vmatprep.subr.mxu1 %v8271_v38  ;;  %7031 = vmatpush3.msra.mxu0 %v7978_v23  ;;  %v1380_v61 = vsel %vm1316_vm0, %v1284_v21, %v1348_v58  ;;  %v8322_v53 = vld [vmem:[#allocation2 + $0x58] sm:$0xff]  ;;  %v8356_v31 = vld [vmem:[%s7791_s17 + $0xe8] sm:$0xff] }
 0x131   : > { %vm1315_vm1 = vcmp.ge.f32.partialorder %v1283_v48, 0.0  ;;  %v1347_v26 = vmul.f32 0.2, %v1283_v48  ;;  %6840 = vmatmul.mubr.msk.f32.gmra.mxu1 %vm1397_vm2, %v8288_v45  ;;  %6915 = vmatmul.mubr.msk.f32.gmra.mxu0 %vm1397_vm2, %v8288_v45  ;;  %v8301_v55 = vpop.f32.mrf.mxu1  ;;  %v6643_v52 = vpop.f32.mrf.mxu0  ;;  %1413 = vst.msk [vmem:[#allocation2 + $0x78] sm:$0xff] %vm1397_vm2, %v1380_v61  ;;  %v834_v13 = vadd.f32 %v8186_v34, %v8067_v35  ;;  %10144 = vst [vmem:[#allocation17_spill] sm:$0xff] %v8356_v31 }
 0x132   : > { %vm1318_vm3 = vcmp.ge.f32.partialorder %v1286_v5, 0.0  ;;  %v1350_v10 = vmul.f32 0.2, %v1286_v5  ;;  %v1285_v23 = vadd.f32 %v8138_v16, %v1249_v42  ;;  %6957 = vmatpush3.msra.mxu1 %v8271_v38  ;;  %7032 = vmatprep.subr.mxu0 %v7991_v25  ;;  %v1252_v36 = vadd.f32 %v6643_v52, %v814_v30 }
 0x133   : > { %v1379_v44 = vsel %vm1315_vm1, %v1283_v48, %v1347_v26  ;;  %v8309_v57 = vpop.f32.mrf.mxu1  ;;  %v1164_v19 = vpop.f32.mrf.mxu0  ;;  %v8311_v49 = vld [vmem:[#allocation2 + $0x50] sm:$0xff]  ;;  %6958 = vmatprep.subr.mxu1 %v8292_v50  ;;  %7033 = vmatpush3.msra.mxu0 %v7991_v25  ;;  %v844_v52 = vadd.f32 %v8206_v17, %v8073_v39 }
 0x134   : > { %1412 = vst.msk [vmem:[#allocation2 + $0x70] sm:$0xff] %vm1397_vm2, %v1379_v44  ;;  %v1382_v15 = vsel %vm1318_vm3, %v1286_v5, %v1350_v10  ;;  %vm1317_vm4 = vcmp.ge.f32.partialorder %v1285_v23, 0.0  ;;  %v1349_v9 = vmul.f32 0.2, %v1285_v23  ;;  %6842 = vmatprep.mubr.msk.f32.mxu1 %vm1397_vm2, %v8311_v49  ;;  %6917 = vmatprep.mubr.msk.f32.mxu0 %vm1397_vm2, %v8311_v49  ;;  %v1288_v25 = vadd.f32 %v8138_v16, %v1252_v36  ;;  %v8352_v48 = vld [vmem:[#allocation2 + $0x68] sm:$0xff] }
 0x135   : > { %1415 = vst.msk [vmem:[#allocation2 + $0x88] sm:$0xff] %vm1397_vm2, %v1382_v15  ;;  %v1251_v54 = vadd.f32 %v1164_v19, %v809_v7  ;;  %6843 = vmatmul.mubr.msk.f32.gmra.mxu1 %vm1397_vm2, %v8322_v53  ;;  %6918 = vmatmul.mubr.msk.f32.gmra.mxu0 %vm1397_vm2, %v8322_v53  ;;  %v6646_v11 = vpop.f32.mrf.mxu0  ;;  %v8330_v40 = vpop.f32.mrf.mxu1  ;;  %v8397_v15 = vld [vmem:[%s7791_s17 + $0xe0] sm:$0xff] }
 0x136   : > { %v1381_v43 = vsel %vm1317_vm4, %v1285_v23, %v1349_v9  ;;  %v1254_v21 = vadd.f32 %v6646_v11, %v824_v63  ;;  %v8337_v59 = vld [vmem:[#allocation2 + $0x60] sm:$0xff]  ;;  %6959 = vmatpush3.msra.mxu1 %v8292_v50  ;;  %7034 = vmatprep.subr.mxu0 %v8000_v27  ;;  %vm1320_vm5 = vcmp.ge.f32.partialorder %v1288_v25, 0.0  ;;  %v1352_v60 = vmul.f32 0.2, %v1288_v25  ;;  %10147 = vst [vmem:[#allocation20_spill] sm:$0xff] %v8397_v15 }
 0x137   : > { %1414 = vst.msk [vmem:[#allocation2 + $0x80] sm:$0xff] %vm1397_vm2, %v1381_v43  ;;  %v1287_v24 = vadd.f32 %v8138_v16, %v1251_v54  ;;  %v1174_v56 = vpop.f32.mrf.mxu0  ;;  %v8343_v14 = vpop.f32.mrf.mxu1  ;;  %6845 = vmatprep.mubr.msk.f32.mxu1 %vm1397_vm2, %v8337_v59  ;;  %6920 = vmatprep.mubr.msk.f32.mxu0 %vm1397_vm2, %v8337_v59 }
 0x138   : > { %v1290_v47 = vadd.f32 %v8138_v16, %v1254_v21  ;;  %v1253_v58 = vadd.f32 %v1174_v56, %v819_v4  ;;  %6960 = vmatprep.subr.mxu1 %v8333_v46  ;;  %7035 = vmatpush3.msra.mxu0 %v8000_v27  ;;  %v1384_v5 = vsel %vm1320_vm5, %v1288_v25, %v1352_v60  ;;  %v8385_v39 = vld [vmem:[#allocation2 + $0x78] sm:$0xff] }
 0x139   : > { %vm1319_vm6 = vcmp.ge.f32.partialorder %v1287_v24, 0.0  ;;  %v1351_v42 = vmul.f32 0.2, %v1287_v24  ;;  %6846 = vmatmul.mubr.msk.f32.gmra.mxu1 %vm1397_vm2, %v8352_v48  ;;  %6921 = vmatmul.mubr.msk.f32.gmra.mxu0 %vm1397_vm2, %v8352_v48  ;;  %v6649_v35 = vpop.f32.mrf.mxu0  ;;  %v8363_v34 = vpop.f32.mrf.mxu1  ;;  %1417 = vst.msk [vmem:[#allocation2 + $0x98] sm:$0xff] %vm1397_vm2, %v1384_v5  ;;  %v829_v27 = vadd.f32 %v8194_v22, %v8071_v37  ;;  %10146 = vst [vmem:[#allocation19_spill] sm:$0xff] %v8385_v39 }
 0x13a   : > { %vm1322_vm7 = vcmp.ge.f32.partialorder %v1290_v47, 0.0  ;;  %v1354_v30 = vmul.f32 0.2, %v1290_v47  ;;  %v1289_v61 = vadd.f32 %v8138_v16, %v1253_v58  ;;  %v1256_v26 = vadd.f32 %v6649_v35, %v834_v13  ;;  %6961 = vmatpush3.msra.mxu1 %v8333_v46  ;;  %7036 = vmatprep.subr.mxu0 %v8009_v28 }
 0x13b   : > { %v1383_v10 = vsel %vm1319_vm6, %v1287_v24, %v1351_v42  ;;  %v1184_v23 = vpop.f32.mrf.mxu0  ;;  %v8373_v7 = vpop.f32.mrf.mxu1  ;;  %v8375_v44 = vld [vmem:[#allocation2 + $0x70] sm:$0xff]  ;;  %6962 = vmatprep.subr.mxu1 %v8356_v31  ;;  %7037 = vmatpush3.msra.mxu0 %v8009_v28  ;;  %v839_v22 = vadd.f32 %v8219_v8, %v8075_v41  ;;  %v10149_v8 = vld [vmem:[#allocation10_spill] sm:$0xff] }
 0x13c   : > { %10145 = vst [vmem:[#allocation18_spill] sm:$0xff] %v8375_v44  ;;  %1416 = vst.msk [vmem:[#allocation2 + $0x90] sm:$0xff] %vm1397_vm2, %v1383_v10  ;;  %v1386_v36 = vsel %vm1322_vm7, %v1290_v47, %v1354_v30  ;;  %vm1321_vm8 = vcmp.ge.f32.partialorder %v1289_v61, 0.0  ;;  %v1353_v19 = vmul.f32 0.2, %v1289_v61  ;;  %v1292_v37 = vadd.f32 %v8138_v16, %v1256_v26  ;;  %6848 = vmatprep.mubr.msk.f32.mxu1 %vm1397_vm2, %v8375_v44  ;;  %v8414_v13 = vld [vmem:[#allocation2 + $0x88] sm:$0xff] }
 0x13d   : > { %6923 = vmatprep.mubr.msk.f32.mxu0 %vm1397_vm2, %v8375_v44  ;;  %1419 = vst.msk [vmem:[#allocation2 + $0xa8] sm:$0xff] %vm1397_vm2, %v1386_v36  ;;  %v1255_v28 = vadd.f32 %v1184_v23, %v829_v27  ;;  %6849 = vmatmul.mubr.msk.f32.gmra.mxu1 %vm1397_vm2, %v8385_v39  ;;  %v6652_v17 = vpop.f32.mrf.mxu0  ;;  %v8394_v63 = vpop.f32.mrf.mxu1  ;;  %v854_v11 = vadd.f32 %v8239_v2, %v10149_v8  ;;  %10150 = vst [vmem:[#allocation10_spill] sm:$0xff] %v8414_v13  ;;  %v8418_v2 = vld [vmem:[%s7791_s17 + $0xd8] sm:$0xff]  ;;  %v10154_v27 = vld [vmem:[#allocation12_spill] sm:$0xff] }
 0x13e   : > { %6924 = vmatmul.mubr.msk.f32.gmra.mxu0 %vm1397_vm2, %v8385_v39  ;;  %v1385_v9 = vsel %vm1321_vm8, %v1289_v61, %v1353_v19  ;;  %vm1324_vm9 = vcmp.ge.f32.partialorder %v1292_v37, 0.0  ;;  %v1356_v25 = vmul.f32 0.2, %v1292_v37  ;;  %v1258_v54 = vadd.f32 %v6652_v17, %v844_v52  ;;  %v8399_v41 = vld [vmem:[#allocation2 + $0x80] sm:$0xff]  ;;  %6963 = vmatpush3.msra.mxu1 %v8356_v31  ;;  %10151 = vst [vmem:[#allocation22_spill] sm:$0xff] %v8418_v2  ;;  %v10153_v61 = vld [vmem:[#allocation11_spill] sm:$0xff] }
 0x13f   : > { %10148 = vst [vmem:[#allocation21_spill] sm:$0xff] %v8399_v41  ;;  %7038 = vmatprep.subr.mxu0 %v8014_v29  ;;  %1418 = vst.msk [vmem:[#allocation2 + $0xa0] sm:$0xff] %vm1397_vm2, %v1385_v9  ;;  %v1291_v4 = vadd.f32 %v8138_v16, %v1255_v28  ;;  %v1194_v43 = vpop.f32.mrf.mxu0  ;;  %v8407_v21 = vpop.f32.mrf.mxu1  ;;  %6851 = vmatprep.mubr.msk.f32.mxu1 %vm1397_vm2, %v8399_v41  ;;  %v849_v26 = vadd.f32 %v8247_v20, %v10153_v61  ;;  %v10157_v28 = vld [vmem:[#allocation13_spill] sm:$0xff]  ;;  %v8459_v8 = vld [vmem:[%s7791_s17 + $0xd0] sm:$0xff] }
 0x140   : > { %6926 = vmatprep.mubr.msk.f32.mxu0 %vm1397_vm2, %v8399_v41  ;;  %v1388_v60 = vsel %vm1324_vm9, %v1292_v37, %v1356_v25  ;;  %v1294_v24 = vadd.f32 %v8138_v16, %v1258_v54  ;;  %v1257_v56 = vadd.f32 %v1194_v43, %v839_v22  ;;  %6964 = vmatprep.subr.mxu1 %v8397_v15 }
 0x141   : > { %7039 = vmatpush3.msra.mxu0 %v8014_v29  ;;  %1421 = vst.msk [vmem:[#allocation2 + $0xb8] sm:$0xff] %vm1397_vm2, %v1388_v60  ;;  %vm1323_vm10 = vcmp.ge.f32.partialorder %v1291_v4, 0.0  ;;  %v1355_v47 = vmul.f32 0.2, %v1291_v4  ;;  %6852 = vmatmul.mubr.msk.f32.gmra.mxu1 %vm1397_vm2, %v8414_v13  ;;  %v6655_v58 = vpop.f32.mrf.mxu0  ;;  %v8426_v5 = vpop.f32.mrf.mxu1  ;;  %v10152_v29 = vld [vmem:[#allocation7_spill] sm:$0xff]  ;;  %v864_v52 = vadd.f32 %v8268_v3, %v10154_v27  ;;  %v8447_v3 = vld [vmem:[#allocation2 + $0x98] sm:$0xff]  ;;  %v859_v17 = vadd.f32 %v8281_v6, %v10157_v28 }
 0x142   : > { %6927 = vmatmul.mubr.msk.f32.gmra.mxu0 %vm1397_vm2, %v8414_v13  ;;  %vm1326_vm11 = vcmp.ge.f32.partialorder %v1294_v24, 0.0  ;;  %v1358_v42 = vmul.f32 0.2, %v1294_v24  ;;  %v1293_v35 = vadd.f32 %v8138_v16, %v1257_v56  ;;  %v1260_v30 = vadd.f32 %v6655_v58, %v854_v11  ;;  %6965 = vmatpush3.msra.mxu1 %v8397_v15  ;;  %10156 = vst [vmem:[#allocation11_spill] sm:$0xff] %v8447_v3  ;;  %v10160_v60 = vld [vmem:[#allocation8_spill] sm:$0xff] }
 0x143   : > { %7040 = vmatprep.subr.mxu0 %v10152_v29  ;;  %v1387_v10 = vsel %vm1323_vm10, %v1291_v4, %v1355_v47  ;;  %v1204_v23 = vpop.f32.mrf.mxu0  ;;  %v8435_v36 = vpop.f32.mrf.mxu1  ;;  %v8437_v19 = vld [vmem:[#allocation2 + $0x90] sm:$0xff]  ;;  %6966 = vmatprep.subr.mxu1 %v8418_v2  ;;  %10158 = vst [vmem:[#allocation12_spill] sm:$0xff] %v8459_v8 }
 0x144   : > { %10155 = vst [vmem:[#allocation7_spill] sm:$0xff] %v8437_v19  ;;  %7041 = vmatpush3.msra.mxu0 %v10152_v29  ;;  %1420 = vst.msk [vmem:[#allocation2 + $0xb0] sm:$0xff] %vm1397_vm2, %v1387_v10  ;;  %v1390_v37 = vsel %vm1326_vm11, %v1294_v24, %v1358_v42  ;;  %vm1325_vm12 = vcmp.ge.f32.partialorder %v1293_v35, 0.0  ;;  %v1357_v22 = vmul.f32 0.2, %v1293_v35  ;;  %v1296_v20 = vadd.f32 %v8138_v16, %v1260_v30  ;;  %v10161_v24 = vld [vmem:[#allocation14_spill] sm:$0xff] }
 0x145   : > { %6854 = vmatprep.mubr.msk.f32.mxu1 %vm1397_vm2, %v8437_v19  ;;  %6929 = vmatprep.mubr.msk.f32.mxu0 %vm1397_vm2, %v8437_v19  ;;  %1423 = vst.msk [vmem:[#allocation2 + $0xc8] sm:$0xff] %vm1397_vm2, %v1390_v37  ;;  %v1259_v9 = vadd.f32 %v1204_v23, %v849_v26  ;;  %v6658_v25 = vpop.f32.mrf.mxu0  ;;  %v8456_v54 = vpop.f32.mrf.mxu1  ;;  %v874_v56 = vadd.f32 %v8301_v55, %v10161_v24  ;;  %v8476_v61 = vld [vmem:[#allocation2 + $0xa8] sm:$0xff] }
 0x146   : > { %6855 = vmatmul.mubr.msk.f32.gmra.mxu1 %vm1397_vm2, %v8447_v3  ;;  %6930 = vmatmul.mubr.msk.f32.gmra.mxu0 %vm1397_vm2, %v8447_v3  ;;  %v1389_v11 = vsel %vm1325_vm12, %v1293_v35, %v1357_v22  ;;  %vm1328_vm13 = vcmp.ge.f32.partialorder %v1296_v20, 0.0  ;;  %v1360_v4 = vmul.f32 0.2, %v1296_v20  ;;  %v1262_v43 = vadd.f32 %v6658_v25, %v864_v52  ;;  %v8461_v6 = vld [vmem:[#allocation2 + $0xa0] sm:$0xff]  ;;  %10162 = vst [vmem:[#allocation8_spill] sm:$0xff] %v8476_v61  ;;  %v8480_v55 = vld [vmem:[%s7791_s17 + $0xc8] sm:$0xff] }
 0x147   : > { %10159 = vst [vmem:[#allocation13_spill] sm:$0xff] %v8461_v6  ;;  %6967 = vmatpush3.msra.mxu1 %v8418_v2  ;;  %7042 = vmatprep.subr.mxu0 %v10160_v60  ;;  %1422 = vst.msk [vmem:[#allocation2 + $0xc0] sm:$0xff] %vm1397_vm2, %v1389_v11  ;;  %v1295_v47 = vadd.f32 %v8138_v16, %v1259_v9  ;;  %v1214_v58 = vpop.f32.mrf.mxu0  ;;  %v8469_v42 = vpop.f32.mrf.mxu1  ;;  %v10164_v22 = vld [vmem:[#allocation9_spill] sm:$0xff] }
 0x148   : > { %6857 = vmatprep.mubr.msk.f32.mxu1 %vm1397_vm2, %v8461_v6  ;;  %6932 = vmatprep.mubr.msk.f32.mxu0 %vm1397_vm2, %v8461_v6  ;;  %v1392_v35 = vsel %vm1328_vm13, %v1296_v20, %v1360_v4  ;;  %v1298_v30 = vadd.f32 %v8138_v16, %v1262_v43  ;;  %v1261_v29 = vadd.f32 %v1214_v58, %v859_v17  ;;  %v10165_v20 = vld [vmem:[#allocation15_spill] sm:$0xff]  ;;  %v8502_v4 = vld [vmem:[%s7791_s17 + $0x58] sm:$0xff] }
 0x149   : > { %6968 = vmatprep.subr.mxu1 %v8459_v8  ;;  %10163 = vst [vmem:[#allocation14_spill] sm:$0xff] %v8480_v55  ;;  %7043 = vmatpush3.msra.mxu0 %v10160_v60  ;;  %1425 = vst.msk [vmem:[#allocation2 + $0xd8] sm:$0xff] %vm1397_vm2, %v1392_v35  ;;  %vm1327_vm14 = vcmp.ge.f32.partialorder %v1295_v47, 0.0  ;;  %v1359_v26 = vmul.f32 0.2, %v1295_v47  ;;  %v6661_v27 = vpop.f32.mrf.mxu0  ;;  %v8488_v52 = vpop.f32.mrf.mxu1  ;;  %v869_v28 = vadd.f32 %v8309_v57, %v10165_v20  ;;  %v8510_v24 = vld [vmem:[#allocation2 + $0xb8] sm:$0xff] }
 0x14a   : > { %6858 = vmatmul.mubr.msk.f32.gmra.mxu1 %vm1397_vm2, %v8476_v61  ;;  %6933 = vmatmul.mubr.msk.f32.gmra.mxu0 %vm1397_vm2, %v8476_v61  ;;  %vm1330_vm15 = vcmp.ge.f32.partialorder %v1298_v30, 0.0  ;;  %v1362_v10 = vmul.f32 0.2, %v1298_v30  ;;  %v1297_v23 = vadd.f32 %v8138_v16, %v1261_v29  ;;  %v1264_v37 = vadd.f32 %v6661_v27, %v874_v56  ;;  %10167 = vst [vmem:[#allocation15_spill] sm:$0xff] %v8510_v24  ;;  %v8522_v35 = vld [vmem:[%s7791_s17 + $0xc0] sm:$0xff] }
 0x14b   : > { %6969 = vmatpush3.msra.mxu1 %v8459_v8  ;;  %7044 = vmatprep.subr.mxu0 %v10164_v22  ;;  %v1391_v17 = vsel %vm1327_vm14, %v1295_v47, %v1359_v26  ;;  %v1224_v9 = vpop.f32.mrf.mxu0  ;;  %v8495_v25 = vpop.f32.mrf.mxu1  ;;  %v8497_v11 = vld [vmem:[#allocation2 + $0xb0] sm:$0xff]  ;;  %10168 = vst [vmem:[#allocation23_spill] sm:$0xff] %v8522_v35 }
 0x14c   : > { %10166 = vst [vmem:[#allocation9_spill] sm:$0xff] %v8497_v11  ;;  %6970 = vmatprep.subr.mxu1 %v8480_v55  ;;  %7045 = vmatpush3.msra.mxu0 %v10164_v22  ;;  %1424 = vst.msk [vmem:[#allocation2 + $0xd0] sm:$0xff] %vm1397_vm2, %v1391_v17  ;;  %v1394_v43 = vsel %vm1330_vm15, %v1298_v30, %v1362_v10  ;;  %vm1329_vm0 = vcmp.ge.f32.partialorder %v1297_v23, 0.0  ;;  %v1361_v60 = vmul.f32 0.2, %v1297_v23  ;;  %v8538_v22 = vld [vmem:[#allocation2 + $0xc8] sm:$0xff] }
 0x14d   : > { %v1300_v57 = vadd.f32 %v8138_v16, %v1264_v37  ;;  %6860 = vmatprep.mubr.msk.f32.mxu1 %vm1397_vm2, %v8497_v11  ;;  %6935 = vmatprep.mubr.msk.f32.mxu0 %vm1397_vm2, %v8497_v11  ;;  %1427 = vst.msk [vmem:[#allocation2 + $0xe8] sm:$0xff] %vm1397_vm2, %v1394_v43  ;;  %v1263_v56 = vadd.f32 %v1224_v9, %v869_v28  ;;  %v8517_v47 = vpop.f32.mrf.mxu1  ;;  %v8519_v58 = vpop.f32.mrf.mxu0  ;;  %10170 = vst [vmem:[#allocation25_spill] sm:$0xff] %v8538_v22 }
 0x14e   : > { %6861 = vmatmul.mubr.msk.f32.gmra.mxu1 %vm1397_vm2, %v8510_v24  ;;  %6936 = vmatmul.mubr.msk.f32.gmra.mxu0 %vm1397_vm2, %v8510_v24  ;;  %v1393_v30 = vsel %vm1329_vm0, %v1297_v23, %v1361_v60  ;;  %v8524_v26 = vld [vmem:[#allocation2 + $0xc0] sm:$0xff] }
 0x14f   : > { %vm1332_vm1 = vcmp.ge.f32.partialorder %v1300_v57, 0.0  ;;  %v1364_v29 = vmul.f32 0.2, %v1300_v57  ;;  %10169 = vst [vmem:[#allocation24_spill] sm:$0xff] %v8524_v26  ;;  %6971 = vmatpush3.msra.mxu1 %v8480_v55  ;;  %7082 = vmatprep.subr.mxu0 %v8502_v4  ;;  %1426 = vst.msk [vmem:[#allocation2 + $0xe0] sm:$0xff] %vm1397_vm2, %v1393_v30  ;;  %v1299_v27 = vadd.f32 %v8138_v16, %v1263_v56  ;;  %v8530_v10 = vpop.f32.mrf.mxu1  ;;  %v8536_v23 = vpop.f32.mrf.mxu0 }
 0x150   : > { %6863 = vmatprep.mubr.msk.f32.mxu1 %vm1397_vm2, %v8524_v26  ;;  %6938 = vmatprep.mubr.msk.f32.mxu0 %vm1397_vm2, %v8524_v26  ;;  %v8563_v56 = vld [vmem:[#allocation2 + $0xd8] sm:$0xff] }
 0x151   : > { %v1396_v37 = vsel %vm1332_vm1, %v1300_v57, %v1364_v29  ;;  %6972 = vmatprep.subr.mxu1 %v8522_v35  ;;  %vm1331_vm3 = vcmp.ge.f32.partialorder %v1299_v27, 0.0  ;;  %v1363_v20 = vmul.f32 0.2, %v1299_v27  ;;  %v8546_v28 = vpop.f32.mrf.mxu1  ;;  %v8548_v17 = vpop.f32.mrf.mxu0  ;;  %10172 = vst [vmem:[#allocation27_spill] sm:$0xff] %v8563_v56 }
 0x152   : > { %1429 = vst.msk [vmem:[#allocation2 + $0xf8] sm:$0xff] %vm1397_vm2, %v1396_v37  ;;  %6864 = vmatmul.mubr.msk.f32.gmra.mxu1 %vm1397_vm2, %v8538_v22  ;;  %6939 = vmatmul.mubr.msk.f32.gmra.mxu0 %vm1397_vm2, %v8538_v22 }
 0x153   : > { %6973 = vmatpush3.msra.mxu1 %v8522_v35  ;;  %v1395_v9 = vsel %vm1331_vm3, %v1299_v27, %v1363_v20  ;;  %v8551_v43 = vpop.f32.mrf.mxu1  ;;  %v8553_v60 = vld [vmem:[#allocation2 + $0xd0] sm:$0xff]  ;;  %v8555_v57 = vpop.f32.mrf.mxu0 }
 0x154   : > { %10171 = vst [vmem:[#allocation26_spill] sm:$0xff] %v8553_v60  ;;  %7142 = vmatprep.subr.mxu1 %v8045_v33  ;;  %1428 = vst.msk [vmem:[#allocation2 + $0xf0] sm:$0xff] %vm1397_vm2, %v1395_v9  ;;  %6866 = vmatprep.mubr.msk.f32.mxu1 %vm1397_vm2, %v8553_v60  ;;  %v8581_v20 = vld [vmem:[#allocation2 + $0xe8] sm:$0xff] }
 0x155   : > { %6941 = vmatprep.mubr.msk.f32.mxu0 %vm1397_vm2, %v8553_v60  ;;  %v8569_v30 = vpop.f32.mrf.mxu1  ;;  %v6772_v29 = vpop.f32.mrf.mxu0  ;;  %10174 = vst [vmem:[#allocation29_spill] sm:$0xff] %v8581_v20 }
 0x156   : > { %6867 = vmatmul.mubr.msk.f32.gmra.mxu1 %vm1397_vm2, %v8563_v56  ;;  %6942 = vmatmul.mubr.msk.f32.gmra.mxu0 %vm1397_vm2, %v8563_v56  ;;  %v8571_v33 = vld [vmem:[#allocation2 + $0xe0] sm:$0xff] }
 0x157   : > { %10173 = vst [vmem:[#allocation28_spill] sm:$0xff] %v8571_v33  ;;  %v8573_v27 = vpop.f32.mrf.mxu1  ;;  %6869 = vmatprep.mubr.msk.f32.mxu1 %vm1397_vm2, %v8571_v33  ;;  %6944 = vmatprep.mubr.msk.f32.mxu0 %vm1397_vm2, %v8571_v33  ;;  %v8579_v37 = vpop.f32.mrf.mxu0 }
 0x159   : > { %v8587_v9 = vpop.f32.mrf.mxu1  ;;  %v8589_v35 = vpop.f32.mrf.mxu0  ;;  %v8601_v33 = vld [vmem:[#allocation2 + $0xf8] sm:$0xff] }
 0x15a   : > { %6870 = vmatmul.mubr.msk.f32.gmra.mxu1 %vm1397_vm2, %v8581_v20  ;;  %6945 = vmatmul.mubr.msk.f32.gmra.mxu0 %vm1397_vm2, %v8581_v20  ;;  %10176 = vst [vmem:[#allocation31_spill] sm:$0xff] %v8601_v33 }
 0x15b   : > { %v8591_v56 = vpop.f32.mrf.mxu1  ;;  %v8593_v55 = vld [vmem:[#allocation2 + $0xf0] sm:$0xff]  ;;  %v8595_v60 = vpop.f32.mrf.mxu0 }
 0x15c   : > { %10175 = vst [vmem:[#allocation30_spill] sm:$0xff] %v8593_v55  ;;  %6872 = vmatprep.mubr.msk.f32.mxu1 %vm1397_vm2, %v8593_v55  ;;  %6947 = vmatprep.mubr.msk.f32.mxu0 %vm1397_vm2, %v8593_v55 }
 0x15d   : > { %v8607_v20 = vpop.f32.mrf.mxu1  ;;  %v8609_v22 = vpop.f32.mrf.mxu0 }
 0x15e   : > { %6873 = vmatmul.mubr.msk.f32.gmra.mxu1 %vm1397_vm2, %v8601_v33  ;;  %6948 = vmatmul.mubr.msk.f32.gmra.mxu0 %vm1397_vm2, %v8601_v33 }
 0x15f   : > { %v8611_v8 = vpop.f32.mrf.mxu1  ;;  %v8613_v26 = vpop.f32.mrf.mxu0 }
 0x160   : > { %10177 = vst [vmem:[#allocation32_spill] sm:$0xff] %v8611_v8 }
 0x161   : > { %v8615_v24 = vpop.f32.mrf.mxu1  ;;  %v8617_v11 = vpop.f32.mrf.mxu0 }
 0x162   : > { %10178 = vst [vmem:[#allocation33_spill] sm:$0xff] %v8615_v24 }
 0x163   : > { %v8619_v55 = vpop.f32.mrf.mxu1  ;;  %v8621_v61 = vpop.f32.mrf.mxu0 }
 0x164   : > { %10179 = vst [vmem:[#allocation34_spill] sm:$0xff] %v8619_v55 }
 0x165   : > { %v8623_v2 = vpop.f32.mrf.mxu1  ;;  %v8627_v33 = vpop.f32.mrf.mxu0 }
 0x166   : > { %10180 = vst [vmem:[#allocation35_spill] sm:$0xff] %v8623_v2 }
 0x167   : > { %v8625_v6 = vpop.f32.mrf.mxu1  ;;  %v8633_v19 = vpop.f32.mrf.mxu0 }
 0x168   : > { %10181 = vst [vmem:[#allocation36_spill] sm:$0xff] %v8625_v6 }
 0x169   : > { %v8629_v15 = vpop.f32.mrf.mxu1  ;;  %v8636_v39 = vpop.f32.mrf.mxu0 }
 0x16a   : > { %10182 = vst [vmem:[#allocation37_spill] sm:$0xff] %v8629_v15 }
 0x16b   : > { %v8631_v3 = vpop.f32.mrf.mxu1  ;;  %v8643_v8 = vpop.f32.mrf.mxu0 }
 0x16c   : > { %10183 = vst [vmem:[#allocation38_spill] sm:$0xff] %v8631_v3 }
 0x16d   : > { %v6718_v13 = vpop.f32.mrf.mxu1 }
 0x16e   : > { %v1833_v31 = vadd.f32 %v6718_v13, %v8330_v40 }
 0x16f   : > { %v1827_v41 = vpop.f32.mrf.mxu1 }
 0x170   : > { %v2287_v55 = vadd.f32 %v8519_v58, %v1833_v31  ;;  %v1828_v2 = vadd.f32 %v1827_v41, %v8343_v14 }
 0x171   : > { %v6721_v24 = vpop.f32.mrf.mxu1 }
 0x172   : > { %v2315_v6 = vadd.f32 %v8138_v16, %v2287_v55  ;;  %v2286_v46 = vadd.f32 %v8536_v23, %v1828_v2  ;;  %v1843_v15 = vadd.f32 %v6721_v24, %v8363_v34  ;;  %v8652_v23 = vpop.f32.mrf.mxu0 }
 0x173   : > { %v1837_v3 = vpop.f32.mrf.mxu1 }
 0x174   : > { %vm2343_vm4 = vcmp.ge.f32.partialorder %v2315_v6, 0.0  ;;  %v2371_v44 = vmul.f32 0.2, %v2315_v6  ;;  %v2314_v40 = vadd.f32 %v8138_v16, %v2286_v46  ;;  %v1838_v13 = vadd.f32 %v1837_v3, %v8373_v7 }
 0x175   : > { %v2289_v31 = vadd.f32 %v8548_v17, %v1843_v15  ;;  %v6724_v58 = vpop.f32.mrf.mxu1 }
 0x176   : > { %v2399_v14 = vsel %vm2343_vm4, %v2315_v6, %v2371_v44  ;;  %vm2342_vm5 = vcmp.ge.f32.partialorder %v2314_v40, 0.0  ;;  %v2370_v41 = vmul.f32 0.2, %v2314_v40  ;;  %v1853_v55 = vadd.f32 %v6724_v58, %v8394_v63  ;;  %v8664_v58 = vld [vmem:[%s8131_s6] ss:$0 sm:$0xff] }
 0x177   : > { %2427 = vst.msk [vmem:[#allocation2 + $0x108] sm:$0xff] %vm1397_vm2, %v2399_v14  ;;  %v2317_v34 = vadd.f32 %v8138_v16, %v2289_v31  ;;  %v2288_v2 = vadd.f32 %v8555_v57, %v1838_v13  ;;  %v1847_v24 = vpop.f32.mrf.mxu1 }
 0x178   : > { %v2398_v46 = vsel %vm2342_vm5, %v2314_v40, %v2370_v41  ;;  %v1848_v7 = vadd.f32 %v1847_v24, %v8407_v21  ;;  %v2291_v3 = vadd.f32 %v6772_v29, %v1853_v55  ;;  %v8660_v21 = vpop.f32.mrf.mxu0 }
 0x179   : > { %2426 = vst.msk [vmem:[#allocation2 + $0x100] sm:$0xff] %vm1397_vm2, %v2398_v46  ;;  %vm2345_vm6 = vcmp.ge.f32.partialorder %v2317_v34, 0.0  ;;  %v2373_v44 = vmul.f32 0.2, %v2317_v34  ;;  %v2316_v63 = vadd.f32 %v8138_v16, %v2288_v2  ;;  %v6727_v15 = vpop.f32.mrf.mxu1 }
 0x17a   : > { %v2319_v6 = vadd.f32 %v8138_v16, %v2291_v3  ;;  %v1863_v17 = vadd.f32 %v6727_v15, %v8426_v5  ;;  %v2290_v57 = vadd.f32 %v8579_v37, %v1848_v7  ;;  %v8674_v3 = vpop.f32.mrf.mxu0 }
 0x17b   : > { %v2401_v13 = vsel %vm2345_vm6, %v2317_v34, %v2373_v44  ;;  %vm2344_vm7 = vcmp.ge.f32.partialorder %v2316_v63, 0.0  ;;  %v2372_v40 = vmul.f32 0.2, %v2316_v63  ;;  %v1857_v31 = vpop.f32.mrf.mxu1 }
 0x17c   : > { %2429 = vst.msk [vmem:[#allocation2 + $0x118] sm:$0xff] %vm1397_vm2, %v2401_v13  ;;  %vm2347_vm8 = vcmp.ge.f32.partialorder %v2319_v6, 0.0  ;;  %v2375_v29 = vmul.f32 0.2, %v2319_v6  ;;  %v2318_v14 = vadd.f32 %v8664_v58, %v2290_v57  ;;  %v1858_v16 = vadd.f32 %v1857_v31, %v8435_v36  ;;  %v8693_v31 = vpop.f32.mrf.mxu0 }
 0x17d   : > { %v2400_v41 = vsel %vm2344_vm7, %v2316_v63, %v2372_v40  ;;  %v2293_v5 = vadd.f32 %v8589_v35, %v1863_v17  ;;  %v6730_v37 = vpop.f32.mrf.mxu1 }
 0x17e   : > { %2428 = vst.msk [vmem:[#allocation2 + $0x110] sm:$0xff] %vm1397_vm2, %v2400_v41  ;;  %v2403_v55 = vsel %vm2347_vm8, %v2319_v6, %v2375_v29  ;;  %vm2346_vm9 = vcmp.ge.f32.partialorder %v2318_v14, 0.0  ;;  %v2374_v34 = vmul.f32 0.2, %v2318_v14  ;;  %v1873_v2 = vadd.f32 %v6730_v37, %v8456_v54 }
 0x17f   : > { %2431 = vst.msk [vmem:[#allocation2 + $0x128] sm:$0xff] %vm1397_vm2, %v2403_v55  ;;  %v2321_v24 = vadd.f32 %v8664_v58, %v2293_v5  ;;  %v2292_v46 = vadd.f32 %v8595_v60, %v1858_v16  ;;  %v1867_v7 = vpop.f32.mrf.mxu1  ;;  %v8684_v60 = vld [vmem:[#allocation2 + $0x108] sm:$0xff] }
 0x180   : > { %v2402_v36 = vsel %vm2346_vm9, %v2318_v14, %v2374_v34  ;;  %v1868_v35 = vadd.f32 %v1867_v7, %v8469_v42  ;;  %v2295_v44 = vadd.f32 %v8609_v22, %v1873_v2  ;;  %v8678_v63 = vld [vmem:[#allocation2 + $0x100] sm:$0xff] }
 0x181   : > { %2430 = vst.msk [vmem:[#allocation2 + $0x120] sm:$0xff] %vm1397_vm2, %v2402_v36  ;;  %vm2349_vm10 = vcmp.ge.f32.partialorder %v2321_v24, 0.0  ;;  %v2377_v54 = vmul.f32 0.2, %v2321_v24  ;;  %v2320_v15 = vadd.f32 %v8664_v58, %v2292_v46  ;;  %v6733_v6 = vpop.f32.mrf.mxu1  ;;  %6875 = vmatprep.mubr.msk.f32.mxu1 %vm1397_vm2, %v8678_v63  ;;  %v7270_v36 = vld [vmem:[%s7791_s17 + $0x118] sm:$0xff] }
 0x182   : > { %v2323_v17 = vadd.f32 %v8664_v58, %v2295_v44  ;;  %v1883_v42 = vadd.f32 %v6733_v6, %v8488_v52  ;;  %v2294_v22 = vadd.f32 %v8613_v26, %v1868_v35  ;;  %6876 = vmatmul.mubr.msk.f32.gmra.mxu1 %vm1397_vm2, %v8684_v60 }
 0x183   : > { %v2405_v57 = vsel %vm2349_vm10, %v2321_v24, %v2377_v54  ;;  %vm2348_vm11 = vcmp.ge.f32.partialorder %v2320_v15, 0.0  ;;  %v2376_v13 = vmul.f32 0.2, %v2320_v15  ;;  %v1877_v40 = vpop.f32.mrf.mxu1  ;;  %6974 = vmatprep.mubr.msk.f32.mxu1 %vm1397_vm2, %v8213_v32  ;;  %v3561_v24 = vld [vmem:[%s7791_s17 + $0x50] sm:$0xff] }
 0x184   : > { %2433 = vst.msk [vmem:[#allocation2 + $0x138] sm:$0xff] %vm1397_vm2, %v2405_v57  ;;  %vm2351_vm12 = vcmp.ge.f32.partialorder %v2323_v17, 0.0  ;;  %v2379_v29 = vmul.f32 0.2, %v2323_v17  ;;  %v2322_v52 = vadd.f32 %v8664_v58, %v2294_v22  ;;  %v1878_v26 = vadd.f32 %v1877_v40, %v8495_v25  ;;  %v8707_v25 = vld [vmem:[#allocation2 + $0x118] sm:$0xff] }
 0x185   : > { %v2404_v14 = vsel %vm2348_vm11, %v2320_v15, %v2376_v13  ;;  %v2297_v16 = vadd.f32 %v8617_v11, %v1883_v42  ;;  %v6736_v41 = vpop.f32.mrf.mxu1  ;;  %v8699_v5 = vld [vmem:[#allocation2 + $0x110] sm:$0xff]  ;;  %v3560_v15 = vld [vmem:[%s7791_s17 + $0x48] sm:$0xff] }
 0x186   : > { %2432 = vst.msk [vmem:[#allocation2 + $0x130] sm:$0xff] %vm1397_vm2, %v2404_v14  ;;  %v2407_v32 = vsel %vm2351_vm12, %v2323_v17, %v2379_v29  ;;  %vm2350_vm13 = vcmp.ge.f32.partialorder %v2322_v52, 0.0  ;;  %v2378_v37 = vmul.f32 0.2, %v2322_v52  ;;  %v1893_v55 = vadd.f32 %v6736_v41, %v8517_v47  ;;  %7046 = vmatprep.mubr.msk.f32.mxu0 %vm1397_vm2, %v8699_v5  ;;  %6975 = vmatmul.mubr.msk.f32.vlgmr.msra.gmra.mxu1 %vm1397_vm2, %v8226_v62  ;;  %v8716_v47 = vpop.f32.mrf.mxu0 }
 0x187   : > { %2435 = vst.msk [vmem:[#allocation2 + $0x148] sm:$0xff] %vm1397_vm2, %v2407_v32  ;;  %v2325_v11 = vadd.f32 %v8664_v58, %v2297_v16  ;;  %v2296_v34 = vadd.f32 %v8621_v61, %v1878_v26  ;;  %7047 = vmatmul.mubr.msk.f32.vlgmr.msra.gmra.mxu0 %vm1397_vm2, %v8707_v25  ;;  %v1887_v2 = vpop.f32.mrf.mxu1  ;;  %6977 = vmatprep.mubr.msk.f32.mxu1 %vm1397_vm2, %v8249_v12  ;;  %v3559_v16 = vld [vmem:[%s7791_s17 + $0x40] sm:$0xff] }
 0x188   : > { %v2406_v46 = vsel %vm2350_vm13, %v2322_v52, %v2378_v37  ;;  %v1888_v62 = vadd.f32 %v1887_v2, %v8530_v10  ;;  %v2299_v7 = vadd.f32 %v8627_v33, %v1893_v55  ;;  %7143 = vmatpush3.msra.mxu1 %v7270_v36  ;;  %v8722_v35 = vld [vmem:[#allocation2 + $0x120] sm:$0xff]  ;;  %7083 = vmatpush3.msra.mxu0 %v8502_v4  ;;  %v8735_v4 = vld [vmem:[#allocation2 + $0x128] sm:$0xff] }
 0x189   : > { %2434 = vst.msk [vmem:[#allocation2 + $0x140] sm:$0xff] %vm1397_vm2, %v2406_v46  ;;  %vm2353_vm14 = vcmp.ge.f32.partialorder %v2325_v11, 0.0  ;;  %v2381_v61 = vmul.f32 0.2, %v2325_v11  ;;  %v2324_v12 = vadd.f32 %v8664_v58, %v2296_v34  ;;  %v6739_v44 = vpop.f32.mrf.mxu1  ;;  %7049 = vmatprep.mubr.msk.f32.mxu0 %vm1397_vm2, %v8722_v35  ;;  %7144 = vmatprep.subr.mxu1 %v8209_v18  ;;  %v3558_v34 = vld [vmem:[%s7791_s17 + $0x38] sm:$0xff] }
 0x18a   : > { %v2327_v10 = vadd.f32 %v8664_v58, %v2299_v7  ;;  %v1903_v33 = vadd.f32 %v6739_v44, %v8546_v28  ;;  %v2298_v54 = vadd.f32 %v8633_v19, %v1888_v62  ;;  %6978 = vmatmul.mubr.msk.f32.gmra.mxu1 %vm1397_vm2, %v8260_v1  ;;  %7084 = vmatprep.subr.mxu0 %v3561_v24  ;;  %v8742_v28 = vpop.f32.mrf.mxu0 }
 0x18b   : > { %v2409_v6 = vsel %vm2353_vm14, %v2325_v11, %v2381_v61  ;;  %vm2352_vm15 = vcmp.ge.f32.partialorder %v2324_v12, 0.0  ;;  %v2380_v17 = vmul.f32 0.2, %v2324_v12  ;;  %7050 = vmatmul.mubr.msk.f32.gmra.mxu0 %vm1397_vm2, %v8735_v4  ;;  %v1897_v42 = vpop.f32.mrf.mxu1  ;;  %6980 = vmatprep.mubr.msk.f32.mxu1 %vm1397_vm2, %v8275_v51 }
 0x18c   : > { %2437 = vst.msk [vmem:[#allocation2 + $0x158] sm:$0xff] %vm1397_vm2, %v2409_v6  ;;  %vm2355_vm0 = vcmp.ge.f32.partialorder %v2327_v10, 0.0  ;;  %v2383_v1 = vmul.f32 0.2, %v2327_v10  ;;  %v2326_v19 = vadd.f32 %v8664_v58, %v2298_v54  ;;  %v1898_v22 = vadd.f32 %v1897_v42, %v8551_v43  ;;  %7145 = vmatpush3.msra.mxu1 %v8209_v18  ;;  %7085 = vmatpush3.msra.mxu0 %v3561_v24  ;;  %v8758_v18 = vld [vmem:[#allocation2 + $0x138] sm:$0xff]  ;;  %v10184_v54 = vld [vmem:[#allocation18_spill] sm:$0xff] }
 0x18d   : > { %v2408_v57 = vsel %vm2352_vm15, %v2324_v12, %v2380_v17  ;;  %v2301_v13 = vadd.f32 %v8636_v39, %v1903_v33  ;;  %v6742_v40 = vpop.f32.mrf.mxu1  ;;  %v8749_v29 = vld [vmem:[#allocation2 + $0x130] sm:$0xff]  ;;  %7146 = vmatprep.subr.mxu1 %v8230_v0  ;;  %7086 = vmatprep.subr.mxu0 %v3560_v15 }
 0x18e   : > { %2436 = vst.msk [vmem:[#allocation2 + $0x150] sm:$0xff] %vm1397_vm2, %v2408_v57  ;;  %v2411_v51 = vsel %vm2355_vm0, %v2327_v10, %v2383_v1  ;;  %vm2354_vm1 = vcmp.ge.f32.partialorder %v2326_v19, 0.0  ;;  %v2382_v52 = vmul.f32 0.2, %v2326_v19  ;;  %v1913_v43 = vadd.f32 %v6742_v40, %v8569_v30  ;;  %7052 = vmatprep.mubr.msk.f32.mxu0 %vm1397_vm2, %v8749_v29  ;;  %6981 = vmatmul.mubr.msk.f32.gmra.mxu1 %vm1397_vm2, %v8288_v45  ;;  %v8767_v30 = vpop.f32.mrf.mxu0  ;;  %v10185_v17 = vld [vmem:[#allocation32_spill] sm:$0xff] }
 0x18f   : > { %2439 = vst.msk [vmem:[#allocation2 + $0x168] sm:$0xff] %vm1397_vm2, %v2411_v51  ;;  %v2329_v39 = vadd.f32 %v8664_v58, %v2301_v13  ;;  %v2300_v26 = vadd.f32 %v8643_v8, %v1898_v22  ;;  %7053 = vmatmul.mubr.msk.f32.gmra.mxu0 %vm1397_vm2, %v8758_v18  ;;  %v1907_v14 = vpop.f32.mrf.mxu1  ;;  %6983 = vmatprep.mubr.msk.f32.mxu1 %vm1397_vm2, %v8311_v49  ;;  %v10186_v57 = vld [vmem:[#allocation16_spill] sm:$0xff]  ;;  %v10187_v13 = vld [vmem:[#allocation33_spill] sm:$0xff] }
 0x190   : > { %v2410_v41 = vsel %vm2354_vm1, %v2326_v19, %v2382_v52  ;;  %v1908_v45 = vadd.f32 %v1907_v14, %v8573_v27  ;;  %v2303_v32 = vadd.f32 %v8652_v23, %v1913_v43  ;;  %v8772_v37 = vld [vmem:[#allocation2 + $0x140] sm:$0xff]  ;;  %7147 = vmatpush3.msra.mxu1 %v8230_v0  ;;  %7087 = vmatpush3.msra.mxu0 %v3560_v15  ;;  %v8785_v0 = vld [vmem:[#allocation2 + $0x148] sm:$0xff]  ;;  %v3557_v15 = vld [vmem:[%s7791_s17 + $0x30] sm:$0xff] }
 0x191   : > { %2438 = vst.msk [vmem:[#allocation2 + $0x160] sm:$0xff] %vm1397_vm2, %v2410_v41  ;;  %vm2357_vm3 = vcmp.ge.f32.partialorder %v2329_v39, 0.0  ;;  %v2385_v8 = vmul.f32 0.2, %v2329_v39  ;;  %v2328_v49 = vadd.f32 %v8664_v58, %v2300_v26  ;;  %v6745_v55 = vpop.f32.mrf.mxu1  ;;  %7055 = vmatprep.mubr.msk.f32.mxu0 %vm1397_vm2, %v8772_v37  ;;  %7148 = vmatprep.subr.mxu1 %v8271_v38  ;;  %v3556_v43 = vld [vmem:[%s7791_s17 + $0x28] sm:$0xff] }
 0x192   : > { %v2331_v27 = vadd.f32 %v8664_v58, %v2303_v32  ;;  %v1923_v23 = vadd.f32 %v6745_v55, %v8587_v9  ;;  %v2302_v11 = vadd.f32 %v8660_v21, %v1908_v45  ;;  %6984 = vmatmul.mubr.msk.f32.gmra.mxu1 %vm1397_vm2, %v8322_v53  ;;  %7088 = vmatprep.subr.mxu0 %v3559_v16  ;;  %v8792_v9 = vpop.f32.mrf.mxu0  ;;  %v10190_v32 = vld [vmem:[#allocation34_spill] sm:$0xff] }
 0x193   : > { %v2413_v2 = vsel %vm2357_vm3, %v2329_v39, %v2385_v8  ;;  %vm2356_vm4 = vcmp.ge.f32.partialorder %v2328_v49, 0.0  ;;  %v2384_v24 = vmul.f32 0.2, %v2328_v49  ;;  %7056 = vmatmul.mubr.msk.f32.gmra.mxu0 %vm1397_vm2, %v8785_v0  ;;  %v1917_v46 = vpop.f32.mrf.mxu1  ;;  %6986 = vmatprep.mubr.msk.f32.mxu1 %vm1397_vm2, %v8337_v59 }
 0x194   : > { %2441 = vst.msk [vmem:[#allocation2 + $0x178] sm:$0xff] %vm1397_vm2, %v2413_v2  ;;  %vm2359_vm5 = vcmp.ge.f32.partialorder %v2331_v27, 0.0  ;;  %v2387_v53 = vmul.f32 0.2, %v2331_v27  ;;  %v2330_v21 = vadd.f32 %v8664_v58, %v2302_v11  ;;  %v1918_v62 = vadd.f32 %v1917_v46, %v8591_v56  ;;  %7149 = vmatpush3.msra.mxu1 %v8271_v38  ;;  %7089 = vmatpush3.msra.mxu0 %v3559_v16  ;;  %v8808_v38 = vld [vmem:[#allocation2 + $0x158] sm:$0xff] }
 0x195   : > { %v2412_v7 = vsel %vm2356_vm4, %v2328_v49, %v2384_v24  ;;  %v2305_v36 = vadd.f32 %v8674_v3, %v1923_v23  ;;  %v6748_v61 = vpop.f32.mrf.mxu1  ;;  %v8799_v12 = vld [vmem:[#allocation2 + $0x150] sm:$0xff]  ;;  %7150 = vmatprep.subr.mxu1 %v8292_v50  ;;  %7090 = vmatprep.subr.mxu0 %v3558_v34  ;;  %v10189_v16 = vld [vmem:[#allocation21_spill] sm:$0xff]  ;;  %v10192_v24 = vld [vmem:[#allocation35_spill] sm:$0xff] }
 0x196   : > { %2440 = vst.msk [vmem:[#allocation2 + $0x170] sm:$0xff] %vm1397_vm2, %v2412_v7  ;;  %v2415_v59 = vsel %vm2359_vm5, %v2331_v27, %v2387_v53  ;;  %vm2358_vm6 = vcmp.ge.f32.partialorder %v2330_v21, 0.0  ;;  %v2386_v44 = vmul.f32 0.2, %v2330_v21  ;;  %v1933_v56 = vadd.f32 %v6748_v61, %v8607_v20  ;;  %7058 = vmatprep.mubr.msk.f32.mxu0 %vm1397_vm2, %v8799_v12  ;;  %6987 = vmatmul.mubr.msk.f32.gmra.mxu1 %vm1397_vm2, %v8352_v48  ;;  %v6802_v20 = vpop.f32.mrf.mxu0  ;;  %v8833_v52 = vld [vmem:[#allocation2 + $0x168] sm:$0xff]  ;;  %v10191_v11 = vld [vmem:[#allocation17_spill] sm:$0xff] }
 0x197   : > { %2443 = vst.msk [vmem:[#allocation2 + $0x188] sm:$0xff] %vm1397_vm2, %v2415_v59  ;;  %v2333_v3 = vadd.f32 %v8664_v58, %v2305_v36  ;;  %v2304_v10 = vadd.f32 %v8693_v31, %v1918_v62  ;;  %7059 = vmatmul.mubr.msk.f32.gmra.mxu0 %vm1397_vm2, %v8808_v38  ;;  %v1927_v33 = vpop.f32.mrf.mxu1  ;;  %6989 = vmatprep.mubr.msk.f32.mxu1 %vm1397_vm2, %v10184_v54  ;;  %v10193_v53 = vld [vmem:[#allocation10_spill] sm:$0xff]  ;;  %v10194_v61 = vld [vmem:[#allocation7_spill] sm:$0xff] }
 0x198   : > { %v2414_v6 = vsel %vm2358_vm6, %v2330_v21, %v2386_v44  ;;  %v1928_v48 = vadd.f32 %v1927_v33, %v10185_v17  ;;  %v2307_v42 = vadd.f32 %v8716_v47, %v1933_v56  ;;  %v8820_v1 = vld [vmem:[#allocation2 + $0x160] sm:$0xff]  ;;  %7151 = vmatpush3.msra.mxu1 %v8292_v50  ;;  %7091 = vmatpush3.msra.mxu0 %v3558_v34  ;;  %v10188_v50 = vld [vmem:[#allocation19_spill] sm:$0xff]  ;;  %v2267_v41 = vpop.f32.mrf.mxu0  ;;  %v10195_v56 = vld [vmem:[#allocation36_spill] sm:$0xff] }
 0x199   : > { %2442 = vst.msk [vmem:[#allocation2 + $0x180] sm:$0xff] %vm1397_vm2, %v2414_v6  ;;  %vm2361_vm7 = vcmp.ge.f32.partialorder %v2333_v3, 0.0  ;;  %v2389_v31 = vmul.f32 0.2, %v2333_v3  ;;  %v2332_v19 = vadd.f32 %v8664_v58, %v2304_v10  ;;  %v6751_v22 = vpop.f32.mrf.mxu1  ;;  %7061 = vmatprep.mubr.msk.f32.mxu0 %vm1397_vm2, %v8820_v1  ;;  %7152 = vmatprep.subr.mxu1 %v10186_v57  ;;  %v3555_v21 = vld [vmem:[%s7791_s17 + $0x20] sm:$0xff] }
 0x19a   : > { %v2335_v47 = vadd.f32 %v8664_v58, %v2307_v42  ;;  %v1943_v40 = vadd.f32 %v6751_v22, %v10187_v13  ;;  %v2306_v51 = vadd.f32 %v8742_v28, %v1928_v48  ;;  %6990 = vmatmul.mubr.msk.f32.gmra.mxu1 %vm1397_vm2, %v10188_v50  ;;  %7092 = vmatprep.subr.mxu0 %v3557_v15  ;;  %v6805_v59 = vpop.f32.mrf.mxu0  ;;  %v10197_v42 = vld [vmem:[#allocation11_spill] sm:$0xff]  ;;  %v3554_v22 = vld [vmem:[%s7791_s17 + $0x18] sm:$0xff] }
 0x19b   : > { %v2417_v39 = vsel %vm2361_vm7, %v2333_v3, %v2389_v31  ;;  %vm2360_vm8 = vcmp.ge.f32.partialorder %v2332_v19, 0.0  ;;  %v2388_v26 = vmul.f32 0.2, %v2332_v19  ;;  %7062 = vmatmul.mubr.msk.f32.gmra.mxu0 %vm1397_vm2, %v8833_v52  ;;  %v1937_v14 = vpop.f32.mrf.mxu1  ;;  %6992 = vmatprep.mubr.msk.f32.mxu1 %vm1397_vm2, %v10189_v16 }
 0x19c   : > { %2445 = vst.msk [vmem:[#allocation2 + $0x198] sm:$0xff] %vm1397_vm2, %v2417_v39  ;;  %vm2363_vm9 = vcmp.ge.f32.partialorder %v2335_v47, 0.0  ;;  %v2391_v28 = vmul.f32 0.2, %v2335_v47  ;;  %v2334_v45 = vadd.f32 %v8664_v58, %v2306_v51  ;;  %v1938_v8 = vadd.f32 %v1937_v14, %v10190_v32  ;;  %7153 = vmatpush3.msra.mxu1 %v10186_v57  ;;  %7093 = vmatpush3.msra.mxu0 %v3557_v15  ;;  %v2277_v51 = vpop.f32.mrf.mxu0  ;;  %v10200_v39 = vld [vmem:[#allocation38_spill] sm:$0xff] }
 0x19d   : > { %v2416_v49 = vsel %vm2360_vm8, %v2332_v19, %v2388_v26  ;;  %v2309_v55 = vadd.f32 %v8767_v30, %v1943_v40  ;;  %v6754_v27 = vpop.f32.mrf.mxu1  ;;  %v8845_v23 = vld [vmem:[#allocation2 + $0x170] sm:$0xff]  ;;  %7154 = vmatprep.subr.mxu1 %v10191_v11  ;;  %7094 = vmatprep.subr.mxu0 %v3556_v43  ;;  %v8854_v30 = vld [vmem:[#allocation2 + $0x178] sm:$0xff] }
 0x19e   : > { %2444 = vst.msk [vmem:[#allocation2 + $0x190] sm:$0xff] %vm1397_vm2, %v2416_v49  ;;  %v2419_v34 = vsel %vm2363_vm9, %v2335_v47, %v2391_v28  ;;  %vm2362_vm10 = vcmp.ge.f32.partialorder %v2334_v45, 0.0  ;;  %v2390_v2 = vmul.f32 0.2, %v2334_v45  ;;  %v1953_v46 = vadd.f32 %v6754_v27, %v10192_v24  ;;  %7064 = vmatprep.mubr.msk.f32.mxu0 %vm1397_vm2, %v8845_v23  ;;  %6993 = vmatmul.mubr.msk.f32.gmra.mxu1 %vm1397_vm2, %v10193_v53  ;;  %v8876_v31 = vld [vmem:[#allocation2 + $0x188] sm:$0xff]  ;;  %v10198_v19 = vld [vmem:[#allocation20_spill] sm:$0xff] }
 0x19f   : > { %2447 = vst.msk [vmem:[#allocation2 + $0x1a8] sm:$0xff] %vm1397_vm2, %v2419_v34  ;;  %v2337_v62 = vadd.f32 %v8664_v58, %v2309_v55  ;;  %v2308_v7 = vadd.f32 %v8792_v9, %v1938_v8  ;;  %7065 = vmatmul.mubr.msk.f32.gmra.mxu0 %vm1397_vm2, %v8854_v30  ;;  %v1947_v36 = vpop.f32.mrf.mxu1  ;;  %6995 = vmatprep.mubr.msk.f32.mxu1 %vm1397_vm2, %v10194_v61  ;;  %v10199_v40 = vld [vmem:[#allocation13_spill] sm:$0xff]  ;;  %v10201_v28 = vld [vmem:[#allocation22_spill] sm:$0xff]  ;;  %v10202_v49 = vld [vmem:[#allocation8_spill] sm:$0xff] }
 0x1a0   : > { %v2418_v44 = vsel %vm2362_vm10, %v2334_v45, %v2390_v2  ;;  %v1948_v3 = vadd.f32 %v1947_v36, %v10195_v56  ;;  %v2311_v10 = vadd.f32 %v6802_v20, %v1953_v46  ;;  %v8865_v33 = vld [vmem:[#allocation2 + $0x180] sm:$0xff]  ;;  %7155 = vmatpush3.msra.mxu1 %v10191_v11  ;;  %7095 = vmatpush3.msra.mxu0 %v3556_v43  ;;  %v10196_v20 = vld [vmem:[#allocation37_spill] sm:$0xff]  ;;  %v3553_v27 = vld [vmem:[%s7791_s17 + $0x10] sm:$0xff] }
 0x1a1   : > { %2446 = vst.msk [vmem:[#allocation2 + $0x1a0] sm:$0xff] %vm1397_vm2, %v2418_v44  ;;  %vm2365_vm11 = vcmp.ge.f32.partialorder %v2337_v62, 0.0  ;;  %v2393_v9 = vmul.f32 0.2, %v2337_v62  ;;  %v2336_v54 = vadd.f32 %v8664_v58, %v2308_v7  ;;  %v6757_v15 = vpop.f32.mrf.mxu1  ;;  %7067 = vmatprep.mubr.msk.f32.mxu0 %vm1397_vm2, %v8865_v33  ;;  %7096 = vmatprep.subr.mxu0 %v3555_v21  ;;  %v10203_v34 = vld [vmem:[#allocation9_spill] sm:$0xff]  ;;  %v10204_v7 = vld [vmem:[#allocation15_spill] sm:$0xff] }
 0x1a2   : > { %v2339_v6 = vadd.f32 %v8664_v58, %v2311_v10  ;;  %v1963_v17 = vadd.f32 %v6757_v15, %v10196_v20  ;;  %v2310_v48 = vadd.f32 %v2267_v41, %v1948_v3  ;;  %6996 = vmatmul.mubr.msk.f32.gmra.mxu1 %vm1397_vm2, %v10197_v42  ;;  %7156 = vmatprep.subr.mxu1 %v10198_v19  ;;  %v10205_v61 = vld [vmem:[#allocation24_spill] sm:$0xff]  ;;  %v3551_v3 = vld [vmem:[%s7791_s17] sm:$0xff]  ;;  %v10207_v10 = vld [vmem:[#allocation25_spill] sm:$0xff] }
 0x1a3   : > { %v2421_v57 = vsel %vm2365_vm11, %v2337_v62, %v2393_v9  ;;  %vm2364_vm12 = vcmp.ge.f32.partialorder %v2336_v54, 0.0  ;;  %v2392_v47 = vmul.f32 0.2, %v2336_v54  ;;  %7068 = vmatmul.mubr.msk.f32.gmra.mxu0 %vm1397_vm2, %v8876_v31  ;;  %v1957_v13 = vpop.f32.mrf.mxu1  ;;  %6998 = vmatprep.mubr.msk.f32.mxu1 %vm1397_vm2, %v10199_v40  ;;  %v8896_v55 = vld [vmem:[#allocation2 + $0x198] sm:$0xff]  ;;  %v10206_v44 = vld [vmem:[#allocation12_spill] sm:$0xff]  ;;  %v10210_v20 = vld [vmem:[#allocation27_spill] sm:$0xff] }
 0x1a4   : > { %2449 = vst.msk [vmem:[#allocation2 + $0x1b8] sm:$0xff] %vm1397_vm2, %v2421_v57  ;;  %vm2367_vm13 = vcmp.ge.f32.partialorder %v2339_v6, 0.0  ;;  %v2395_v50 = vmul.f32 0.2, %v2339_v6  ;;  %v2338_v43 = vadd.f32 %v8664_v58, %v2310_v48  ;;  %v1958_v26 = vadd.f32 %v1957_v13, %v10200_v39  ;;  %7097 = vmatpush3.msra.mxu0 %v3555_v21  ;;  %7157 = vmatpush3.msra.mxu1 %v10198_v19  ;;  %v3552_v21 = vld [vmem:[%s7791_s17 + $0x8] sm:$0xff]  ;;  %v10211_v48 = vld [vmem:[#allocation28_spill] sm:$0xff]  ;;  %s5431_s17 = scalar_lea.hbm %s10082_s5, %s5957_s12 }
 0x1a5   : > { %v2420_v14 = vsel %vm2364_vm12, %v2336_v54, %v2392_v47  ;;  %v2313_v16 = vadd.f32 %v6805_v59, %v1963_v17  ;;  %v8888_v41 = vld [vmem:[#allocation2 + $0x190] sm:$0xff]  ;;  %7098 = vmatprep.subr.mxu0 %v3554_v22  ;;  %7158 = vmatprep.subr.mxu1 %v10201_v28  ;;  %v10208_v54 = vld [vmem:[#allocation26_spill] sm:$0xff]  ;;  %v10212_v42 = vld [vmem:[#allocation23_spill] sm:$0xff] }
 0x1a6   : > { %2448 = vst.msk [vmem:[#allocation2 + $0x1b0] sm:$0xff] %vm1397_vm2, %v2420_v14  ;;  %v2423_v45 = vsel %vm2367_vm13, %v2339_v6, %v2395_v50  ;;  %vm2366_vm14 = vcmp.ge.f32.partialorder %v2338_v43, 0.0  ;;  %v2394_v32 = vmul.f32 0.2, %v2338_v43  ;;  %v2312_v8 = vadd.f32 %v2277_v51, %v1958_v26  ;;  %7070 = vmatprep.mubr.msk.f32.mxu0 %vm1397_vm2, %v8888_v41  ;;  %6999 = vmatmul.mubr.msk.f32.gmra.mxu1 %vm1397_vm2, %v10202_v49  ;;  %v10209_v6 = vld [vmem:[#allocation14_spill] sm:$0xff]  ;;  %v10213_v19 = vld [vmem:[#allocation29_spill] sm:$0xff] }
 0x1a7   : > { %2451 = vst.msk [vmem:[#allocation2 + $0x1c8] sm:$0xff] %vm1397_vm2, %v2423_v45  ;;  %v2341_v11 = vadd.f32 %v8664_v58, %v2313_v16  ;;  %7071 = vmatmul.mubr.msk.f32.gmra.mxu0 %vm1397_vm2, %v8896_v55  ;;  %7001 = vmatprep.mubr.msk.f32.mxu1 %vm1397_vm2, %v10203_v34  ;;  %v10215_v57 = vld [vmem:[#allocation31_spill] sm:$0xff] }
 0x1a8   : > { %v2422_v2 = vsel %vm2366_vm14, %v2338_v43, %v2394_v32  ;;  %v2340_v24 = vadd.f32 %v8664_v58, %v2312_v8  ;;  %v8906_v46 = vld [vmem:[#allocation2 + $0x1a0] sm:$0xff]  ;;  %7099 = vmatpush3.msra.mxu0 %v3554_v22  ;;  %7159 = vmatpush3.msra.mxu1 %v10201_v28  ;;  %v8915_v58 = vld [vmem:[#allocation2 + $0x1a8] sm:$0xff] }
 0x1a9   : > { %2450 = vst.msk [vmem:[#allocation2 + $0x1c0] sm:$0xff] %vm1397_vm2, %v2422_v2  ;;  %vm2369_vm15 = vcmp.ge.f32.partialorder %v2341_v11, 0.0  ;;  %v2397_v53 = vmul.f32 0.2, %v2341_v11  ;;  %7073 = vmatprep.mubr.msk.f32.mxu0 %vm1397_vm2, %v8906_v46  ;;  %7100 = vmatprep.subr.mxu0 %v3553_v27  ;;  %v10214_v22 = vld [vmem:[#allocation30_spill] sm:$0xff] }
 0x1aa   : > { %vm2368_vm0 = vcmp.ge.f32.partialorder %v2340_v24, 0.0  ;;  %v2396_v62 = vmul.f32 0.2, %v2340_v24  ;;  %7002 = vmatmul.mubr.msk.f32.gmra.mxu1 %vm1397_vm2, %v10204_v7  ;;  %7101 = vmatpush3.msra.mxu0 %v3553_v27 }
 0x1ab   : > { %v2425_v36 = vsel %vm2369_vm15, %v2341_v11, %v2397_v53  ;;  %7074 = vmatmul.mubr.msk.f32.gmra.mxu0 %vm1397_vm2, %v8915_v58  ;;  %7004 = vmatprep.mubr.msk.f32.mxu1 %vm1397_vm2, %v10205_v61  ;;  %v8932_v9 = vld [vmem:[#allocation2 + $0x1b8] sm:$0xff] }
 0x1ac   : > { %2453 = vst.msk [vmem:[#allocation2 + $0x1d8] sm:$0xff] %vm1397_vm2, %v2425_v36  ;;  %v2424_v59 = vsel %vm2368_vm0, %v2340_v24, %v2396_v62  ;;  %7102 = vmatprep.subr.mxu0 %v3552_v21  ;;  %7160 = vmatprep.subr.mxu1 %v10206_v44 }
 0x1ad   : > { %2452 = vst.msk [vmem:[#allocation2 + $0x1d0] sm:$0xff] %vm1397_vm2, %v2424_v59  ;;  %v8924_v56 = vld [vmem:[#allocation2 + $0x1b0] sm:$0xff]  ;;  %7103 = vmatpush3.msra.mxu0 %v3552_v21  ;;  %7161 = vmatpush3.msra.mxu1 %v10206_v44 }
 0x1ae   : > { %7076 = vmatprep.mubr.msk.f32.mxu0 %vm1397_vm2, %v8924_v56  ;;  %7005 = vmatmul.mubr.msk.f32.gmra.mxu1 %vm1397_vm2, %v10207_v10  ;;  %v8945_v17 = vld [vmem:[#allocation2 + $0x1c8] sm:$0xff] }
 0x1af   : > { %7077 = vmatmul.mubr.msk.f32.gmra.mxu0 %vm1397_vm2, %v8932_v9  ;;  %7007 = vmatprep.mubr.msk.f32.mxu1 %vm1397_vm2, %v10208_v54  ;;  %v10122_v54 = vmov 0.0  }
 0x1b0   : > { %v8938_v15 = vld [vmem:[#allocation2 + $0x1c0] sm:$0xff]  ;;  %7104 = vmatprep.subr.mxu0 %v3551_v3  ;;  %7162 = vmatprep.subr.mxu1 %v10209_v6 }
 0x1b1   : > { %7079 = vmatprep.mubr.msk.f32.mxu0 %vm1397_vm2, %v8938_v15  ;;  %7105 = vmatpush3.msra.mxu0 %v3551_v3 }
 0x1b2   : > { %7008 = vmatmul.mubr.msk.f32.gmra.mxu1 %vm1397_vm2, %v10210_v20  ;;  %4379 = vmatprep.subr.mxu0 %v10122_v54 }
 0x1b3   : > { %7080 = vmatmul.mubr.msk.f32.gmra.mxu0 %vm1397_vm2, %v8945_v17  ;;  %7010 = vmatprep.mubr.msk.f32.mxu1 %vm1397_vm2, %v10211_v48 }
 0x1b4   : > { %7106 = vmatprep.mubr.msk.f32.mxu0 %vm1397_vm2, %v8678_v63  ;;  %7163 = vmatpush3.msra.mxu1 %v10209_v6 }
 0x1b5   : > { %7164 = vmatprep.subr.mxu1 %v10212_v42 }
 0x1b6   : > { %7011 = vmatmul.mubr.msk.f32.gmra.mxu1 %vm1397_vm2, %v10213_v19 }
 0x1b7   : > { %7107 = vmatmul.mubr.msk.f32.vlgmr.msra.gmra.mxu0 %vm1397_vm2, %v8684_v60  ;;  %7013 = vmatprep.mubr.msk.f32.mxu1 %vm1397_vm2, %v10214_v22 }
 0x1b8   : > { %7109 = vmatprep.mubr.msk.f32.mxu0 %vm1397_vm2, %v8699_v5  ;;  %7165 = vmatpush3.msra.mxu1 %v10212_v42 }
 0x1ba   : > { %7014 = vmatmul.mubr.msk.f32.gmra.mxu1 %vm1397_vm2, %v10215_v57 }
 0x1bb   : > { %7110 = vmatmul.mubr.msk.f32.gmra.mxu0 %vm1397_vm2, %v8707_v25  ;;  %7016 = vmatprep.mubr.msk.f32.mxu1 %vm1397_vm2, %v8678_v63 }
 0x1bc   : > { %7112 = vmatprep.mubr.msk.f32.mxu0 %vm1397_vm2, %v8722_v35 }
 0x1be   : > { %7017 = vmatmul.mubr.msk.f32.gmra.mxu1 %vm1397_vm2, %v8684_v60 }
 0x1bf   : > { %7113 = vmatmul.mubr.msk.f32.gmra.mxu0 %vm1397_vm2, %v8735_v4  ;;  %7019 = vmatprep.mubr.msk.f32.mxu1 %vm1397_vm2, %v8699_v5 }
 0x1c0   : > { %7115 = vmatprep.mubr.msk.f32.mxu0 %vm1397_vm2, %v8749_v29 }
 0x1c2   : > { %7020 = vmatmul.mubr.msk.f32.gmra.mxu1 %vm1397_vm2, %v8707_v25 }
 0x1c3   : > { %7116 = vmatmul.mubr.msk.f32.gmra.mxu0 %vm1397_vm2, %v8758_v18  ;;  %7166 = vmatprep.mubr.msk.f32.mxu1 %vm1397_vm2, %v8722_v35 }
 0x1c4   : > { %7118 = vmatprep.mubr.msk.f32.mxu0 %vm1397_vm2, %v8772_v37 }
 0x1c6   : > { %7167 = vmatmul.mubr.msk.f32.vlgmr.msra.gmra.mxu1 %vm1397_vm2, %v8735_v4 }
 0x1c7   : > { %7119 = vmatmul.mubr.msk.f32.gmra.mxu0 %vm1397_vm2, %v8785_v0  ;;  %7169 = vmatprep.mubr.msk.f32.mxu1 %vm1397_vm2, %v8749_v29 }
 0x1c8   : > { %7121 = vmatprep.mubr.msk.f32.mxu0 %vm1397_vm2, %v8799_v12 }
 0x1ca   : > { %7170 = vmatmul.mubr.msk.f32.gmra.mxu1 %vm1397_vm2, %v8758_v18 }
 0x1cb   : > { %7122 = vmatmul.mubr.msk.f32.gmra.mxu0 %vm1397_vm2, %v8808_v38  ;;  %7172 = vmatprep.mubr.msk.f32.mxu1 %vm1397_vm2, %v8772_v37 }
 0x1cc   : > { %7124 = vmatprep.mubr.msk.f32.mxu0 %vm1397_vm2, %v8820_v1 }
 0x1ce   : > { %7173 = vmatmul.mubr.msk.f32.gmra.mxu1 %vm1397_vm2, %v8785_v0 }
 0x1cf   : > { %7125 = vmatmul.mubr.msk.f32.gmra.mxu0 %vm1397_vm2, %v8833_v52  ;;  %7175 = vmatprep.mubr.msk.f32.mxu1 %vm1397_vm2, %v8799_v12 }
 0x1d0   : > { %7127 = vmatprep.mubr.msk.f32.mxu0 %vm1397_vm2, %v8845_v23 }
 0x1d2   : > { %7176 = vmatmul.mubr.msk.f32.gmra.mxu1 %vm1397_vm2, %v8808_v38 }
 0x1d3   : > { %7128 = vmatmul.mubr.msk.f32.gmra.mxu0 %vm1397_vm2, %v8854_v30  ;;  %7178 = vmatprep.mubr.msk.f32.mxu1 %vm1397_vm2, %v8820_v1  ;;  %v4047_v1 = vld [vmem:[#allocation2 + $0x1d0] sm:$0xff] }
 0x1d4   : > { %7130 = vmatprep.mubr.msk.f32.mxu0 %vm1397_vm2, %v8865_v33 }
 0x1d6   : > { %7179 = vmatmul.mubr.msk.f32.gmra.mxu1 %vm1397_vm2, %v8833_v52 }
 0x1d7   : > { %7131 = vmatmul.mubr.msk.f32.gmra.mxu0 %vm1397_vm2, %v8876_v31  ;;  %7181 = vmatprep.mubr.msk.f32.mxu1 %vm1397_vm2, %v8845_v23 }
 0x1d8   : > { %7133 = vmatprep.mubr.msk.f32.mxu0 %vm1397_vm2, %v8888_v41 }
 0x1da   : > { %7182 = vmatmul.mubr.msk.f32.gmra.mxu1 %vm1397_vm2, %v8854_v30 }
 0x1db   : > { %7134 = vmatmul.mubr.msk.f32.gmra.mxu0 %vm1397_vm2, %v8896_v55  ;;  %7184 = vmatprep.mubr.msk.f32.mxu1 %vm1397_vm2, %v8865_v33 }
 0x1dc   : > { %7136 = vmatprep.mubr.msk.f32.mxu0 %vm1397_vm2, %v8906_v46 }
 0x1de   : > { %7185 = vmatmul.mubr.msk.f32.gmra.mxu1 %vm1397_vm2, %v8876_v31  ;;  %v4048_v31 = vld [vmem:[#allocation2 + $0x1d8] sm:$0xff] }
 0x1df   : > { %7137 = vmatmul.mubr.msk.f32.gmra.mxu0 %vm1397_vm2, %v8915_v58  ;;  %7187 = vmatprep.mubr.msk.f32.mxu1 %vm1397_vm2, %v8888_v41 }
 0x1e0   : > { %7139 = vmatprep.mubr.msk.f32.mxu0 %vm1397_vm2, %v8924_v56  ;;  %v9044_v63 = vpop.f32.mrf.mxu0 }
 0x1e2   : > { %v9046_v60 = vpop.f32.mrf.mxu0  ;;  %7188 = vmatmul.mubr.msk.f32.gmra.mxu1 %vm1397_vm2, %v8896_v55 }
 0x1e3   : > { %7140 = vmatmul.mubr.msk.f32.gmra.mxu0 %vm1397_vm2, %v8932_v9  ;;  %7190 = vmatprep.mubr.msk.f32.mxu1 %vm1397_vm2, %v8906_v46 }
 0x1e5   : > { %v9054_v5 = vpop.f32.mrf.mxu1  ;;  %v9056_v25 = vpop.f32.mrf.mxu0 }
 0x1e6   : > { %7191 = vmatmul.mubr.msk.f32.gmra.mxu1 %vm1397_vm2, %v8915_v58  ;;  %v10121_v58 = vlaneseq }
 0x1e7   : > { %v9060_v35 = vpop.f32.mrf.mxu1  ;;  %v9062_v4 = vpop.f32.mrf.mxu0  ;;  %7193 = vmatprep.mubr.msk.f32.mxu1 %vm1397_vm2, %v8924_v56  ;;  %v9159_v56 = vld [vmem:[%s10081_s4] sm:$0x3] }
 0x1e8   : > { %v9151_v61 = vshrl.u32 %v10121_v58, 7  ;;  %10217 = vst [vmem:[#allocation32_spill] sm:$0xff] %v9159_v56 }
 0x1e9   : > { %v9066_v29 = vpop.f32.mrf.mxu1  ;;  %v9068_v18 = vpop.f32.mrf.mxu0 }
 0x1ea   : > { %7194 = vmatmul.mubr.msk.f32.gmra.mxu1 %vm1397_vm2, %v8932_v9  ;;  %10216 = vst [vmem:[#allocation18_spill] sm:$0xff] %v9151_v61  ;;  %v4374_v44 = vsub.s32 1, %v9151_v61 }
 0x1eb   : > { %v9072_v37 = vpop.f32.mrf.mxu1  ;;  %v9074_v0 = vpop.f32.mrf.mxu0  ;;  %7196 = vmatprep.mubr.msk.f32.mxu1 %vm1397_vm2, %v8938_v15 }
 0x1ec   : > { %v9164_v10 = vrot.slane %v9159_v56, %v4374_v44 }
 0x1ed   : > { %v9078_v12 = vpop.f32.mrf.mxu1  ;;  %v9080_v38 = vpop.f32.mrf.mxu0 }
 0x1ee   : > { %7197 = vmatmul.mubr.msk.f32.gmra.mxu1 %vm1397_vm2, %v8945_v17  ;;  %10218 = vst [vmem:[#allocation16_spill] sm:$0xff] %v9164_v10 }
 0x1ef   : > { %v9084_v52 = vpop.f32.mrf.mxu1  ;;  %v9086_v23 = vpop.f32.mrf.mxu0  ;;  %7199 = vmatprep.mubr.msk.f32.mxu1 %vm1397_vm2, %v4047_v1 }
 0x1f1   : > { %v9089_v30 = vpop.f32.mrf.mxu1  ;;  %v9091_v33 = vpop.f32.mrf.mxu0 }
 0x1f2   : > { %7200 = vmatmul.mubr.msk.f32.gmra.mxu1 %vm1397_vm2, %v4048_v31  ;;  %vm3461_vm2 = vcmask 523264  }
 0x1f3   : > { %v9094_v47 = vpop.f32.mrf.mxu1  ;;  %v9096_v13 = vpop.f32.mrf.mxu0  ;;  %4524 = vmatprep.mubr.f32.mxu1 %v9164_v10 }
 0x1f5   : > { %v9098_v40 = vpop.f32.mrf.mxu1  ;;  %v9100_v51 = vpop.f32.mrf.mxu0 }
 0x1f7   : > { %v9102_v50 = vpop.f32.mrf.mxu1  ;;  %v9104_v43 = vpop.f32.mrf.mxu0 }
 0x1f9   : > { %v9106_v39 = vpop.f32.mrf.mxu1  ;;  %v9108_v26 = vpop.f32.mrf.mxu0 }
 0x1fb   : > { %v9110_v14 = vpop.f32.mrf.mxu1  ;;  %v9112_v16 = vpop.f32.mrf.mxu0 }
 0x1fd   : > { %v9114_v41 = vpop.f32.mrf.mxu1 }
 0x1fe   : > { %v9118_v45 = vpop.f32.mrf.mxu0 }
 0x1ff   : > { %v9116_v28 = vpop.f32.mrf.mxu1 }
 0x200   : > { %v9122_v8 = vpop.f32.mrf.mxu0 }
 0x201   : > { %v9120_v32 = vpop.f32.mrf.mxu1 }
 0x202   : > { %v9126_v55 = vpop.f32.mrf.mxu0 }
 0x203   : > { %v9124_v49 = vpop.f32.mrf.mxu1 }
 0x204   : > { %v9130_v11 = vpop.f32.mrf.mxu0 }
 0x206   : > { %v9128_v27 = vpop.f32.mrf.mxu1  ;;  %v9134_v2 = vpop.f32.mrf.mxu0 }
 0x208   : > { %v9132_v34 = vpop.f32.mrf.mxu1  ;;  %v9138_v46 = vpop.f32.mrf.mxu0 }
 0x20a   : > { %v9136_v24 = vpop.f32.mrf.mxu1  ;;  %v9142_v21 = vpop.f32.mrf.mxu0 }
 0x20c   : > { %v9140_v53 = vpop.f32.mrf.mxu1  ;;  %v9146_v7 = vpop.f32.mrf.mxu0 }
 0x20e   : > { %v9144_v62 = vpop.f32.mrf.mxu1  ;;  %v9153_v59 = vpop.f32.mrf.mxu0 }
 0x210   : > { %v9148_v36 = vpop.f32.mrf.mxu1  ;;  %v9166_v9 = vpop.f32.mrf.mxu0 }
 0x212   : > { %v9161_v3 = vpop.f32.mrf.mxu1  ;;  %v9172_v6 = vpop.f32.mrf.mxu0 }
 0x214   : > { %v9170_v15 = vpop.f32.mrf.mxu1  ;;  %v9176_v17 = vpop.f32.mrf.mxu0 }
 0x216   : > { %v9174_v20 = vpop.f32.mrf.mxu1  ;;  %v9180_v42 = vpop.f32.mrf.mxu0 }
 0x217   : > { %10219 = vst [vmem:[#allocation33_spill] sm:$0xff] %v9180_v42  ;;  %v2911_v42 = vadd.f32 %v9044_v63, %v9054_v5 }
 0x218   : > { %v9178_v48 = vpop.f32.mrf.mxu1  ;;  %v9184_v22 = vpop.f32.mrf.mxu0 }
 0x219   : > { %10220 = vst [vmem:[#allocation19_spill] sm:$0xff] %v9184_v22 }
 0x21a   : > { %v9182_v19 = vpop.f32.mrf.mxu1  ;;  %v9188_v1 = vpop.f32.mrf.mxu0 }
 0x21b   : > { %10222 = vst [vmem:[#allocation34_spill] sm:$0xff] %v9188_v1  ;;  %v2906_v1 = vadd.f32 %v9046_v60, %v9060_v35 }
 0x21c   : > { %v9186_v57 = vpop.f32.mrf.mxu1  ;;  %v9192_v58 = vpop.f32.mrf.mxu0 }
 0x21d   : > { %10221 = vst [vmem:[#allocation21_spill] sm:$0xff] %v9186_v57  ;;  %10224 = vst [vmem:[#allocation35_spill] sm:$0xff] %v9192_v58 }
 0x21e   : > { %v9190_v31 = vpop.f32.mrf.mxu1  ;;  %v9196_v10 = vpop.f32.mrf.mxu0 }
 0x21f   : > { %10223 = vst [vmem:[#allocation17_spill] sm:$0xff] %v9190_v31  ;;  %10226 = vst [vmem:[#allocation7_spill] sm:$0xff] %v9196_v10  ;;  %v2921_v10 = vadd.f32 %v9056_v25, %v9066_v29  ;;  %v2931_v25 = vadd.f32 %v9068_v18, %v9078_v12  ;;  %v2941_v18 = vadd.f32 %v9080_v38, %v9089_v30 }
 0x220   : > { %v9194_v54 = vpop.f32.mrf.mxu1  ;;  %v9204_v22 = vpop.f32.mrf.mxu0 }
 0x221   : > { %10225 = vst [vmem:[#allocation10_spill] sm:$0xff] %v9194_v54  ;;  %10228 = vst [vmem:[#allocation37_spill] sm:$0xff] %v9204_v22  ;;  %v2916_v22 = vadd.f32 %v9062_v4, %v9072_v37  ;;  %v2926_v4 = vadd.f32 %v9074_v0, %v9084_v52  ;;  %v9255_v0 = vld [vmem:[%s10081_s4 + $0x2] sm:$0x3] }
 0x222   : > { %10230 = vst [vmem:[#allocation20_spill] sm:$0xff] %v9255_v0 }
 0x242   : > { %v9198_v56 = vpop.f32.mrf.mxu1 }
 0x244   : > { %v9200_v61 = vpop.f32.mrf.mxu1 }
 0x245   : > { %10227 = vst [vmem:[#allocation36_spill] sm:$0xff] %v9200_v61 }
 0x246   : > { %v6976_v57 = vpop.f32.mrf.mxu1 }
 0x247   : > { %v9208_v31 = vadd.f32 %v6976_v57, %v2911_v42  ;;  %v9210_v58 = vpop.f32.mrf.mxu0 }
 0x248   : > { %v3270_v54 = vpop.f32.mrf.mxu1 }
 0x249   : > { %3463 = vst.msk [vmem:[#allocation3 + $0x8] sm:$0xff] %vm3461_vm2, %v9208_v31  ;;  %v9216_v61 = vadd.f32 %v3270_v54, %v2906_v1  ;;  %v9218_v63 = vpop.f32.mrf.mxu0 }
 0x24a   : > { %v6979_v5 = vpop.f32.mrf.mxu1 }
 0x24b   : > { %10229 = vst [vmem:[#allocation11_spill] sm:$0xff] %v9216_v61  ;;  %3462 = vst.msk [vmem:[#allocation3] sm:$0xff] %vm3461_vm2, %v9216_v61  ;;  %v9224_v60 = vadd.f32 %v6979_v5, %v2921_v10  ;;  %v9226_v35 = vpop.f32.mrf.mxu0  ;;  %v9258_v5 = vrot.slane %v9255_v0, %v4374_v44  ;;  %v10241_v0 = vld [vmem:[#allocation21_spill] sm:$0xff] }
 0x24c   : > { %v3280_v42 = vpop.f32.mrf.mxu1 }
 0x24d   : > { %3465 = vst.msk [vmem:[#allocation3 + $0x18] sm:$0xff] %vm3461_vm2, %v9224_v60  ;;  %v9232_v29 = vadd.f32 %v3280_v42, %v2916_v22  ;;  %v9234_v54 = vpop.f32.mrf.mxu0  ;;  %10231 = vst [vmem:[#allocation13_spill] sm:$0xff] %v9258_v5  ;;  %v2936_v42 = vadd.f32 %v9086_v23, %v9094_v47  ;;  %5887 = vmatprep.mubr.msk.f32.mxu0 %vm3461_vm2, %v9258_v5 }
 0x24e   : > { %v6982_v57 = vpop.f32.mrf.mxu1 }
 0x24f   : > { %3464 = vst.msk [vmem:[#allocation3 + $0x10] sm:$0xff] %vm3461_vm2, %v9232_v29  ;;  %v9240_v37 = vadd.f32 %v6982_v57, %v2931_v25  ;;  %v9242_v10 = vpop.f32.mrf.mxu0  ;;  %v2951_v57 = vadd.f32 %v9091_v33, %v9098_v40  ;;  %v2961_v33 = vadd.f32 %v9100_v51, %v9106_v39  ;;  %v2971_v51 = vadd.f32 %v9108_v26, %v9114_v41 }
 0x250   : > { %v3290_v1 = vpop.f32.mrf.mxu1  ;;  %v2981_v26 = vadd.f32 %v9118_v45, %v9120_v32  ;;  %v2991_v45 = vadd.f32 %v9126_v55, %v9128_v27  ;;  %v3001_v55 = vadd.f32 %v9134_v2, %v9136_v24  ;;  %v3011_v2 = vadd.f32 %v9142_v21, %v9144_v62 }
 0x251   : > { %3467 = vst.msk [vmem:[#allocation3 + $0x28] sm:$0xff] %vm3461_vm2, %v9240_v37  ;;  %v9248_v12 = vadd.f32 %v3290_v1, %v2926_v4  ;;  %v9250_v22 = vpop.f32.mrf.mxu0  ;;  %v2946_v4 = vadd.f32 %v9096_v13, %v9102_v50  ;;  %v2956_v13 = vadd.f32 %v9104_v43, %v9110_v14  ;;  %v2966_v43 = vadd.f32 %v9112_v16, %v9116_v28 }
 0x252   : > { %v6985_v52 = vpop.f32.mrf.mxu1  ;;  %v2976_v16 = vadd.f32 %v9122_v8, %v9124_v49  ;;  %v2986_v8 = vadd.f32 %v9130_v11, %v9132_v34  ;;  %v2996_v11 = vadd.f32 %v9138_v46, %v9140_v53  ;;  %v3006_v46 = vadd.f32 %v9146_v7, %v9148_v36 }
 0x253   : > { %3466 = vst.msk [vmem:[#allocation3 + $0x20] sm:$0xff] %vm3461_vm2, %v9248_v12  ;;  %v9264_v38 = vadd.f32 %v6985_v52, %v2941_v18  ;;  %v9266_v30 = vpop.f32.mrf.mxu0  ;;  %v3021_v21 = vadd.f32 %v9153_v59, %v9161_v3  ;;  %v3016_v7 = vadd.f32 %v9166_v9, %v9170_v15  ;;  %v3031_v59 = vadd.f32 %v9172_v6, %v9174_v20  ;;  %v10240_v6 = vld [vmem:[#allocation33_spill] sm:$0xff] }
 0x254   : > { %v3300_v25 = vpop.f32.mrf.mxu1  ;;  %v3026_v9 = vadd.f32 %v9176_v17, %v9178_v48  ;;  %v3041_v20 = vadd.f32 %v10240_v6, %v9182_v19 }
 0x255   : > { %3469 = vst.msk [vmem:[#allocation3 + $0x38] sm:$0xff] %vm3461_vm2, %v9264_v38  ;;  %v9274_v44 = vadd.f32 %v3300_v25, %v2936_v42  ;;  %v9276_v23 = vpop.f32.mrf.mxu0 }
 0x256   : > { %v6988_v47 = vpop.f32.mrf.mxu1 }
 0x257   : > { %3468 = vst.msk [vmem:[#allocation3 + $0x30] sm:$0xff] %vm3461_vm2, %v9274_v44  ;;  %v9282_v1 = vadd.f32 %v6988_v47, %v2951_v57  ;;  %v9284_v18 = vpop.f32.mrf.mxu0 }
 0x258   : > { %v3310_v52 = vpop.f32.mrf.mxu1 }
 0x259   : > { %3471 = vst.msk [vmem:[#allocation3 + $0x48] sm:$0xff] %vm3461_vm2, %v9282_v1  ;;  %v9290_v40 = vadd.f32 %v3310_v52, %v2946_v4  ;;  %v9292_v42 = vpop.f32.mrf.mxu0 }
 0x25a   : > { %v6991_v25 = vpop.f32.mrf.mxu1 }
 0x25b   : > { %3470 = vst.msk [vmem:[#allocation3 + $0x40] sm:$0xff] %vm3461_vm2, %v9290_v40  ;;  %v9298_v50 = vadd.f32 %v6991_v25, %v2961_v33  ;;  %v9300_v57 = vpop.f32.mrf.mxu0 }
 0x25c   : > { %v3320_v47 = vpop.f32.mrf.mxu1 }
 0x25d   : > { %3473 = vst.msk [vmem:[#allocation3 + $0x58] sm:$0xff] %vm3461_vm2, %v9298_v50  ;;  %v9306_v39 = vadd.f32 %v3320_v47, %v2956_v13  ;;  %v9308_v4 = vpop.f32.mrf.mxu0 }
 0x25e   : > { %v6994_v52 = vpop.f32.mrf.mxu1 }
 0x25f   : > { %3472 = vst.msk [vmem:[#allocation3 + $0x50] sm:$0xff] %vm3461_vm2, %v9306_v39  ;;  %v9314_v14 = vadd.f32 %v6994_v52, %v2971_v51  ;;  %v9316_v33 = vpop.f32.mrf.mxu0 }
 0x260   : > { %v3330_v25 = vpop.f32.mrf.mxu1 }
 0x261   : > { %3475 = vst.msk [vmem:[#allocation3 + $0x68] sm:$0xff] %vm3461_vm2, %v9314_v14  ;;  %v9322_v41 = vadd.f32 %v3330_v25, %v2966_v43  ;;  %v9324_v13 = vpop.f32.mrf.mxu0 }
 0x262   : > { %v6997_v47 = vpop.f32.mrf.mxu1 }
 0x263   : > { %3474 = vst.msk [vmem:[#allocation3 + $0x60] sm:$0xff] %vm3461_vm2, %v9322_v41  ;;  %v9330_v28 = vadd.f32 %v6997_v47, %v2981_v26  ;;  %v9332_v51 = vpop.f32.mrf.mxu0 }
 0x264   : > { %v3340_v52 = vpop.f32.mrf.mxu1 }
 0x265   : > { %3477 = vst.msk [vmem:[#allocation3 + $0x78] sm:$0xff] %vm3461_vm2, %v9330_v28  ;;  %v9338_v32 = vadd.f32 %v3340_v52, %v2976_v16  ;;  %v9340_v43 = vpop.f32.mrf.mxu0 }
 0x266   : > { %v7000_v25 = vpop.f32.mrf.mxu1 }
 0x267   : > { %3476 = vst.msk [vmem:[#allocation3 + $0x70] sm:$0xff] %vm3461_vm2, %v9338_v32  ;;  %v9346_v49 = vadd.f32 %v7000_v25, %v2991_v45  ;;  %v9348_v26 = vpop.f32.mrf.mxu0 }
 0x268   : > { %10232 = vst [vmem:[#allocation38_spill] sm:$0xff] %v9348_v26  ;;  %v3350_v47 = vpop.f32.mrf.mxu1  ;;  %v10249_v26 = vld [vmem:[#allocation37_spill] sm:$0xff] }
 0x269   : > { %3479 = vst.msk [vmem:[#allocation3 + $0x88] sm:$0xff] %vm3461_vm2, %v9346_v49  ;;  %v9354_v27 = vadd.f32 %v3350_v47, %v2986_v8  ;;  %v9356_v16 = vpop.f32.mrf.mxu0 }
 0x26a   : > { %10233 = vst [vmem:[#allocation22_spill] sm:$0xff] %v9356_v16  ;;  %v7003_v52 = vpop.f32.mrf.mxu1  ;;  %v10248_v16 = vld [vmem:[#allocation36_spill] sm:$0xff] }
 0x26b   : > { %3478 = vst.msk [vmem:[#allocation3 + $0x80] sm:$0xff] %vm3461_vm2, %v9354_v27  ;;  %v9362_v34 = vadd.f32 %v7003_v52, %v3001_v55  ;;  %v9364_v45 = vpop.f32.mrf.mxu0 }
 0x26c   : > { %10234 = vst [vmem:[#allocation8_spill] sm:$0xff] %v9364_v45  ;;  %v3360_v25 = vpop.f32.mrf.mxu1  ;;  %v10247_v45 = vld [vmem:[#allocation7_spill] sm:$0xff] }
 0x26d   : > { %3481 = vst.msk [vmem:[#allocation3 + $0x98] sm:$0xff] %vm3461_vm2, %v9362_v34  ;;  %v9370_v24 = vadd.f32 %v3360_v25, %v2996_v11  ;;  %v9372_v8 = vpop.f32.mrf.mxu0 }
 0x26e   : > { %10235 = vst [vmem:[#allocation9_spill] sm:$0xff] %v9372_v8  ;;  %v7006_v47 = vpop.f32.mrf.mxu1  ;;  %v10246_v8 = vld [vmem:[#allocation35_spill] sm:$0xff] }
 0x26f   : > { %3480 = vst.msk [vmem:[#allocation3 + $0x90] sm:$0xff] %vm3461_vm2, %v9370_v24  ;;  %v9378_v53 = vadd.f32 %v7006_v47, %v3011_v2  ;;  %v9380_v55 = vpop.f32.mrf.mxu0 }
 0x270   : > { %10236 = vst [vmem:[#allocation15_spill] sm:$0xff] %v9380_v55  ;;  %v3370_v52 = vpop.f32.mrf.mxu1  ;;  %v10245_v55 = vld [vmem:[#allocation10_spill] sm:$0xff] }
 0x271   : > { %3483 = vst.msk [vmem:[#allocation3 + $0xa8] sm:$0xff] %vm3461_vm2, %v9378_v53  ;;  %v9386_v62 = vadd.f32 %v3370_v52, %v3006_v46  ;;  %v9388_v11 = vpop.f32.mrf.mxu0 }
 0x272   : > { %10237 = vst [vmem:[#allocation24_spill] sm:$0xff] %v9388_v11  ;;  %v7009_v25 = vpop.f32.mrf.mxu1  ;;  %v10244_v11 = vld [vmem:[#allocation34_spill] sm:$0xff] }
 0x273   : > { %3482 = vst.msk [vmem:[#allocation3 + $0xa0] sm:$0xff] %vm3461_vm2, %v9386_v62  ;;  %v9394_v36 = vadd.f32 %v7009_v25, %v3021_v21  ;;  %v9396_v2 = vpop.f32.mrf.mxu0 }
 0x274   : > { %10238 = vst [vmem:[#allocation12_spill] sm:$0xff] %v9396_v2  ;;  %v3380_v47 = vpop.f32.mrf.mxu1  ;;  %v10243_v2 = vld [vmem:[#allocation17_spill] sm:$0xff] }
 0x275   : > { %3485 = vst.msk [vmem:[#allocation3 + $0xb8] sm:$0xff] %vm3461_vm2, %v9394_v36  ;;  %v9402_v3 = vadd.f32 %v3380_v47, %v3016_v7  ;;  %v9404_v46 = vpop.f32.mrf.mxu0  ;;  %v3051_v19 = vadd.f32 %v10244_v11, %v10243_v2  ;;  %v3061_v11 = vadd.f32 %v10247_v45, %v9198_v56 }
 0x276   : > { %10239 = vst [vmem:[#allocation25_spill] sm:$0xff] %v9404_v46  ;;  %v7012_v52 = vpop.f32.mrf.mxu1  ;;  %v10242_v46 = vld [vmem:[#allocation19_spill] sm:$0xff] }
 0x277   : > { %3484 = vst.msk [vmem:[#allocation3 + $0xb0] sm:$0xff] %vm3461_vm2, %v9402_v3  ;;  %v9410_v15 = vadd.f32 %v7012_v52, %v3031_v59  ;;  %v7108_v21 = vpop.f32.mrf.mxu0  ;;  %v3036_v17 = vadd.f32 %v10242_v46, %v10241_v0  ;;  %v3046_v0 = vadd.f32 %v10246_v8, %v10245_v55  ;;  %v3056_v8 = vadd.f32 %v10249_v26, %v10248_v16 }
 0x278   : > { %v3390_v25 = vpop.f32.mrf.mxu1  ;;  %v3912_v61 = vadd.f32 %v7108_v21, %v9210_v58 }
 0x279   : > { %3487 = vst.msk [vmem:[#allocation3 + $0xc8] sm:$0xff] %vm3461_vm2, %v9410_v15  ;;  %v9416_v7 = vadd.f32 %v3390_v25, %v3026_v9  ;;  %v3906_v47 = vpop.f32.mrf.mxu0 }
 0x27a   : > { %v7015_v5 = vpop.f32.mrf.mxu1  ;;  %v3907_v26 = vadd.f32 %v3906_v47, %v9218_v63 }
 0x27b   : > { %3486 = vst.msk [vmem:[#allocation3 + $0xc0] sm:$0xff] %vm3461_vm2, %v9416_v7  ;;  %v9422_v48 = vadd.f32 %v7015_v5, %v3041_v20  ;;  %v7111_v59 = vpop.f32.mrf.mxu0 }
 0x27c   : > { %v3400_v52 = vpop.f32.mrf.mxu1  ;;  %v3922_v21 = vadd.f32 %v7111_v59, %v9226_v35 }
 0x27d   : > { %3489 = vst.msk [vmem:[#allocation3 + $0xd8] sm:$0xff] %vm3461_vm2, %v9422_v48  ;;  %v9428_v9 = vadd.f32 %v3400_v52, %v3036_v17  ;;  %v3916_v25 = vpop.f32.mrf.mxu0 }
 0x27e   : > { %v7018_v6 = vpop.f32.mrf.mxu1 }
 0x27f   : > { %3488 = vst.msk [vmem:[#allocation3 + $0xd0] sm:$0xff] %vm3461_vm2, %v9428_v9  ;;  %v9434_v5 = vadd.f32 %v7018_v6, %v3051_v19  ;;  %v7114_v46 = vpop.f32.mrf.mxu0 }
 0x280   : > { %v3410_v20 = vpop.f32.mrf.mxu1  ;;  %v3932_v59 = vadd.f32 %v7114_v46, %v9242_v10 }
 0x281   : > { %3491 = vst.msk [vmem:[#allocation3 + $0xe8] sm:$0xff] %vm3461_vm2, %v9434_v5  ;;  %v9440_v2 = vadd.f32 %v3410_v20, %v3046_v0  ;;  %v3926_v17 = vpop.f32.mrf.mxu0 }
 0x282   : > { %v7021_v52 = vpop.f32.mrf.mxu1 }
 0x283   : > { %3490 = vst.msk [vmem:[#allocation3 + $0xe0] sm:$0xff] %vm3461_vm2, %v9440_v2  ;;  %v9446_v55 = vadd.f32 %v7021_v52, %v3061_v11  ;;  %v7117_v19 = vpop.f32.mrf.mxu0 }
 0x284   : > { %v3420_v6 = vpop.f32.mrf.mxu1  ;;  %v3942_v46 = vadd.f32 %v7117_v19, %v9266_v30 }
 0x285   : > { %3493 = vst.msk [vmem:[#allocation3 + $0xf8] sm:$0xff] %vm3461_vm2, %v9446_v55  ;;  %v9451_v56 = vadd.f32 %v3420_v6, %v3056_v8  ;;  %v3936_v45 = vpop.f32.mrf.mxu0  ;;  %6396 = vmatprep.subr.mxu1 %v9446_v55 }
 0x286   : > { %v7168_v0 = vpop.f32.mrf.mxu1  ;;  %6397 = vmatpush3.msra.mxu1 %v9330_v28 }
 0x287   : > { %3492 = vst.msk [vmem:[#allocation3 + $0xf0] sm:$0xff] %vm3461_vm2, %v9451_v56  ;;  %v7120_v16 = vpop.f32.mrf.mxu0  ;;  %v9458_v20 = vadd.f32 %v7168_v0, %v3912_v61  ;;  %6398 = vmatprep.subr.mxu1 %v9451_v56  ;;  %v3917_v61 = vadd.f32 %v3916_v25, %v9234_v54  ;;  %v3927_v25 = vadd.f32 %v3926_v17, %v9250_v22 }
 0x288   : > { %v4199_v58 = vpop.f32.mrf.mxu1  ;;  %6399 = vmatpush3.msra.mxu1 %v9338_v32  ;;  %v3937_v17 = vadd.f32 %v3936_v45, %v9276_v23  ;;  %v3952_v19 = vadd.f32 %v7120_v16, %v9284_v18 }
 0x289   : > { %4343 = vst.msk [vmem:[#allocation3 + $0x108] sm:$0xff] %vm3461_vm2, %v9458_v20  ;;  %v3946_v11 = vpop.f32.mrf.mxu0  ;;  %v9465_v52 = vadd.f32 %v4199_v58, %v3907_v26  ;;  %6400 = vmatprep.subr.mxu1 %v9434_v5 }
 0x28a   : > { %v7171_v63 = vpop.f32.mrf.mxu1  ;;  %6401 = vmatpush3.msra.mxu1 %v9314_v14  ;;  %v3947_v45 = vadd.f32 %v3946_v11, %v9292_v42 }
 0x28b   : > { %4342 = vst.msk [vmem:[#allocation3 + $0x100] sm:$0xff] %vm3461_vm2, %v9465_v52  ;;  %v7123_v47 = vpop.f32.mrf.mxu0  ;;  %v9472_v8 = vadd.f32 %v7171_v63, %v3922_v21  ;;  %6402 = vmatprep.subr.mxu1 %v9440_v2 }
 0x28c   : > { %v4209_v35 = vpop.f32.mrf.mxu1  ;;  %6403 = vmatpush3.msra.mxu1 %v9322_v41  ;;  %v3962_v16 = vadd.f32 %v7123_v47, %v9300_v57 }
 0x28d   : > { %4345 = vst.msk [vmem:[#allocation3 + $0x118] sm:$0xff] %vm3461_vm2, %v9472_v8  ;;  %v3956_v6 = vpop.f32.mrf.mxu0  ;;  %v9479_v0 = vadd.f32 %v4209_v35, %v3917_v61  ;;  %6404 = vmatprep.subr.mxu1 %v9422_v48 }
 0x28e   : > { %v7174_v54 = vpop.f32.mrf.mxu1  ;;  %6405 = vmatpush3.msra.mxu1 %v9298_v50  ;;  %v3957_v11 = vadd.f32 %v3956_v6, %v9308_v4  ;;  %v10250_v6 = vld [vmem:[#allocation18_spill] sm:$0xff] }
 0x28f   : > { %4344 = vst.msk [vmem:[#allocation3 + $0x110] sm:$0xff] %vm3461_vm2, %v9479_v0  ;;  %v7126_v26 = vpop.f32.mrf.mxu0  ;;  %v9486_v58 = vadd.f32 %v7174_v54, %v3932_v59  ;;  %6406 = vmatprep.subr.mxu1 %v9428_v9 }
 0x290   : > { %v4219_v10 = vpop.f32.mrf.mxu1  ;;  %6407 = vmatpush3.msra.mxu1 %v9306_v39 }
 0x291   : > { %4347 = vst.msk [vmem:[#allocation3 + $0x128] sm:$0xff] %vm3461_vm2, %v9486_v58  ;;  %v3966_v21 = vpop.f32.mrf.mxu0  ;;  %v9493_v63 = vadd.f32 %v4219_v10, %v3927_v25  ;;  %6408 = vmatprep.subr.mxu1 %v9410_v15 }
 0x292   : > { %v7177_v22 = vpop.f32.mrf.mxu1  ;;  %6409 = vmatpush3.msra.mxu1 %v9282_v1 }
 0x293   : > { %4346 = vst.msk [vmem:[#allocation3 + $0x120] sm:$0xff] %vm3461_vm2, %v9493_v63  ;;  %v7129_v61 = vpop.f32.mrf.mxu0  ;;  %v9500_v35 = vadd.f32 %v7177_v22, %v3942_v46  ;;  %6410 = vmatprep.subr.mxu1 %v9416_v7 }
 0x294   : > { %v4229_v30 = vpop.f32.mrf.mxu1  ;;  %6411 = vmatpush3.msra.mxu1 %v9290_v40 }
 0x295   : > { %4349 = vst.msk [vmem:[#allocation3 + $0x138] sm:$0xff] %vm3461_vm2, %v9500_v35  ;;  %v3976_v59 = vpop.f32.mrf.mxu0  ;;  %v9507_v54 = vadd.f32 %v4229_v30, %v3937_v17  ;;  %6412 = vmatprep.subr.mxu1 %v9394_v36  ;;  %v3972_v30 = vadd.f32 %v7126_v26, %v9316_v33 }
 0x296   : > { %v7180_v23 = vpop.f32.mrf.mxu1  ;;  %6413 = vmatpush3.msra.mxu1 %v9264_v38 }
 0x297   : > { %4348 = vst.msk [vmem:[#allocation3 + $0x130] sm:$0xff] %vm3461_vm2, %v9507_v54  ;;  %v7132_v25 = vpop.f32.mrf.mxu0  ;;  %v9514_v10 = vadd.f32 %v7180_v23, %v3952_v19  ;;  %6414 = vmatprep.subr.mxu1 %v9402_v3  ;;  %v9540_v23 = vsub.s32 0, %v10250_v6 }
 0x298   : > { %v4239_v18 = vpop.f32.mrf.mxu1  ;;  %6415 = vmatpush3.msra.mxu1 %v9274_v44 }
 0x299   : > { %4351 = vst.msk [vmem:[#allocation3 + $0x148] sm:$0xff] %vm3461_vm2, %v9514_v10  ;;  %v3986_v46 = vpop.f32.mrf.mxu0  ;;  %v9521_v22 = vadd.f32 %v4239_v18, %v3947_v45  ;;  %6416 = vmatprep.subr.mxu1 %v9378_v53  ;;  %v3967_v45 = vadd.f32 %v3966_v21, %v9324_v13  ;;  %v10251_v21 = vld [vmem:[#allocation32_spill] sm:$0xff] }
 0x29a   : > { %v7183_v42 = vpop.f32.mrf.mxu1  ;;  %6417 = vmatpush3.msra.mxu1 %v9240_v37 }
 0x29b   : > { %4350 = vst.msk [vmem:[#allocation3 + $0x140] sm:$0xff] %vm3461_vm2, %v9521_v22  ;;  %v9528_v17 = vadd.f32 %v7183_v42, %v3962_v16  ;;  %6418 = vmatprep.subr.mxu1 %v9386_v62  ;;  %v7135_v57 = vpop.f32.mrf.mxu0  ;;  %v3982_v16 = vadd.f32 %v7129_v61, %v9332_v51  ;;  %v3526_v61 = vmul.f32 %v9446_v55, %v9446_v55 }
 0x29c   : > { %v4249_v47 = vpop.f32.mrf.mxu1  ;;  %6419 = vmatpush3.msra.mxu1 %v9248_v12  ;;  %v3525_v55 = vmul.f32 %v9451_v56, %v9451_v56  ;;  %v3524_v56 = vmul.f32 %v9434_v5, %v9434_v5  ;;  %v3523_v5 = vmul.f32 %v9440_v2, %v9440_v2  ;;  %v3522_v2 = vmul.f32 %v9422_v48, %v9422_v48 }
 0x29d   : > { %4353 = vst.msk [vmem:[#allocation3 + $0x158] sm:$0xff] %vm3461_vm2, %v9528_v17  ;;  %v9535_v19 = vadd.f32 %v4249_v47, %v3957_v11  ;;  %6420 = vmatprep.subr.mxu1 %v9362_v34  ;;  %v3996_v33 = vpop.f32.mrf.mxu0  ;;  %v9558_v11 = vrot.slane %v10251_v21, %v9540_v23  ;;  %v3977_v47 = vadd.f32 %v3976_v59, %v9340_v43  ;;  %v10253_v21 = vld [vmem:[#allocation38_spill] sm:$0xff] }
 0x29e   : > { %v7186_v4 = vpop.f32.mrf.mxu1  ;;  %6421 = vmatpush3.msra.mxu1 %v9224_v60  ;;  %v3992_v6 = vadd.f32 %v7132_v25, %v10253_v21  ;;  %v10255_v25 = vld [vmem:[#allocation22_spill] sm:$0xff]  ;;  %v3521_v48 = vmul.f32 %v9428_v9, %v9428_v9  ;;  %v3520_v9 = vmul.f32 %v9410_v15, %v9410_v15  ;;  %v3519_v15 = vmul.f32 %v9416_v7, %v9416_v7 }
 0x29f   : > { %4352 = vst.msk [vmem:[#allocation3 + $0x150] sm:$0xff] %vm3461_vm2, %v9535_v19  ;;  %v9545_v18 = vadd.f32 %v7186_v4, %v3972_v30  ;;  %6422 = vmatprep.subr.mxu1 %v9370_v24  ;;  %v7138_v30 = vpop.f32.mrf.mxu0  ;;  %v3518_v7 = vmul.f32 %v9394_v36, %v9394_v36  ;;  %v3501_v36 = vmul.f32 %v9274_v44, %v9274_v44 }
 0x2a0   : > { %v4259_v26 = vpop.f32.mrf.mxu1  ;;  %6423 = vmatpush3.msra.mxu1 %v9232_v29  ;;  %v3515_v44 = vmul.f32 %v9386_v62, %v9386_v62  ;;  %v3497_v62 = vmul.f32 %v9232_v29, %v9232_v29  ;;  %v3511_v29 = vmul.f32 %v9354_v27, %v9354_v27 }
 0x2a1   : > { %4355 = vst.msk [vmem:[#allocation3 + $0x168] sm:$0xff] %vm3461_vm2, %v9545_v18  ;;  %v9552_v42 = vadd.f32 %v4259_v26, %v3967_v45  ;;  %6424 = vmatprep.subr.mxu1 %v9346_v49  ;;  %v10252_v45 = vld [vmem:[#allocation11_spill] sm:$0xff]  ;;  %v3510_v26 = vmul.f32 %v9330_v28, %v9330_v28  ;;  %v3509_v28 = vmul.f32 %v9338_v32, %v9338_v32 }
 0x2a2   : > { %v7189_v13 = vpop.f32.mrf.mxu1  ;;  %6425 = vmatpush3.msra.mxu1 %v9208_v31  ;;  %v3508_v32 = vmul.f32 %v9314_v14, %v9314_v14  ;;  %v3507_v14 = vmul.f32 %v9322_v41, %v9322_v41  ;;  %v3506_v41 = vmul.f32 %v9298_v50, %v9298_v50  ;;  %v3505_v50 = vmul.f32 %v9306_v39, %v9306_v39 }
 0x2a3   : > { %4354 = vst.msk [vmem:[#allocation3 + $0x160] sm:$0xff] %vm3461_vm2, %v9552_v42  ;;  %v9563_v51 = vadd.f32 %v7189_v13, %v3982_v16  ;;  %6426 = vmatprep.subr.mxu1 %v9354_v27  ;;  %v10254_v16 = vmov 0.0   ;;  %v3987_v13 = vadd.f32 %v3986_v46, %v10255_v25  ;;  %v10256_v46 = vld [vmem:[#allocation8_spill] sm:$0xff]  ;;  %v3504_v39 = vmul.f32 %v9282_v1, %v9282_v1 }
 0x2a4   : > { %v4269_v4 = vpop.f32.mrf.mxu1  ;;  %6427 = vmatpush3.msra.mxu1 %v10252_v45  ;;  %v4002_v21 = vadd.f32 %v7135_v57, %v10256_v46  ;;  %v3503_v1 = vmul.f32 %v9290_v40, %v9290_v40  ;;  %v3502_v40 = vmul.f32 %v9264_v38, %v9264_v38  ;;  %v3516_v38 = vmul.f32 %v9378_v53, %v9378_v53 }
 0x2a5   : > { %4357 = vst.msk [vmem:[#allocation3 + $0x178] sm:$0xff] %vm3461_vm2, %v9563_v51  ;;  %v9574_v43 = vadd.f32 %v4269_v4, %v3977_v47  ;;  %4380 = vmatpush1.msra.mxu0 %v9563_v51  ;;  %6431 = vmatprep.subr.mxu1 %v3526_v61  ;;  %v4006_v61 = vpop.f32.mrf.mxu0  ;;  %v3498_v53 = vmul.f32 %v9224_v60, %v9224_v60 }
 0x2a6   : > { %v7192_v59 = vpop.f32.mrf.mxu1  ;;  %4381 = vmatprep.subr.mxu0 %v10254_v16  ;;  %4525 = vmatmul.mubr.f32.vlgmr.msra.gmra.mxu1 %v9558_v11  ;;  %v3512_v60 = vmul.f32 %v9346_v49, %v9346_v49  ;;  %v10263_v49 = vld [vmem:[#allocation20_spill] sm:$0xff] }
 0x2a7   : > { %4356 = vst.msk [vmem:[#allocation3 + $0x170] sm:$0xff] %vm3461_vm2, %v9574_v43  ;;  %v9586_v47 = vadd.f32 %v7192_v59, %v3992_v6  ;;  %6432 = vmatpush3.msra.mxu1 %v3510_v26  ;;  %4382 = vmatpush1.msra.mxu0 %v9574_v43  ;;  %v10257_v59 = vld [vmem:[#allocation9_spill] sm:$0xff]  ;;  %v9726_v27 = vrot.slane %v10263_v49, %v9540_v23 }
 0x2a8   : > { %6433 = vmatprep.subr.mxu1 %v3525_v55  ;;  %v4279_v4 = vpop.f32.mrf.mxu1  ;;  %4383 = vmatprep.subr.mxu0 %v10254_v16  ;;  %v3997_v57 = vadd.f32 %v3996_v33, %v10257_v59  ;;  %v10258_v33 = vld [vmem:[#allocation15_spill] sm:$0xff] }
 0x2a9   : > { %4359 = vst.msk [vmem:[#allocation3 + $0x188] sm:$0xff] %vm3461_vm2, %v9586_v47  ;;  %v9597_v6 = vadd.f32 %v4279_v4, %v3987_v13  ;;  %6434 = vmatpush3.msra.mxu1 %v3509_v28  ;;  %4384 = vmatpush1.msra.mxu0 %v9545_v18  ;;  %v7141_v28 = vpop.f32.mrf.mxu0  ;;  %v4012_v13 = vadd.f32 %v7138_v30, %v10258_v33 }
 0x2aa   : > { %6435 = vmatprep.subr.mxu1 %v3524_v56  ;;  %v7195_v26 = vpop.f32.mrf.mxu1  ;;  %4385 = vmatprep.subr.mxu0 %v10254_v16  ;;  %v3517_v33 = vmul.f32 %v9402_v3, %v9402_v3  ;;  %v3499_v3 = vmul.f32 %v9248_v12, %v9248_v12  ;;  %v3513_v12 = vmul.f32 %v9370_v24, %v9370_v24 }
 0x2ab   : > { %4358 = vst.msk [vmem:[#allocation3 + $0x180] sm:$0xff] %vm3461_vm2, %v9597_v6  ;;  %v9608_v55 = vadd.f32 %v7195_v26, %v4002_v21  ;;  %6436 = vmatpush3.msra.mxu1 %v3508_v32  ;;  %4386 = vmatpush1.msra.mxu0 %v9552_v42  ;;  %v10259_v32 = vld [vmem:[#allocation24_spill] sm:$0xff]  ;;  %v4016_v21 = vpop.f32.mrf.mxu0  ;;  %v3495_v24 = vmul.f32 %v10252_v45, %v10252_v45 }
 0x2ac   : > { %6437 = vmatprep.subr.mxu1 %v3523_v5  ;;  %v4289_v25 = vpop.f32.mrf.mxu1  ;;  %4387 = vmatprep.subr.mxu0 %v10254_v16  ;;  %v4007_v30 = vadd.f32 %v4006_v61, %v10259_v32  ;;  %v10260_v61 = vld [vmem:[#allocation12_spill] sm:$0xff]  ;;  %v4544_v45 = vmul.f32 %v9574_v43, %v9574_v43  ;;  %v4541_v43 = vmul.f32 %v9528_v17, %v9528_v17 }
 0x2ad   : > { %4361 = vst.msk [vmem:[#allocation3 + $0x198] sm:$0xff] %vm3461_vm2, %v9608_v55  ;;  %v9619_v4 = vadd.f32 %v4289_v25, %v3997_v57  ;;  %6438 = vmatpush3.msra.mxu1 %v3507_v14  ;;  %4388 = vmatpush1.msra.mxu0 %v9528_v17  ;;  %v4022_v5 = vadd.f32 %v7141_v28, %v10260_v61  ;;  %v10261_v57 = vld [vmem:[#allocation25_spill] sm:$0xff] }
 0x2ae   : > { %6439 = vmatprep.subr.mxu1 %v3522_v2  ;;  %v7198_v56 = vpop.f32.mrf.mxu1  ;;  %4389 = vmatprep.subr.mxu0 %v10254_v16  ;;  %v4017_v28 = vadd.f32 %v4016_v21, %v10261_v57  ;;  %v4537_v17 = vmul.f32 %v9500_v35, %v9500_v35  ;;  %v4549_v32 = vmul.f32 %v9608_v55, %v9608_v55 }
 0x2af   : > { %4360 = vst.msk [vmem:[#allocation3 + $0x190] sm:$0xff] %vm3461_vm2, %v9619_v4  ;;  %v9630_v46 = vadd.f32 %v7198_v56, %v4012_v13  ;;  %6440 = vmatpush3.msra.mxu1 %v3506_v41  ;;  %4390 = vmatpush1.msra.mxu0 %v9535_v19  ;;  %v3500_v13 = vmul.f32 %v9240_v37, %v9240_v37  ;;  %v10264_v56 = vld [vmem:[#allocation13_spill] sm:$0xff] }
 0x2b0   : > { %6441 = vmatprep.subr.mxu1 %v3521_v48  ;;  %v4299_v26 = vpop.f32.mrf.mxu1  ;;  %4391 = vmatprep.subr.mxu0 %v10254_v16  ;;  %v3514_v37 = vmul.f32 %v9362_v34, %v9362_v34  ;;  %v3496_v34 = vmul.f32 %v9208_v31, %v9208_v31  ;;  %v10262_v31 = vld [vmem:[#allocation16_spill] sm:$0xff]  ;;  %v4543_v48 = vmul.f32 %v9545_v18, %v9545_v18 }
 0x2b1   : > { %4363 = vst.msk [vmem:[#allocation3 + $0x1a8] sm:$0xff] %vm3461_vm2, %v9630_v46  ;;  %v9641_v14 = vadd.f32 %v4299_v26, %v4007_v30  ;;  %6442 = vmatpush3.msra.mxu1 %v3505_v50  ;;  %4392 = vmatpush1.msra.mxu0 %v9514_v10  ;;  %v4540_v50 = vmul.f32 %v9535_v19, %v9535_v19 }
 0x2b2   : > { %6443 = vmatprep.subr.mxu1 %v3520_v9  ;;  %v7201_v59 = vpop.f32.mrf.mxu1  ;;  %4393 = vmatprep.subr.mxu0 %v10254_v16  ;;  %v4539_v18 = vmul.f32 %v9514_v10, %v9514_v10  ;;  %v4536_v19 = vmul.f32 %v9507_v54, %v9507_v54  ;;  %v4535_v10 = vmul.f32 %v9486_v58, %v9486_v58 }
 0x2b3   : > { %4362 = vst.msk [vmem:[#allocation3 + $0x1a0] sm:$0xff] %vm3461_vm2, %v9641_v14  ;;  %v9652_v25 = vadd.f32 %v7201_v59, %v4022_v5  ;;  %6444 = vmatpush3.msra.mxu1 %v3504_v39  ;;  %4394 = vmatpush1.msra.mxu0 %v9521_v22  ;;  %v4548_v30 = vmul.f32 %v9619_v4, %v9619_v4 }
 0x2b4   : > { %6445 = vmatprep.subr.mxu1 %v3519_v15  ;;  %v4309_v2 = vpop.f32.mrf.mxu1  ;;  %4395 = vmatprep.subr.mxu0 %v10254_v16  ;;  %v4546_v21 = vmul.f32 %v9597_v6, %v9597_v6  ;;  %v9810_v15 = vld [vmem:[%s8131_s6 + $0x3] sm:$0x1] }
 0x2b5   : > { %4365 = vst.msk [vmem:[#allocation3 + $0x1b8] sm:$0xff] %vm3461_vm2, %v9652_v25  ;;  %v9662_v41 = vadd.f32 %v4309_v2, %v4017_v28  ;;  %6446 = vmatpush3.msra.mxu1 %v3503_v1  ;;  %4396 = vmatpush1.msra.mxu0 %v9500_v35  ;;  %v4533_v35 = vmul.f32 %v9472_v8, %v9472_v8 }
 0x2b6   : > { %6447 = vmatprep.subr.mxu1 %v3518_v7  ;;  %4397 = vmatprep.subr.mxu0 %v10254_v16 }
 0x2b7   : > { %4364 = vst.msk [vmem:[#allocation3 + $0x1b0] sm:$0xff] %vm3461_vm2, %v9662_v41  ;;  %6448 = vmatpush3.msra.mxu1 %v3502_v40  ;;  %4398 = vmatpush1.msra.mxu0 %v9507_v54  ;;  %v4532_v54 = vmul.f32 %v9479_v0, %v9479_v0  ;;  %v281_v40 = vld [vmem:[%s8131_s6 + $0x1] sm:$0x1] }
 0x2b8   : > { %6449 = vmatprep.subr.mxu1 %v3517_v33  ;;  %4399 = vmatprep.subr.mxu0 %v10254_v16 }
 0x2b9   : > { %6450 = vmatpush3.msra.mxu1 %v3501_v36  ;;  %4400 = vmatpush1.msra.mxu0 %v9486_v58  ;;  %v4531_v58 = vmul.f32 %v9458_v20, %v9458_v20  ;;  %v282_v36 = vld [vmem:[%s8131_s6 + $0x2] sm:$0x1]  ;;  %s7277_s6 = scalar_lea.vmem %s7276_s22, 128 }
 0x2ba   : > { %6451 = vmatprep.subr.mxu1 %v3516_v38  ;;  %4401 = vmatprep.subr.mxu0 %v10254_v16  ;;  %p7279_p1 = scmp.lt.s32.totalorder %s7277_s6, %s7271_s25 }
 0x2bb   : > { %6452 = vmatpush3.msra.mxu1 %v3500_v13  ;;  %4402 = vmatpush1.msra.mxu0 %v9493_v63 }
 0x2bc   : > { %6453 = vmatprep.subr.mxu1 %v3515_v44  ;;  %4403 = vmatprep.subr.mxu0 %v10254_v16  ;;  %p7280_p2 = por %p7279_p1, %p7278_p0 }
 0x2bd   : > { %6454 = vmatpush3.msra.mxu1 %v3499_v3  ;;  %4404 = vmatpush1.msra.mxu0 %v9472_v8  ;;  %v4553_v8 = vmul.f32 %v9652_v25, %v9652_v25  ;;  %v4734_v3 = vld [vmem:[#allocation3 + $0xf8] sm:$0xff] }
 0x2be   : > { %6455 = vmatprep.subr.mxu1 %v3514_v37  ;;  %4405 = vmatprep.subr.mxu0 %v10254_v16  ;;  %v5088_v37 = vld [vmem:[#allocation3 + $0x178] sm:$0xff]  ;;  %p7281_p3 = pnand %p7280_p2, %p7274_p13 }
 0x2bf   : > { %6456 = vmatpush3.msra.mxu1 %v3498_v53  ;;  %4406 = vmatpush1.msra.mxu0 %v9479_v0  ;;  %v4552_v0 = vmul.f32 %v9662_v41, %v9662_v41  ;;  %v4718_v53 = vld [vmem:[#allocation3 + $0x78] sm:$0xff] }
 0x2c0   : > { %6457 = vmatprep.subr.mxu1 %v3513_v12  ;;  %4407 = vmatprep.subr.mxu0 %v10254_v16  ;;  %v4716_v12 = vld [vmem:[#allocation3 + $0x68] sm:$0xff] }
 0x2c1   : > { %6458 = vmatpush3.msra.mxu1 %v3497_v62  ;;  %4408 = vmatpush1.msra.mxu0 %v9458_v20  ;;  %v4551_v20 = vmul.f32 %v9630_v46, %v9630_v46 }
 0x2c2   : > { %6459 = vmatprep.subr.mxu1 %v3512_v60  ;;  %4409 = vmatprep.subr.mxu0 %v10254_v16 }
 0x2c3   : > { %6460 = vmatpush3.msra.mxu1 %v3496_v34  ;;  %4410 = vmatpush1.msra.mxu0 %v9465_v52 }
 0x2c4   : > { %6461 = vmatprep.subr.mxu1 %v3511_v29  ;;  %4427 = vmatprep.subr.mxu0 %v10254_v16  ;;  %v4733_v29 = vld [vmem:[#allocation3 + $0xf0] sm:$0xff] }
 0x2c5   : > { %6462 = vmatpush3.msra.mxu1 %v3495_v24  ;;  %4428 = vmatpush2.msra.mxu0 %v9652_v25  ;;  %v5087_v24 = vld [vmem:[#allocation3 + $0x170] sm:$0xff] }
 0x2c6   : > { %4429 = vmatprep.subr.mxu0 %v10254_v16  ;;  %4688 = vmatprep.mubr.f32.mxu1 %v10262_v31  ;;  %v4717_v31 = vld [vmem:[#allocation3 + $0x70] sm:$0xff] }
 0x2c7   : > { %4430 = vmatpush2.msra.mxu0 %v9662_v41  ;;  %4689 = vmatmul.mubr.f32.vlgmr.msra.gmra.mxu1 %v9558_v11  ;;  %v4545_v11 = vmul.f32 %v9563_v51, %v9563_v51  ;;  %v4542_v51 = vmul.f32 %v9552_v42, %v9552_v42  ;;  %v4538_v42 = vmul.f32 %v9521_v22, %v9521_v22 }
 0x2c8   : > { %4431 = vmatprep.subr.mxu0 %v10254_v16  ;;  %v4534_v22 = vmul.f32 %v9493_v63, %v9493_v63  ;;  %v4530_v63 = vmul.f32 %v9465_v52, %v9465_v52  ;;  %v4550_v52 = vmul.f32 %v9641_v14, %v9641_v14  ;;  %6498 = vmatprep.mubr.msk.f32.mxu1 %vm3461_vm2, %v9810_v15 }
 0x2c9   : > { %4432 = vmatpush2.msra.mxu0 %v9630_v46  ;;  %v4547_v46 = vmul.f32 %v9586_v47, %v9586_v47 }
 0x2ca   : > { %4433 = vmatprep.subr.mxu0 %v10254_v16 }
 0x2cb   : > { %4434 = vmatpush2.msra.mxu0 %v9641_v14 }
 0x2cc   : > { %4435 = vmatprep.subr.mxu0 %v10254_v16 }
 0x2cd   : > { %4436 = vmatpush2.msra.mxu0 %v9608_v55 }
 0x2ce   : > { %4437 = vmatprep.subr.mxu0 %v10254_v16 }
 0x2cf   : > { %4438 = vmatpush2.msra.mxu0 %v9619_v4 }
 0x2d0   : > { %4439 = vmatprep.subr.mxu0 %v10254_v16 }
 0x2d1   : > { %4440 = vmatpush2.msra.mxu0 %v9586_v47 }
 0x2d2   : > { %4441 = vmatprep.subr.mxu0 %v10254_v16 }
 0x2d3   : > { %4442 = vmatpush2.msra.mxu0 %v9597_v6 }
 0x2d4   : > { %4444 = vmatmul.mubr.f32.vlgmr.msra.gmra.mxu0 %v9726_v27  ;;  %4554 = vmatprep.subr.mxu0 %v10254_v16 }
 0x2d5   : > { %4555 = vmatpush1.msra.mxu0 %v4545_v11  ;;  %5888 = vmatprep.mubr.msk.f32.mxu0 %vm3461_vm2, %v10264_v56  ;;  %v4732_v56 = vld [vmem:[#allocation3 + $0xe8] sm:$0xff] }
 0x2d6   : > { %4556 = vmatprep.subr.mxu0 %v10254_v16 }
 0x2d7   : > { %4557 = vmatpush1.msra.mxu0 %v4544_v45 }
 0x2d8   : > { %4558 = vmatprep.subr.mxu0 %v10254_v16 }
 0x2d9   : > { %4559 = vmatpush1.msra.mxu0 %v4543_v48  ;;  %v5086_v48 = vld [vmem:[#allocation3 + $0x168] sm:$0xff] }
 0x2da   : > { %4560 = vmatprep.subr.mxu0 %v10254_v16 }
 0x2db   : > { %4561 = vmatpush1.msra.mxu0 %v4542_v51  ;;  %v4731_v51 = vld [vmem:[#allocation3 + $0xe0] sm:$0xff] }
 0x2dc   : > { %4562 = vmatprep.subr.mxu0 %v10254_v16 }
 0x2dd   : > { %4563 = vmatpush1.msra.mxu0 %v4541_v43 }
 0x2de   : > { %4564 = vmatprep.subr.mxu0 %v10254_v16 }
 0x2df   : > { %4565 = vmatpush1.msra.mxu0 %v4540_v50 }
 0x2e0   : > { %4566 = vmatprep.subr.mxu0 %v10254_v16 }
 0x2e1   : > { %4567 = vmatpush1.msra.mxu0 %v4539_v18 }
 0x2e2   : > { %4568 = vmatprep.subr.mxu0 %v10254_v16 }
 0x2e3   : > { %4569 = vmatpush1.msra.mxu0 %v4538_v42 }
 0x2e4   : > { %4570 = vmatprep.subr.mxu0 %v10254_v16 }
 0x2e5   : > { %4571 = vmatpush1.msra.mxu0 %v4537_v17 }
 0x2e6   : > { %4572 = vmatprep.subr.mxu0 %v10254_v16 }
 0x2e7   : > { %4573 = vmatpush1.msra.mxu0 %v4536_v19 }
 0x2e8   : > { %4574 = vmatprep.subr.mxu0 %v10254_v16 }
 0x2e9   : > { %4575 = vmatpush1.msra.mxu0 %v4535_v10 }
 0x2ea   : > { %4576 = vmatprep.subr.mxu0 %v10254_v16 }
 0x2eb   : > { %4577 = vmatpush1.msra.mxu0 %v4534_v22 }
 0x2ec   : > { %4578 = vmatprep.subr.mxu0 %v10254_v16 }
 0x2ed   : > { %4579 = vmatpush1.msra.mxu0 %v4533_v35 }
 0x2ee   : > { %4580 = vmatprep.subr.mxu0 %v10254_v16 }
 0x2ef   : > { %4581 = vmatpush1.msra.mxu0 %v4532_v54 }
 0x2f0   : > { %4582 = vmatprep.subr.mxu0 %v10254_v16 }
 0x2f1   : > { %4583 = vmatpush1.msra.mxu0 %v4531_v58 }
 0x2f2   : > { %4584 = vmatprep.subr.mxu0 %v10254_v16 }
 0x2f3   : > { %4585 = vmatpush1.msra.mxu0 %v4530_v63  ;;  %v5085_v63 = vld [vmem:[#allocation3 + $0x160] sm:$0xff] }
 0x2f4   : > { %4602 = vmatprep.subr.mxu0 %v10254_v16 }
 0x2f5   : > { %4603 = vmatpush2.msra.mxu0 %v4553_v8 }
 0x2f6   : > { %4604 = vmatprep.subr.mxu0 %v10254_v16 }
 0x2f7   : > { %4605 = vmatpush2.msra.mxu0 %v4552_v0 }
 0x2f8   : > { %4606 = vmatprep.subr.mxu0 %v10254_v16 }
 0x2f9   : > { %4607 = vmatpush2.msra.mxu0 %v4551_v20 }
 0x2fa   : > { %4608 = vmatprep.subr.mxu0 %v10254_v16 }
 0x2fb   : > { %4609 = vmatpush2.msra.mxu0 %v4550_v52 }
 0x2fc   : > { %4610 = vmatprep.subr.mxu0 %v10254_v16 }
 0x2fd   : > { %4611 = vmatpush2.msra.mxu0 %v4549_v32 }
 0x2fe   : > { %4612 = vmatprep.subr.mxu0 %v10254_v16 }
 0x2ff   : > { %4613 = vmatpush2.msra.mxu0 %v4548_v30 }
 0x300   : > { %4614 = vmatprep.subr.mxu0 %v10254_v16 }
 0x301   : > { %4615 = vmatpush2.msra.mxu0 %v4547_v46 }
 0x302   : > { %4616 = vmatprep.subr.mxu0 %v10254_v16 }
 0x303   : > { %4617 = vmatpush2.msra.mxu0 %v4546_v21 }
 0x304   : > { %4619 = vmatmul.mubr.f32.vlgmr.msra.gmra.mxu0 %v9726_v27  ;;  %5289 = vmatprep.subr.mxu0 %v10254_v16 }
 0x305   : > { %5353 = vmatprep.mubr.f32.mxu0 %v10254_v16 }
 0x366   : > { %v6428_v47 = vpop.f32.mrf.mxu1 }
 0x368   : > { %v6429_v26 = vpop.f32.mrf.mxu1 }
 0x369   : > { %v6430_v9 = vadd.f32 %v6429_v26, %v6428_v47 }
 0x387   : > { %v6463_v39 = vpop.f32.mrf.mxu1 }
 0x389   : > { %v6464_v6 = vpop.f32.mrf.mxu1 }
 0x38a   : > { %v6465_v14 = vadd.f32 %v6464_v6, %v6463_v39 }
 0x394   : > { %v4445_v55 = vpop.f32.mrf.mxu0 }
 0x395   : > { %v4527_v61 = vadd.f32 %v6430_v9, %v4445_v55  ;;  %v4715_v55 = vld [vmem:[#allocation3 + $0x60] sm:$0xff]  ;;  %v4730_v9 = vld [vmem:[#allocation3 + $0xd8] sm:$0xff] }
 0x396   : > { %v4447_v4 = vpop.f32.mrf.mxu0 }
 0x397   : > { %v4694_v5 = vmul.f32 0.0034722222, %v4527_v61 }
 0x399   : > { %v4696_v25 = vmul.f32 %v4694_v5, %v4694_v5 }
 0x3c4   : > { %v4620_v59 = vpop.f32.mrf.mxu0 }
 0x3c5   : > { %v4691_v1 = vadd.f32 %v6465_v14, %v4620_v59 }
 0x3c6   : > { %v4622_v57 = vpop.f32.mrf.mxu0 }
 0x3c7   : > { %v4695_v28 = vmul.f32 0.0034722222, %v4691_v1 }
 0x3c9   : > { %v4697_v2 = vsub.f32 %v4695_v28, %v4696_v25 }
 0x3cb   : > { %v4698_v7 = vadd.f32 1e-05, %v4697_v2 }
 0x3cd   : > { %7251 = vrsqrt.f32 %v4698_v7 }
 0x3da   : > { %v7252_v41 = vpop.eup %7251 }
 0x3db   : > { %v4700_v33 = vmul.f32 %v7252_v41, %v281_v40  ;;  %v5084_v40 = vld [vmem:[#allocation3 + $0x158] sm:$0xff] }
 0x3dd   : > { %v4701_v38 = vmul.f32 %v4700_v33, %v4694_v5  ;;  %v9817_v13 = vrot.slane %v4700_v33, %v9540_v23 }
 0x3df   : > { %v4702_v44 = vsub.f32 %v282_v36, %v4701_v38  ;;  %v4770_v62 = vmul.f32 %v9817_v13, %v4734_v3  ;;  %v5112_v60 = vmul.f32 %v5088_v37, %v9817_v13  ;;  %v4754_v34 = vmul.f32 %v9817_v13, %v4718_v53  ;;  %v4714_v3 = vld [vmem:[#allocation3 + $0x58] sm:$0xff] }
 0x3e0   : > { %v4769_v27 = vmul.f32 %v9817_v13, %v4733_v29  ;;  %v5111_v11 = vmul.f32 %v5087_v24, %v9817_v13  ;;  %v4753_v45 = vmul.f32 %v9817_v13, %v4717_v31  ;;  %v4768_v43 = vmul.f32 %v9817_v13, %v4732_v56 }
 0x3e1   : > { %v9823_v49 = vrot.slane %v4702_v44, %v9540_v23  ;;  %v5110_v50 = vmul.f32 %v5086_v48, %v9817_v13  ;;  %v4752_v18 = vmul.f32 %v9817_v13, %v4716_v12  ;;  %v4767_v42 = vmul.f32 %v9817_v13, %v4731_v51 }
 0x3e2   : > { %v5109_v21 = vmul.f32 %v5085_v63, %v9817_v13  ;;  %v4751_v26 = vmul.f32 %v9817_v13, %v4715_v55  ;;  %v4766_v6 = vmul.f32 %v9817_v13, %v4730_v9  ;;  %v5108_v36 = vmul.f32 %v5084_v40, %v9817_v13  ;;  %v5081_v55 = vld [vmem:[#allocation3 + $0x140] sm:$0xff] }
 0x3e3   : > { %v4806_v23 = vadd.f32 %v9823_v49, %v4770_v62  ;;  %v5136_v17 = vadd.f32 %v5112_v60, %v9823_v49  ;;  %v4790_v19 = vadd.f32 %v9823_v49, %v4754_v34  ;;  %v4805_v10 = vadd.f32 %v9823_v49, %v4769_v27  ;;  %v4729_v62 = vld [vmem:[#allocation3 + $0xd0] sm:$0xff] }
 0x3e4   : > { %v5135_v22 = vadd.f32 %v5111_v11, %v9823_v49  ;;  %v4789_v35 = vadd.f32 %v9823_v49, %v4753_v45  ;;  %v4804_v54 = vadd.f32 %v9823_v49, %v4768_v43  ;;  %v5134_v58 = vadd.f32 %v5110_v50, %v9823_v49  ;;  %v5083_v60 = vld [vmem:[#allocation3 + $0x150] sm:$0xff]  ;;  %v4728_v50 = vld [vmem:[#allocation3 + $0xc8] sm:$0xff] }
 0x3e5   : > { %vm4838_vm1 = vcmp.ge.f32.partialorder %v4806_v23, 0.0  ;;  %v4870_v8 = vmul.f32 0.2, %v4806_v23  ;;  %vm5160_vm3 = vcmp.ge.f32.partialorder %v5136_v17, 0.0  ;;  %v5184_v0 = vmul.f32 0.2, %v5136_v17 }
 0x3e6   : > { %vm4822_vm4 = vcmp.ge.f32.partialorder %v4790_v19, 0.0  ;;  %v4854_v20 = vmul.f32 0.2, %v4790_v19  ;;  %vm4837_vm5 = vcmp.ge.f32.partialorder %v4805_v10, 0.0  ;;  %v4869_v52 = vmul.f32 0.2, %v4805_v10 }
 0x3e7   : > { %v4902_v32 = vsel %vm4838_vm1, %v4806_v23, %v4870_v8  ;;  %v5208_v30 = vsel %vm5160_vm3, %v5136_v17, %v5184_v0  ;;  %v5183_v46 = vmul.f32 0.2, %v5135_v22  ;;  %vm5159_vm6 = vcmp.ge.f32.partialorder %v5135_v22, 0.0  ;;  %v4713_v27 = vld [vmem:[#allocation3 + $0x50] sm:$0xff]  ;;  %v4712_v8 = vld [vmem:[#allocation3 + $0x48] sm:$0xff] }
 0x3e8   : > { %6466 = vmatprep.subr.msk.mxu1 %vm3461_vm2, %v4902_v32  ;;  %5922 = vmatpush1.xpose.msk.msra.mxu0 %vm3461_vm2, %v5208_v30  ;;  %v4886_v4 = vsel %vm4822_vm4, %v4790_v19, %v4854_v20  ;;  %v4853_v47 = vmul.f32 0.2, %v4789_v35  ;;  %v4901_v39 = vsel %vm4837_vm5, %v4805_v10, %v4869_v52  ;;  %vm4821_vm7 = vcmp.ge.f32.partialorder %v4789_v35, 0.0  ;;  %v5082_v19 = vld [vmem:[#allocation3 + $0x148] sm:$0xff]  ;;  %v4727_v32 = vld [vmem:[#allocation3 + $0xc0] sm:$0xff] }
 0x3e9   : > { %6467 = vmatpush3.xpose.msk.msra.mxu1 %vm3461_vm2, %v4886_v4  ;;  %5291 = vmatprep.subr.mxu0 %v10254_v16  ;;  %v4868_v61 = vmul.f32 0.2, %v4804_v54  ;;  %vm4836_vm8 = vcmp.ge.f32.partialorder %v4804_v54, 0.0  ;;  %v5182_v5 = vmul.f32 0.2, %v5134_v58  ;;  %v4788_v14 = vadd.f32 %v9823_v49, %v4752_v18 }
 0x3ea   : > { %6468 = vmatprep.subr.msk.mxu1 %vm3461_vm2, %v4901_v39  ;;  %v4803_v59 = vadd.f32 %v9823_v49, %v4767_v42  ;;  %v5207_v1 = vsel %vm5159_vm6, %v5135_v22, %v5183_v46  ;;  %vm5158_vm9 = vcmp.ge.f32.partialorder %v5134_v58, 0.0  ;;  %v5133_v57 = vadd.f32 %v5109_v21, %v9823_v49  ;;  %v4711_v39 = vld [vmem:[#allocation3 + $0x40] sm:$0xff] }
 0x3eb   : > { %v4787_v28 = vadd.f32 %v9823_v49, %v4751_v26  ;;  %v4885_v25 = vsel %vm4821_vm7, %v4789_v35, %v4853_v47  ;;  %vm4820_vm10 = vcmp.ge.f32.partialorder %v4788_v14, 0.0  ;;  %v4852_v2 = vmul.f32 0.2, %v4788_v14 }
 0x3ec   : > { %5923 = vmatpush1.xpose.msk.msra.mxu0 %vm3461_vm2, %v5207_v1  ;;  %v4802_v7 = vadd.f32 %v9823_v49, %v4766_v6  ;;  %v4900_v41 = vsel %vm4836_vm8, %v4804_v54, %v4868_v61  ;;  %v4867_v33 = vmul.f32 0.2, %v4803_v59  ;;  %v5206_v38 = vsel %vm5158_vm9, %v5134_v58, %v5182_v5  ;;  %v4726_v1 = vld [vmem:[#allocation3 + $0xb8] sm:$0xff] }
 0x3ed   : > { %6469 = vmatpush3.xpose.msk.msra.mxu1 %vm3461_vm2, %v4885_v25  ;;  %5293 = vmatprep.subr.mxu0 %v10254_v16  ;;  %vm4835_vm11 = vcmp.ge.f32.partialorder %v4803_v59, 0.0  ;;  %vm5157_vm12 = vcmp.ge.f32.partialorder %v5133_v57, 0.0  ;;  %v5181_v44 = vmul.f32 0.2, %v5133_v57  ;;  %v4884_v37 = vsel %vm4820_vm10, %v4788_v14, %v4852_v2 }
 0x3ee   : > { %6470 = vmatprep.subr.msk.mxu1 %vm3461_vm2, %v4900_v41  ;;  %vm4819_vm13 = vcmp.ge.f32.partialorder %v4787_v28, 0.0  ;;  %v5132_v53 = vadd.f32 %v5108_v36, %v9823_v49  ;;  %v4750_v12 = vmul.f32 %v9817_v13, %v4714_v3  ;;  %v4851_v34 = vmul.f32 0.2, %v4787_v28  ;;  %v4710_v3 = vld [vmem:[#allocation3 + $0x38] sm:$0xff] }
 0x3ef   : > { %v4866_v29 = vmul.f32 0.2, %v4802_v7  ;;  %v4765_v24 = vmul.f32 %v9817_v13, %v4729_v62  ;;  %v5107_v31 = vmul.f32 %v5083_v60, %v9817_v13  ;;  %v4899_v11 = vsel %vm4835_vm11, %v4803_v59, %v4867_v33 }
 0x3f0   : > { %5924 = vmatpush1.xpose.msk.msra.mxu0 %vm3461_vm2, %v5206_v38  ;;  %v5180_v45 = vmul.f32 0.2, %v5132_v53  ;;  %v4786_v56 = vadd.f32 %v9823_v49, %v4750_v12  ;;  %v4749_v48 = vmul.f32 %v9817_v13, %v4713_v27  ;;  %vm4834_vm14 = vcmp.ge.f32.partialorder %v4802_v7, 0.0 }
 0x3f1   : > { %6471 = vmatpush3.xpose.msk.msra.mxu1 %vm3461_vm2, %v4884_v37  ;;  %5295 = vmatprep.subr.mxu0 %v10254_v16  ;;  %vm5156_vm15 = vcmp.ge.f32.partialorder %v5132_v53, 0.0  ;;  %v4801_v51 = vadd.f32 %v9823_v49, %v4765_v24  ;;  %v5131_v43 = vadd.f32 %v5107_v31, %v9823_v49  ;;  %v5205_v18 = vsel %vm5157_vm12, %v5133_v57, %v5181_v44  ;;  %v4725_v37 = vld [vmem:[#allocation3 + $0xb0] sm:$0xff] }
 0x3f2   : > { %6472 = vmatprep.subr.msk.mxu1 %vm3461_vm2, %v4899_v11  ;;  %v4850_v42 = vmul.f32 0.2, %v4786_v56  ;;  %v4785_v23 = vadd.f32 %v9823_v49, %v4749_v48  ;;  %v4764_v17 = vmul.f32 %v9817_v13, %v4728_v50  ;;  %v4883_v10 = vsel %vm4819_vm13, %v4787_v28, %v4851_v34  ;;  %v5079_v34 = vld [vmem:[#allocation3 + $0x130] sm:$0xff] }
 0x3f3   : > { %vm4818_vm0 = vcmp.ge.f32.partialorder %v4786_v56, 0.0  ;;  %v4865_v22 = vmul.f32 0.2, %v4801_v51  ;;  %v5106_v35 = vmul.f32 %v5082_v19, %v9817_v13  ;;  %v4898_v54 = vsel %vm4834_vm14, %v4802_v7, %v4866_v29  ;;  %v5080_v7 = vld [vmem:[#allocation3 + $0x138] sm:$0xff]  ;;  %v4724_v19 = vld [vmem:[#allocation3 + $0xa8] sm:$0xff] }
 0x3f4   : > { %5925 = vmatpush1.xpose.msk.msra.mxu0 %vm3461_vm2, %v5205_v18  ;;  %v5204_v58 = vsel %vm5156_vm15, %v5132_v53, %v5180_v45  ;;  %vm4833_vm1 = vcmp.ge.f32.partialorder %v4801_v51, 0.0  ;;  %v4800_v63 = vadd.f32 %v9823_v49, %v4764_v17  ;;  %vm5155_vm3 = vcmp.ge.f32.partialorder %v5131_v43, 0.0 }
 0x3f5   : > { %6473 = vmatpush3.xpose.msk.msra.mxu1 %vm3461_vm2, %v4883_v10  ;;  %5297 = vmatprep.subr.mxu0 %v10254_v16  ;;  %v5179_v0 = vmul.f32 0.2, %v5131_v43  ;;  %v5130_v20 = vadd.f32 %v5106_v35, %v9823_v49  ;;  %v4748_v52 = vmul.f32 %v9817_v13, %v4712_v8  ;;  %v4882_v30 = vsel %vm4818_vm0, %v4786_v56, %v4850_v42  ;;  %v4709_v56 = vld [vmem:[#allocation3 + $0x30] sm:$0xff]  ;;  %v5078_v10 = vld [vmem:[#allocation3 + $0x128] sm:$0xff] }
 0x3f6   : > { %6474 = vmatprep.subr.msk.mxu1 %vm3461_vm2, %v4898_v54  ;;  %vm4817_vm4 = vcmp.ge.f32.partialorder %v4785_v23, 0.0  ;;  %v4849_v46 = vmul.f32 0.2, %v4785_v23  ;;  %v4763_v21 = vmul.f32 %v9817_v13, %v4727_v32  ;;  %v4897_v4 = vsel %vm4833_vm1, %v4801_v51, %v4865_v22  ;;  %v4708_v22 = vld [vmem:[#allocation3 + $0x28] sm:$0xff] }
 0x3f7   : > { %v4864_v47 = vmul.f32 0.2, %v4800_v63  ;;  %v4784_v26 = vadd.f32 %v9823_v49, %v4748_v52  ;;  %v5105_v9 = vmul.f32 %v5081_v55, %v9817_v13  ;;  %vm4832_vm5 = vcmp.ge.f32.partialorder %v4800_v63, 0.0  ;;  %v5077_v55 = vld [vmem:[#allocation3 + $0x120] sm:$0xff] }
 0x3f8   : > { %5926 = vmatpush1.xpose.msk.msra.mxu0 %vm3461_vm2, %v5204_v58  ;;  %v5178_v61 = vmul.f32 0.2, %v5130_v20  ;;  %v4799_v6 = vadd.f32 %v9823_v49, %v4763_v21  ;;  %v4747_v5 = vmul.f32 %v9817_v13, %v4711_v39  ;;  %vm5154_vm6 = vcmp.ge.f32.partialorder %v5130_v20, 0.0  ;;  %v4723_v21 = vld [vmem:[#allocation3 + $0xa0] sm:$0xff]  ;;  %v4722_v39 = vld [vmem:[#allocation3 + $0x98] sm:$0xff] }
 0x3f9   : > { %6475 = vmatpush3.xpose.msk.msra.mxu1 %vm3461_vm2, %v4882_v30  ;;  %5299 = vmatprep.subr.mxu0 %v10254_v16  ;;  %vm4816_vm7 = vcmp.ge.f32.partialorder %v4784_v26, 0.0  ;;  %v4848_v14 = vmul.f32 0.2, %v4784_v26  ;;  %v5129_v59 = vadd.f32 %v5105_v9, %v9823_v49  ;;  %v5203_v57 = vsel %vm5155_vm3, %v5131_v43, %v5179_v0  ;;  %v4707_v9 = vld [vmem:[#allocation3 + $0x20] sm:$0xff] }
 0x3fa   : > { %6476 = vmatprep.subr.msk.mxu1 %vm3461_vm2, %v4897_v4  ;;  %v4863_v28 = vmul.f32 0.2, %v4799_v6  ;;  %v4783_v25 = vadd.f32 %v9823_v49, %v4747_v5  ;;  %v4762_v2 = vmul.f32 %v9817_v13, %v4726_v1  ;;  %v4881_v40 = vsel %vm4817_vm4, %v4785_v23, %v4849_v46 }
 0x3fb   : > { %v4896_v41 = vsel %vm4832_vm5, %v4800_v63, %v4864_v47  ;;  %vm4831_vm8 = vcmp.ge.f32.partialorder %v4799_v6, 0.0  ;;  %v5104_v33 = vmul.f32 %v5080_v7, %v9817_v13  ;;  %v5202_v36 = vsel %vm5154_vm6, %v5130_v20, %v5178_v61 }
 0x3fc   : > { %5927 = vmatpush1.xpose.msk.msra.mxu0 %vm3461_vm2, %v5203_v57  ;;  %v4880_v38 = vsel %vm4816_vm7, %v4784_v26, %v4848_v14  ;;  %v4798_v44 = vadd.f32 %v9823_v49, %v4762_v2  ;;  %v5177_v53 = vmul.f32 0.2, %v5129_v59  ;;  %v4746_v62 = vmul.f32 %v9817_v13, %v4710_v3  ;;  %v4706_v3 = vld [vmem:[#allocation3 + $0x18] sm:$0xff] }
 0x3fd   : > { %6477 = vmatpush3.xpose.msk.msra.mxu1 %vm3461_vm2, %v4881_v40  ;;  %5301 = vmatprep.subr.mxu0 %v10254_v16  ;;  %v5128_v12 = vadd.f32 %v5104_v33, %v9823_v49  ;;  %v4761_v60 = vmul.f32 %v9817_v13, %v4725_v37  ;;  %v4895_v29 = vsel %vm4831_vm8, %v4799_v6, %v4863_v28  ;;  %vm5153_vm9 = vcmp.ge.f32.partialorder %v5129_v59, 0.0  ;;  %v5076_v33 = vld [vmem:[#allocation3 + $0x118] sm:$0xff]  ;;  %v4721_v37 = vld [vmem:[#allocation3 + $0x90] sm:$0xff] }
 0x3fe   : > { %6478 = vmatprep.subr.msk.mxu1 %vm3461_vm2, %v4896_v41  ;;  %v4847_v24 = vmul.f32 0.2, %v4783_v25  ;;  %v5103_v31 = vmul.f32 %v5079_v34, %v9817_v13  ;;  %vm4815_vm10 = vcmp.ge.f32.partialorder %v4783_v25, 0.0  ;;  %v4862_v27 = vmul.f32 0.2, %v4798_v44 }
 0x3ff   : > { %v4782_v11 = vadd.f32 %v9823_v49, %v4746_v62  ;;  %v4797_v45 = vadd.f32 %v9823_v49, %v4761_v60  ;;  %vm4830_vm11 = vcmp.ge.f32.partialorder %v4798_v44, 0.0  ;;  %v5176_v48 = vmul.f32 0.2, %v5128_v12 }
 0x400   : > { %5928 = vmatpush1.xpose.msk.msra.mxu0 %vm3461_vm2, %v5202_v36  ;;  %v5127_v51 = vadd.f32 %v5103_v31, %v9823_v49  ;;  %v4745_v43 = vmul.f32 %v9817_v13, %v4709_v56  ;;  %v5201_v50 = vsel %vm5153_vm9, %v5129_v59, %v5177_v53  ;;  %vm5152_vm12 = vcmp.ge.f32.partialorder %v5128_v12, 0.0  ;;  %v4705_v56 = vld [vmem:[#allocation3 + $0x10] sm:$0xff] }
 0x401   : > { %6479 = vmatpush3.xpose.msk.msra.mxu1 %vm3461_vm2, %v4880_v38  ;;  %5303 = vmatprep.subr.mxu0 %v10254_v16  ;;  %vm4814_vm13 = vcmp.ge.f32.partialorder %v4782_v11, 0.0  ;;  %v4846_v18 = vmul.f32 0.2, %v4782_v11  ;;  %v4879_v42 = vsel %vm4815_vm10, %v4783_v25, %v4847_v24  ;;  %vm4829_vm14 = vcmp.ge.f32.partialorder %v4797_v45, 0.0  ;;  %v5075_v24 = vld [vmem:[#allocation3 + $0x110] sm:$0xff] }
 0x402   : > { %6480 = vmatprep.subr.msk.mxu1 %vm3461_vm2, %v4895_v29  ;;  %v4861_v23 = vmul.f32 0.2, %v4797_v45  ;;  %v4781_v17 = vadd.f32 %v9823_v49, %v4745_v43  ;;  %v4894_v35 = vsel %vm4830_vm11, %v4798_v44, %v4862_v27  ;;  %v4760_v54 = vmul.f32 %v9817_v13, %v4724_v19 }
 0x403   : > { %v5102_v58 = vmul.f32 %v5078_v10, %v9817_v13  ;;  %v4744_v63 = vmul.f32 %v9817_v13, %v4708_v22  ;;  %v5200_v8 = vsel %vm5152_vm12, %v5128_v12, %v5176_v48  ;;  %v4878_v0 = vsel %vm4814_vm13, %v4782_v11, %v4846_v18 }
 0x404   : > { %5929 = vmatpush1.xpose.msk.msra.mxu0 %vm3461_vm2, %v5201_v50  ;;  %vm5151_vm15 = vcmp.ge.f32.partialorder %v5127_v51, 0.0  ;;  %v5175_v20 = vmul.f32 0.2, %v5127_v51  ;;  %v4893_v52 = vsel %vm4829_vm14, %v4797_v45, %v4861_v23  ;;  %v4796_v32 = vadd.f32 %v9823_v49, %v4760_v54  ;;  %v4720_v50 = vld [vmem:[#allocation3 + $0x88] sm:$0xff] }
 0x405   : > { %6481 = vmatpush3.xpose.msk.msra.mxu1 %vm3461_vm2, %v4879_v42  ;;  %5305 = vmatprep.subr.mxu0 %v10254_v16  ;;  %v5126_v30 = vadd.f32 %v5102_v58, %v9823_v49  ;;  %v4780_v46 = vadd.f32 %v9823_v49, %v4744_v63  ;;  %vm4813_vm0 = vcmp.ge.f32.partialorder %v4781_v17, 0.0  ;;  %v4845_v4 = vmul.f32 0.2, %v4781_v17  ;;  %v4704_v63 = vld [vmem:[#allocation3 + $0x8] sm:$0xff] }
 0x406   : > { %6482 = vmatprep.subr.msk.mxu1 %vm3461_vm2, %v4894_v35  ;;  %v4759_v47 = vmul.f32 %v9817_v13, %v4723_v21  ;;  %v5101_v26 = vmul.f32 %v5077_v55, %v9817_v13  ;;  %v4860_v61 = vmul.f32 0.2, %v4796_v32  ;;  %v4743_v5 = vmul.f32 %v9817_v13, %v4707_v9  ;;  %v5074_v35 = vld [vmem:[#allocation3 + $0x108] sm:$0xff] }
 0x407   : > { %v5174_v6 = vmul.f32 0.2, %v5126_v30  ;;  %v4758_v14 = vmul.f32 %v9817_v13, %v4722_v39  ;;  %vm4828_vm1 = vcmp.ge.f32.partialorder %v4796_v32, 0.0  ;;  %vm5150_vm3 = vcmp.ge.f32.partialorder %v5126_v30, 0.0 }
 0x408   : > { %5930 = vmatpush1.xpose.msk.msra.mxu0 %vm3461_vm2, %v5200_v8  ;;  %v4844_v59 = vmul.f32 0.2, %v4780_v46  ;;  %v4795_v1 = vadd.f32 %v9823_v49, %v4759_v47  ;;  %vm4812_vm4 = vcmp.ge.f32.partialorder %v4780_v46, 0.0  ;;  %v5125_v57 = vadd.f32 %v5101_v26, %v9823_v49  ;;  %v5073_v47 = vld [vmem:[#allocation3 + $0x100] sm:$0xff] }
 0x409   : > { %6483 = vmatpush3.xpose.msk.msra.mxu1 %vm3461_vm2, %v4878_v0  ;;  %5307 = vmatprep.subr.mxu0 %v10254_v16  ;;  %v5199_v28 = vsel %vm5151_vm15, %v5127_v51, %v5175_v20  ;;  %v4779_v25 = vadd.f32 %v9823_v49, %v4743_v5  ;;  %v4794_v2 = vadd.f32 %v9823_v49, %v4758_v14  ;;  %v4719_v0 = vld [vmem:[#allocation3 + $0x80] sm:$0xff] }
 0x40a   : > { %6484 = vmatprep.subr.msk.mxu1 %vm3461_vm2, %v4893_v52  ;;  %v4877_v7 = vsel %vm4813_vm0, %v4781_v17, %v4845_v4  ;;  %v4892_v40 = vsel %vm4828_vm1, %v4796_v32, %v4860_v61  ;;  %v5198_v41 = vsel %vm5150_vm3, %v5126_v30, %v5174_v6  ;;  %v4876_v36 = vsel %vm4812_vm4, %v4780_v46, %v4844_v59  ;;  %v4703_v61 = vld [vmem:[#allocation3] sm:$0xff] }
 0x40b   : > { %vm4827_vm5 = vcmp.ge.f32.partialorder %v4795_v1, 0.0  ;;  %v4859_v38 = vmul.f32 0.2, %v4795_v1  ;;  %v5100_v44 = vmul.f32 %v5076_v33, %v9817_v13  ;;  %vm5149_vm6 = vcmp.ge.f32.partialorder %v5125_v57, 0.0 }
 0x40c   : > { %5931 = vmatpush1.xpose.msk.msra.mxu0 %vm3461_vm2, %v5199_v28  ;;  %v5173_v53 = vmul.f32 0.2, %v5125_v57  ;;  %v4742_v12 = vmul.f32 %v9817_v13, %v4706_v3  ;;  %v4757_v62 = vmul.f32 %v9817_v13, %v4721_v37  ;;  %vm4811_vm7 = vcmp.ge.f32.partialorder %v4779_v25, 0.0  ;;  %v5095_v3 = vld [vmem:[#allocation3 + $0x1b0] sm:$0xff] }
 0x40d   : > { %6485 = vmatpush3.xpose.msk.msra.mxu1 %vm3461_vm2, %v4877_v7  ;;  %5309 = vmatprep.subr.mxu0 %v10254_v16  ;;  %v4843_v60 = vmul.f32 0.2, %v4779_v25  ;;  %v4858_v34 = vmul.f32 0.2, %v4794_v2  ;;  %v5124_v29 = vadd.f32 %v5100_v44, %v9823_v49  ;;  %vm4826_vm8 = vcmp.ge.f32.partialorder %v4794_v2, 0.0 }
 0x40e   : > { %6486 = vmatprep.subr.msk.mxu1 %vm3461_vm2, %v4892_v40  ;;  %v4778_v31 = vadd.f32 %v9823_v49, %v4742_v12  ;;  %v4793_v27 = vadd.f32 %v9823_v49, %v4757_v62  ;;  %v5099_v11 = vmul.f32 %v5075_v24, %v9817_v13  ;;  %v4891_v45 = vsel %vm4827_vm5, %v4795_v1, %v4859_v38 }
 0x40f   : > { %v5197_v48 = vsel %vm5149_vm6, %v5125_v57, %v5173_v53  ;;  %v4741_v43 = vmul.f32 %v9817_v13, %v4705_v56  ;;  %v4875_v18 = vsel %vm4811_vm7, %v4779_v25, %v4843_v60  ;;  %v4890_v42 = vsel %vm4826_vm8, %v4794_v2, %v4858_v34  ;;  %v5096_v25 = vld [vmem:[#allocation3 + $0x1b8] sm:$0xff] }
 0x410   : > { %5932 = vmatpush1.xpose.msk.msra.mxu0 %vm3461_vm2, %v5198_v41  ;;  %v5123_v51 = vadd.f32 %v5099_v11, %v9823_v49  ;;  %v5172_v23 = vmul.f32 0.2, %v5124_v29  ;;  %v4756_v17 = vmul.f32 %v9817_v13, %v4720_v50  ;;  %vm5148_vm9 = vcmp.ge.f32.partialorder %v5124_v29, 0.0  ;;  %v5092_v50 = vld [vmem:[#allocation3 + $0x198] sm:$0xff] }
 0x411   : > { %6487 = vmatpush3.xpose.msk.msra.mxu1 %vm3461_vm2, %v4876_v36  ;;  %5311 = vmatprep.subr.mxu0 %v10254_v16  ;;  %v4842_v19 = vmul.f32 0.2, %v4778_v31  ;;  %v4857_v10 = vmul.f32 0.2, %v4793_v27  ;;  %v4777_v22 = vadd.f32 %v9823_v49, %v4741_v43  ;;  %vm4810_vm10 = vcmp.ge.f32.partialorder %v4778_v31, 0.0 }
 0x412   : > { %6488 = vmatprep.subr.msk.mxu1 %vm3461_vm2, %v4891_v45  ;;  %vm4825_vm11 = vcmp.ge.f32.partialorder %v4793_v27, 0.0  ;;  %v4792_v54 = vadd.f32 %v9823_v49, %v4756_v17  ;;  %v5098_v58 = vmul.f32 %v5074_v35, %v9817_v13  ;;  %vm5147_vm12 = vcmp.ge.f32.partialorder %v5123_v51, 0.0  ;;  %v5093_v45 = vld [vmem:[#allocation3 + $0x1a0] sm:$0xff] }
 0x413   : > { %v4740_v8 = vmul.f32 %v9817_v13, %v4704_v63  ;;  %v5196_v20 = vsel %vm5148_vm9, %v5124_v29, %v5172_v23  ;;  %v5171_v52 = vmul.f32 0.2, %v5123_v51  ;;  %v4755_v30 = vmul.f32 %v9817_v13, %v4719_v0  ;;  %v5094_v29 = vld [vmem:[#allocation3 + $0x1a8] sm:$0xff] }
 0x414   : > { %5933 = vmatpush1.xpose.msk.msra.mxu0 %vm3461_vm2, %v5197_v48  ;;  %v5122_v32 = vadd.f32 %v5098_v58, %v9823_v49  ;;  %v4874_v46 = vsel %vm4810_vm10, %v4778_v31, %v4842_v19  ;;  %v4889_v21 = vsel %vm4825_vm11, %v4793_v27, %v4857_v10  ;;  %v4841_v55 = vmul.f32 0.2, %v4777_v22  ;;  %v5091_v19 = vld [vmem:[#allocation3 + $0x190] sm:$0xff]  ;;  %v5090_v58 = vld [vmem:[#allocation3 + $0x188] sm:$0xff] }
 0x415   : > { %6489 = vmatpush3.xpose.msk.msra.mxu1 %vm3461_vm2, %v4875_v18  ;;  %5313 = vmatprep.subr.mxu0 %v10254_v16  ;;  %v4776_v4 = vadd.f32 %v9823_v49, %v4740_v8  ;;  %vm4809_vm13 = vcmp.ge.f32.partialorder %v4777_v22, 0.0  ;;  %v4856_v26 = vmul.f32 0.2, %v4792_v54  ;;  %v4791_v9 = vadd.f32 %v9823_v49, %v4755_v30 }
 0x416   : > { %6490 = vmatprep.subr.msk.mxu1 %vm3461_vm2, %v4890_v42  ;;  %v5097_v39 = vmul.f32 %v5073_v47, %v9817_v13  ;;  %vm4824_vm14 = vcmp.ge.f32.partialorder %v4792_v54, 0.0  ;;  %v4739_v6 = vmul.f32 %v9817_v13, %v4703_v61  ;;  %v5195_v5 = vsel %vm5147_vm12, %v5123_v51, %v5171_v52  ;;  %v5089_v52 = vld [vmem:[#allocation3 + $0x180] sm:$0xff] }
 0x417   : > { %v5170_v14 = vmul.f32 0.2, %v5122_v32  ;;  %v4873_v1 = vsel %vm4809_vm13, %v4777_v22, %v4841_v55  ;;  %vm5146_vm15 = vcmp.ge.f32.partialorder %v5122_v32, 0.0  ;;  %v4840_v57 = vmul.f32 0.2, %v4776_v4 }
 0x418   : > { %5934 = vmatpush1.xpose.msk.msra.mxu0 %vm3461_vm2, %v5196_v20  ;;  %v5121_v59 = vadd.f32 %v5097_v39, %v9823_v49  ;;  %v4775_v28 = vadd.f32 %v9823_v49, %v4739_v6  ;;  %v4888_v2 = vsel %vm4824_vm14, %v4792_v54, %v4856_v26  ;;  %vm4808_vm0 = vcmp.ge.f32.partialorder %v4776_v4, 0.0 }
 0x419   : > { %6491 = vmatpush3.xpose.msk.msra.mxu1 %vm3461_vm2, %v4874_v46  ;;  %5315 = vmatprep.subr.mxu0 %v10254_v16  ;;  %v4855_v7 = vmul.f32 0.2, %v4791_v9  ;;  %v5120_v40 = vmul.f32 %v5096_v25, %v9817_v13  ;;  %vm4823_vm1 = vcmp.ge.f32.partialorder %v4791_v9, 0.0  ;;  %v5194_v41 = vsel %vm5146_vm15, %v5122_v32, %v5170_v14 }
 0x41a   : > { %6492 = vmatprep.subr.msk.mxu1 %vm3461_vm2, %v4889_v21  ;;  %v5169_v33 = vmul.f32 0.2, %v5121_v59  ;;  %v4872_v38 = vsel %vm4808_vm0, %v4776_v4, %v4840_v57  ;;  %vm5145_vm3 = vcmp.ge.f32.partialorder %v5121_v59, 0.0  ;;  %v4839_v44 = vmul.f32 0.2, %v4775_v28 }
 0x41b   : > { %v5144_v36 = vadd.f32 %v5120_v40, %v9823_v49  ;;  %v4887_v37 = vsel %vm4823_vm1, %v4791_v9, %v4855_v7  ;;  %vm4807_vm4 = vcmp.ge.f32.partialorder %v4775_v28, 0.0  ;;  %v5119_v53 = vmul.f32 %v5095_v3, %v9817_v13 }
 0x41c   : > { %5935 = vmatpush1.xpose.msk.msra.mxu0 %vm3461_vm2, %v5195_v5  ;;  %v5193_v12 = vsel %vm5145_vm3, %v5121_v59, %v5169_v33  ;;  %v4871_v34 = vsel %vm4807_vm4, %v4775_v28, %v4839_v44  ;;  %v5118_v24 = vmul.f32 %v5094_v29, %v9817_v13  ;;  %v5117_v56 = vmul.f32 %v5093_v45, %v9817_v13  ;;  %v10265_v44 = vld [vmem:[#allocation18_spill] sm:$0xff] }
 0x41d   : > { %6493 = vmatpush3.xpose.msk.msra.mxu1 %vm3461_vm2, %v4873_v1  ;;  %5317 = vmatprep.subr.mxu0 %v10254_v16  ;;  %v5192_v62 = vmul.f32 0.2, %v5144_v36  ;;  %v5143_v60 = vadd.f32 %v5119_v53, %v9823_v49  ;;  %vm5168_vm5 = vcmp.ge.f32.partialorder %v5144_v36, 0.0  ;;  %v5116_v18 = vmul.f32 %v5092_v50, %v9817_v13 }
 0x41e   : > { %6494 = vmatprep.subr.msk.mxu1 %vm3461_vm2, %v4888_v2  ;;  %v5142_v11 = vadd.f32 %v5118_v24, %v9823_v49  ;;  %v5141_v43 = vadd.f32 %v5117_v56, %v9823_v49  ;;  %v5115_v10 = vmul.f32 %v5091_v19, %v9817_v13  ;;  %v5114_v63 = vmul.f32 %v5090_v58, %v9817_v13 }
 0x41f   : > { %v5216_v31 = vsel %vm5168_vm5, %v5144_v36, %v5192_v62  ;;  %v5191_v27 = vmul.f32 0.2, %v5143_v60  ;;  %vm5167_vm6 = vcmp.ge.f32.partialorder %v5143_v60, 0.0  ;;  %v5140_v17 = vadd.f32 %v5116_v18, %v9823_v49 }
 0x420   : > { %5936 = vmatpush1.xpose.msk.msra.mxu0 %vm3461_vm2, %v5194_v41  ;;  %v5190_v51 = vmul.f32 0.2, %v5142_v11  ;;  %vm5166_vm7 = vcmp.ge.f32.partialorder %v5142_v11, 0.0  ;;  %v5189_v23 = vmul.f32 0.2, %v5141_v43  ;;  %vm5165_vm8 = vcmp.ge.f32.partialorder %v5141_v43, 0.0 }
 0x421   : > { %6495 = vmatpush3.xpose.msk.msra.mxu1 %vm3461_vm2, %v4872_v38  ;;  %5319 = vmatprep.subr.mxu0 %v10254_v16  ;;  %v5215_v48 = vsel %vm5167_vm6, %v5143_v60, %v5191_v27  ;;  %v5188_v35 = vmul.f32 0.2, %v5140_v17  ;;  %v5139_v54 = vadd.f32 %v5115_v10, %v9823_v49  ;;  %vm5164_vm9 = vcmp.ge.f32.partialorder %v5140_v17, 0.0 }
 0x422   : > { %6496 = vmatprep.subr.msk.mxu1 %vm3461_vm2, %v4887_v37  ;;  %v5214_v42 = vsel %vm5166_vm7, %v5142_v11, %v5190_v51  ;;  %v5213_v22 = vsel %vm5165_vm8, %v5141_v43, %v5189_v23  ;;  %v5138_v20 = vadd.f32 %v5114_v63, %v9823_v49  ;;  %v5113_v32 = vmul.f32 %v5089_v52, %v9817_v13 }
 0x423   : > { %v5212_v8 = vsel %vm5164_vm9, %v5140_v17, %v5188_v35  ;;  %v5187_v0 = vmul.f32 0.2, %v5139_v54  ;;  %vm5163_vm10 = vcmp.ge.f32.partialorder %v5139_v54, 0.0  ;;  %v7334_v2 = vmov 1966171168  }
 0x424   : > { %5937 = vmatpush1.xpose.msk.msra.mxu0 %vm3461_vm2, %v5193_v12  ;;  %v5186_v46 = vmul.f32 0.2, %v5138_v20  ;;  %v5137_v21 = vadd.f32 %v5113_v32, %v9823_v49  ;;  %vm5162_vm11 = vcmp.ge.f32.partialorder %v5138_v20, 0.0  ;;  %v5391_v7 = vunpack.c.l.s4 %v7334_v2 }
 0x425   : > { %6497 = vmatpush3.xpose.msk.msra.mxu1 %vm3461_vm2, %v4871_v34  ;;  %5337 = vmatprep.subr.mxu0 %v10254_v16  ;;  %v5211_v30 = vsel %vm5163_vm10, %v5139_v54, %v5187_v0  ;;  %v10266_v34 = vlaneseq }
 0x426   : > { %v5210_v55 = vsel %vm5162_vm11, %v5138_v20, %v5186_v46  ;;  %v5185_v4 = vmul.f32 0.2, %v5137_v21  ;;  %vm5161_vm12 = vcmp.ge.f32.partialorder %v5137_v21, 0.0  ;;  %v5392_v41 = vunpack.c.0.s8 %v5391_v7 }
 0x428   : > { %5938 = vmatpush2.xpose.msk.msra.mxu0 %vm3461_vm2, %v5216_v31  ;;  %6499 = vmatmul.mubr.msk.f32.vlgmr.msra.gmra.mxu1 %vm3461_vm2, %v9810_v15  ;;  %v5209_v47 = vsel %vm5161_vm12, %v5137_v21, %v5185_v4  ;;  %v5395_v3 = vsub.s32 %v5392_v41, %v10265_v44 }
 0x429   : > { %5339 = vmatprep.subr.mxu0 %v10254_v16 }
 0x42c   : > { %5939 = vmatpush2.xpose.msk.msra.mxu0 %vm3461_vm2, %v5215_v48 }
 0x42d   : > { %5341 = vmatprep.subr.mxu0 %v10254_v16 }
 0x430   : > { %5940 = vmatpush2.xpose.msk.msra.mxu0 %vm3461_vm2, %v5214_v42 }
 0x431   : > { %5343 = vmatprep.subr.mxu0 %v10254_v16 }
 0x434   : > { %5941 = vmatpush2.xpose.msk.msra.mxu0 %vm3461_vm2, %v5213_v22 }
 0x435   : > { %5345 = vmatprep.subr.mxu0 %v10254_v16 }
 0x438   : > { %5942 = vmatpush2.xpose.msk.msra.mxu0 %vm3461_vm2, %v5212_v8 }
 0x439   : > { %5347 = vmatprep.subr.mxu0 %v10254_v16 }
 0x43c   : > { %5943 = vmatpush2.xpose.msk.msra.mxu0 %vm3461_vm2, %v5211_v30 }
 0x43d   : > { %5349 = vmatprep.subr.mxu0 %v10254_v16 }
 0x440   : > { %5944 = vmatpush2.xpose.msk.msra.mxu0 %vm3461_vm2, %v5210_v55 }
 0x441   : > { %5351 = vmatprep.subr.mxu0 %v10254_v16 }
 0x444   : > { %5945 = vmatpush2.xpose.msk.msra.mxu0 %vm3461_vm2, %v5209_v47 }
 0x447   : > { %5946 = vmatmul.mubr.msk.f32.vlgmr.msra.gmra.mxu0 %vm3461_vm2, %v9810_v15  ;;  %vm5415_vm2 = vcmp.lt.s32.totalorder %v10266_v34, 448 }
 0x4e8   : > { %v5068_v13 = vpop.f32.mrf.mxu1 }
 0x4e9   : > { %v5947_v26 = vmul.f32 -1.442695, %v5068_v13 }
 0x4ea   : > { %v5070_v49 = vpop.f32.mrf.mxu1 }
 0x4eb   : > { %v5948_v9 = vmul.f32 -1.442695, %v5070_v49  ;;  %7253 = vpow2.f32 %v5947_v26 }
 0x4ed   : > { %7255 = vpow2.f32 %v5948_v9 }
 0x4f8   : > { %v7254_v16 = vpop.eup %7253 }
 0x4f9   : > { %v5372_v59 = vadd.f32 1.0, %v7254_v16 }
 0x4fa   : > { %v7256_v14 = vpop.eup %7255 }
 0x4fb   : > { %v5373_v1 = vadd.f32 1.0, %v7256_v14 }
 0x507   : > { %v5355_v39 = vpop.f32.mrf.mxu0 }
 0x508   : > { %v5949_v61 = vmul.f32 -1.442695, %v5355_v39 }
 0x509   : > { %v5357_v6 = vpop.f32.mrf.mxu0 }
 0x50a   : > { %7257 = vpow2.f32 %v5949_v61  ;;  %v5950_v5 = vmul.f32 -1.442695, %v5357_v6 }
 0x50c   : > { %7259 = vpow2.f32 %v5950_v5 }
 0x50d   : > { %7261 = vrcp.f32 %v5372_v59 }
 0x50e   : > { %7263 = vrcp.f32 %v5373_v1 }
 0x517   : > { %v7258_v57 = vpop.eup %7257 }
 0x518   : > { %v5374_v15 = vadd.f32 1.0, %v7258_v57 }
 0x519   : > { %v7260_v28 = vpop.eup %7259 }
 0x51a   : > { %v5375_v25 = vadd.f32 1.0, %v7260_v28  ;;  %7265 = vrcp.f32 %v5374_v15  ;;  %v7262_v40 = vpop.eup %7261 }
 0x51b   : > { %v7264_v33 = vpop.eup %7263 }
 0x51c   : > { %7267 = vrcp.f32 %v5375_v25  ;;  %v5388_v38 = vcombine.low %v7262_v40, %v7264_v33 }
 0x51e   : > { %v5396_v12 = vrot.slane %v5388_v38, %v5395_v3 }
 0x527   : > { %v7266_v36 = vpop.eup %7265 }
 0x529   : > { %v7268_v37 = vpop.eup %7267 }
 0x52a   : > { %v5389_v53 = vcombine.low %v7266_v36, %v7268_v37 }
 0x52c   : > { %v5403_v62 = vrot.slane %v5389_v53, %v5395_v3 }
 0x52e   : > { %v5404_v60 = vcombine.low %v5396_v12, %v5403_v62 }
 0x530   : > { %v5411_v29 = vrot.slane %v5404_v60, %v5395_v3 }
 0x532   : > { %5417 = vst.msk [vmem:[%s260_s13] sm:$0xf] %vm5415_vm2, %v5411_v29 }
 0x533   : > { %7284 = shalt.err (!%p7281_p3)
}
 0x534   : > { %s7285_s30 = scalar_lea.hbm %s5431_s17, 64  ;;  %s7289_s9 = scalar_lea.hbm %s10082_s5, 384 }
 0x535   : > { %p7286_p4 = scmp.ne.s32.totalorder %s5431_s17, %s7285_s30  ;;  %p7290_p9 = scmp.lt.s32.totalorder %s5431_s17, %s10082_s5 }
 0x536   : > { %p7291_p10 = scmp.lt.s32.totalorder %s7289_s9, %s7285_s30 }
 0x537   : > { %p7287_p7 = pnand %p7286_p4, %p7404_p5 }
 0x538   : > { %p7292_p11 = por %p7291_p10, %p7290_p9 }
 0x539   : > { %p7288_p8 = pneg %p7287_p7 }
 0x53b   : > { %p7293_p12 = pnand %p7292_p11, %p7288_p8 }
 0x53d   : > { %7296 = shalt.err (!%p7293_p12)
}
 0x53e   : > { %7210 = dma.vmem_to_hbm [thread:$0]  (%p7404_p5), %s5434_s14, 64, %s5431_s17, %s5419_s23  }
 0x53f PF: > { %p7216_p13 = scmp.ge.s32.totalorder %s7331_s21, 2  ;;  %s5445_s12 = sand.u32 1, %s7319_s18  }
 0x540   : > { %s5446_s13 = scalar_lea.sflag [#allocation5], %s5445_s12 }
 0x541   : > { %p7213_p0 = pnand %p7216_p13, %p7408_p6 }
 0x543   : > { %p7214_p1 = pneg %p7213_p0 }
 0x545   : > { %7314 = dma.done.wait (%p7214_p1), %s5446_s13, 64  }
 0x546   : > { %7316 = vsyncadd (%p7214_p1), %s5446_s13, 4294967232  ;;  %p15_p2 = scmp.ge.s32.totalorder %s7391_s24, 8   ;;  %s10267_s18 = smov %s7323_s19 }
 0x547   : > { %s10268_s19 = smov %s7327_s20  ;;  %s10269_s20 = smov %s7402_s27 }
 0x548   : > { %s10270_s21 = smov %s7391_s24  ;;  %17 = sbr.rel (!%p15_p2) target bundleno = 3 (0x3), region = 84 }
 0x54d   :  { %5451 = vsyncpa [#allocation5], 1 }
 0x54e   :  { %5453 = vsyncpa [#allocation5 + $0x1], 1 }

</bundles_post_ra>
